<compile_context>
chip_gen: v7x
topology: tpu7x:2x2x1
jax: 0.10.0
libtpu: 0.0.40
codegen_flags: <defaults>
</compile_context>

<pallas_src>
import functools

import jax
import jax.numpy as jnp
from jax.experimental import pallas as pl
from jax.experimental.pallas import tpu as pltpu


# ---------------------------------------------------------------------------
# Fused kernel: one grid step = one time block of BOTH directions
#   forward  direction consumes time block i          (local steps 0..ts-1)
#   backward direction consumes time block n_blk-1-i  (local steps ts-1..0)
# ---------------------------------------------------------------------------
def _bilstm_kernel(x_f_ref, x_b_ref, w_ih_ref, w_hh_ref, b_ref,
                   out_f_ref, out_b_ref,
                   gx_f, gx_b, h_f, c_f, h_b, c_b,
                   *, ts, batch, Hp, pad):
    """x_f_ref/x_b_ref : (ts*B, E)   time blocks of x (fwd / bwd order)
       w_ih_ref        : (2, E, 4Hp) input weights, dir 0=fwd, 1=bwd
       w_hh_ref        : (2, Hp, 4Hp) recurrent weights
       b_ref           : (2, 1, 4Hp) f32 folded biases (b_ih + b_hh)
       out_f_ref/out_b_ref : (ts, B, Hp) f32 hidden outputs of this block
       gx_f/gx_b       : (ts*B, 4Hp) f32 VMEM scratch (fused input proj)
       h_f/c_f/h_b/c_b : (B, Hp) f32 recurrent state carried across blocks
    """
    i = pl.program_id(0)
    G3 = 3 * Hp

    @pl.when(i == 0)
    def _():
        # zero initial state (matches the module's build_hidden()).
        h_f[...] = jnp.zeros_like(h_f)
        c_f[...] = jnp.zeros_like(c_f)
        h_b[...] = jnp.zeros_like(h_b)
        c_b[...] = jnp.zeros_like(c_b)

    # ---- fused input projection for this pair of time blocks (one big,
    #      MXU-friendly matmul per direction; no gx HBM round-trip) ----
    gx_f[...] = (jnp.dot(x_f_ref[...], w_ih_ref[0],
                         preferred_element_type=jnp.float32) + b_ref[0])
    gx_b[...] = (jnp.dot(x_b_ref[...], w_ih_ref[1],
                         preferred_element_type=jnp.float32) + b_ref[1])

    # Resident recurrent weights, split so the o-gate dot is independent of
    # the i/f/g -> c -> tanh(c) critical path.  Slices are lane-aligned
    # (Hp % 128 == 0).  Hoisted out of the unrolled loop.
    wf_ifg = w_hh_ref[0, :, :G3]
    wf_o = w_hh_ref[0, :, G3:]
    wb_ifg = w_hh_ref[1, :, :G3]
    wb_o = w_hh_ref[1, :, G3:]
    mmdt = wf_ifg.dtype

    def sigmoid(v):
        # exact identity sigmoid(x) = 0.5*(1 + tanh(x/2)): EUP-only, no divide.
        return 0.5 * jnp.tanh(0.5 * v) + 0.5

    def cell(h, c, gx_row, w_ifg, w_o):
        hmm = h.astype(mmdt)
        # i/f/g part of the recurrent matmul feeds the serial chain ...
        ifg = gx_row[:, :G3] + jnp.dot(hmm, w_ifg,
                                       preferred_element_type=jnp.float32)
        # ... while the o-gate quarter can overlap the EUP work below.
        og = gx_row[:, G3:] + jnp.dot(hmm, w_o,
                                      preferred_element_type=jnp.float32)
        i_g = sigmoid(ifg[:, :Hp])               # PyTorch gate order [i,f,g,o]
        f_g = sigmoid(ifg[:, Hp:2 * Hp])
        g_g = jnp.tanh(ifg[:, 2 * Hp:])
        c_new = f_g * c + i_g * g_g
        h_new = sigmoid(og) * jnp.tanh(c_new)
        return h_new, c_new

    hf, cf = h_f[...], c_f[...]
    hb, cb = h_b[...], c_b[...]
    is_first_block = i == 0

    # Statically unrolled: every gx / out index below is a compile-time
    # constant -> plain static vld/vst.  Interleaving fwd/bwd per step gives
    # two independent dependence chains for the latency-bound recurrence.
    # (At very large B*H, reduce `time_block` to limit vreg pressure.)
    for j in range(ts):
        # ---------------- forward: local step j (global t = i*ts + j) -------
        hf, cf = cell(hf, cf, gx_f[j * batch:(j + 1) * batch, :],
                      wf_ifg, wf_o)
        out_f_ref[j] = hf.astype(out_f_ref.dtype)

        # ---------------- backward: local step ts-1-j of block n_blk-1-i ----
        jb = ts - 1 - j
        hb_n, cb_n = cell(hb, cb, gx_b[jb * batch:(jb + 1) * batch, :],
                          wb_ifg, wb_o)
        if pad and jb >= ts - pad:
            # Padded timesteps (t >= T) exist only in the last time block,
            # which the backward direction visits at grid step 0: keep the
            # zero initial state there so the first REAL bwd step (t = T-1)
            # starts from zeros.  Static branch; the select only exists for
            # the (at most `pad`) affected unrolled steps.
            hb = jnp.where(is_first_block, hb, hb_n)
            cb = jnp.where(is_first_block, cb, cb_n)
        else:
            hb, cb = hb_n, cb_n
        out_b_ref[jb] = hb.astype(out_b_ref.dtype)

    h_f[...] = hf
    c_f[...] = cf
    h_b[...] = hb
    c_b[...] = cb


# ---------------------------------------------------------------------------
# Helpers
# ---------------------------------------------------------------------------
def _round_up(v, m):
    return ((v + m - 1) // m) * m


def _pad_gate_cols(w, H, Hp):
    """(..., 4H) -> (..., 4Hp): zero-pad each gate block's columns to Hp."""
    if Hp == H:
        return w
    lead = w.shape[:-1]
    w4 = w.reshape(lead + (4, H))
    w4 = jnp.pad(w4, [(0, 0)] * (len(lead) + 1) + [(0, Hp - H)])
    return w4.reshape(lead + (4 * Hp,))


def _pick_time_block(cap, T, B, E, Hp, mm_bytes, budget_bytes, pin_weights):
    """Largest time block <= cap whose (double-buffered) VMEM footprint fits
    the budget -- sizes the pipeline for v7x's 64 MiB as well as v5e/v6e."""
    wbuf = 1 if pin_weights else 2
    fixed = (wbuf * 2 * E * 4 * Hp * mm_bytes        # W_ih (both dirs)
             + wbuf * 2 * Hp * 4 * Hp * mm_bytes     # W_hh
             + wbuf * 2 * 4 * Hp * 4                 # bias (f32)
             + 4 * B * Hp * 4)                       # h/c carries
    per_ts = (2 * 2 * B * E * mm_bytes               # x fwd/bwd, double-buf
              + 2 * 2 * B * Hp * 4                   # out fwd/bwd, double-buf
              + 2 * B * 4 * Hp * 4)                  # gx scratch fwd/bwd
    ts = max(1, min(cap, T))
    while ts > 1 and fixed + ts * per_ts > budget_bytes:
        ts -= 1
    return ts


# ---------------------------------------------------------------------------
# Wrapper
# ---------------------------------------------------------------------------
def bilstm_pallas(x, params, hidden_dim, *, time_block=8,
                  matmul_dtype=jnp.bfloat16,
                  vmem_limit_bytes=64 * 1024 * 1024,
                  pin_weights=False):
    """x: (T, B, E) float32.

    params: (w_ih (2, E, 4H), w_hh (2, H, 4H), bias (2, 1, 4H)) float32,
            direction 0 = forward, 1 = backward; bias = b_ih + b_hh folded,
            gate order [i, f, g, o] (PyTorch nn.LSTM layout, transposed).

    Returns (permuted_hidden (B, 2H), lstm_out (T, B, 2H)), both float32.

    Per-chip knobs: v5e/v6e -> raise vmem_limit_bytes (~100 MiB) for large
    shapes; v7x -> keep <= ~56 MiB and set pin_weights=True so the resident
    weights are not double-buffered.
    """
    T, B, E = x.shape
    H = hidden_dim
    Hp = _round_up(H, 128)                    # lane-align the hidden dim
    w_ih, w_hh, bias = params

    # ---- pad the gate dimension (and W_hh rows) of the parameters to Hp ----
    w_ih_p = _pad_gate_cols(w_ih, H, Hp)                          # (2, E, 4Hp)
    w_hh_p = _pad_gate_cols(w_hh, H, Hp)                          # (2, H, 4Hp)
    if Hp != H:
        w_hh_p = jnp.pad(w_hh_p, ((0, 0), (0, Hp - H), (0, 0)))   # (2, Hp,4Hp)
    bias_p = _pad_gate_cols(bias, H, Hp).astype(jnp.float32)      # (2, 1, 4Hp)

    mm_bytes = jnp.dtype(matmul_dtype).itemsize
    ts = _pick_time_block(time_block, T, B, E, Hp, mm_bytes,
                          budget_bytes=int(0.75 * vmem_limit_bytes),
                          pin_weights=pin_weights)
    n_blk = -(-T // ts)
    T_pad = n_blk * ts
    pad_t = T_pad - T

    x_p = jnp.pad(x, ((0, pad_t), (0, 0), (0, 0))) if pad_t else x
    x_mm = x_p.astype(matmul_dtype).reshape(n_blk, ts * B, E)
    w_ih_mm = w_ih_p.astype(matmul_dtype)
    w_hh_mm = w_hh_p.astype(matmul_dtype)

    kern = functools.partial(_bilstm_kernel, ts=ts, batch=B, Hp=Hp, pad=pad_t)

    def wspec(block_shape, index_map):
        if pin_weights:
            # v7x: constant-index resident weights -> single-buffered.
            return pl.BlockSpec(block_shape, index_map,
                                pipeline_mode=pl.Buffered(1))
        return pl.BlockSpec(block_shape, index_map)

    out_f, out_b = pl.pallas_call(
        kern,
        out_shape=(jax.ShapeDtypeStruct((T_pad, B, Hp), jnp.float32),
                   jax.ShapeDtypeStruct((T_pad, B, Hp), jnp.float32)),
        grid_spec=pltpu.PrefetchScalarGridSpec(
            num_scalar_prefetch=0,
            grid=(n_blk,),
            in_specs=[
                # x streamed once per direction (fwd block i, bwd block
                # n_blk-1-i); the fused projection removed the gx HBM pass.
                pl.BlockSpec((None, ts * B, E), lambda i: (i, 0, 0)),
                pl.BlockSpec((None, ts * B, E),
                             lambda i: (n_blk - 1 - i, 0, 0)),
                wspec((2, E, 4 * Hp), lambda i: (0, 0, 0)),    # W_ih resident
                wspec((2, Hp, 4 * Hp), lambda i: (0, 0, 0)),   # W_hh resident
                wspec((2, 1, 4 * Hp), lambda i: (0, 0, 0)),    # bias resident
            ],
            out_specs=[
                pl.BlockSpec((ts, B, Hp), lambda i: (i, 0, 0)),             # fwd
                pl.BlockSpec((ts, B, Hp), lambda i: (n_blk - 1 - i, 0, 0)),  # bwd
            ],
            scratch_shapes=[
                pltpu.VMEM((ts * B, 4 * Hp), jnp.float32),   # gx fwd block
                pltpu.VMEM((ts * B, 4 * Hp), jnp.float32),   # gx bwd block
                pltpu.VMEM((B, Hp), jnp.float32),            # h fwd
                pltpu.VMEM((B, Hp), jnp.float32),            # c fwd
                pltpu.VMEM((B, Hp), jnp.float32),            # h bwd
                pltpu.VMEM((B, Hp), jnp.float32),            # c bwd
            ],
        ),
        compiler_params=pltpu.CompilerParams(
            dimension_semantics=("arbitrary",),      # sequential recurrence
            vmem_limit_bytes=vmem_limit_bytes),
    )(x_mm, x_mm, w_ih_mm, w_hh_mm, bias_p)

    out_f = out_f[:T, :, :H]                       # drop T / H padding
    out_b = out_b[:T, :, :H]
    lstm_out = jnp.concatenate([out_f, out_b], axis=-1)          # (T, B, 2H)
    # PyTorch: hidden[0].permute(1,0,2).view(B, 2H) == [h_fwd(T-1) | h_bwd(0)]
    permuted_hidden = jnp.concatenate([out_f[T - 1], out_b[0]], axis=-1)
    return permuted_hidden, lstm_out


# ---------------------------------------------------------------------------
# Pure-JAX single-direction reference (correctness check)
# ---------------------------------------------------------------------------
def _lstm_scan_ref(x, w_ih, w_hh, b, H):
    B = x.shape[1]

    def step(carry, xt):
        h, c = carry
        gates = xt @ w_ih + h @ w_hh + b
        i = jax.nn.sigmoid(gates[:, 0:H])
        f = jax.nn.sigmoid(gates[:, H:2 * H])
        g = jnp.tanh(gates[:, 2 * H:3 * H])
        o = jax.nn.sigmoid(gates[:, 3 * H:4 * H])
        c = f * c + i * g
        h = o * jnp.tanh(c)
        return (h, c), h

    init = (jnp.zeros((B, H), jnp.float32), jnp.zeros((B, H), jnp.float32))
    _, hs = jax.lax.scan(step, init, x)
    return hs


def make_params(key, embedding_dim, hidden_dim):
    """nn.LSTM-style init: uniform(-1/sqrt(H), 1/sqrt(H)).  Kernel layout,
    stacked over direction (0=fwd, 1=bwd): w_ih (2,E,4H), w_hh (2,H,4H),
    bias (2,1,4H) with b_ih + b_hh folded."""
    H, E = hidden_dim, embedding_dim
    k = jax.random.split(key, 8)
    s = 1.0 / jnp.sqrt(jnp.float32(H))
    u = lambda kk, shape: jax.random.uniform(kk, shape, jnp.float32, -s, s)
    w_ih = jnp.stack([u(k[0], (E, 4 * H)), u(k[4], (E, 4 * H))])
    w_hh = jnp.stack([u(k[1], (H, 4 * H)), u(k[5], (H, 4 * H))])
    bias = jnp.stack([u(k[2], (1, 4 * H)) + u(k[3], (1, 4 * H)),
                      u(k[6], (1, 4 * H)) + u(k[7], (1, 4 * H))])
    return w_ih, w_hh, bias


if __name__ == "__main__":
    # Main config: lane-aligned H, T divisible by the time block.
    T, B, E, H = 16, 8, 32, 128
    key = jax.random.PRNGKey(0)
    kx, kp = jax.random.split(key)
    x = jax.random.normal(kx, (T, B, E), jnp.float32)
    params = make_params(kp, E, H)

    w_ih, w_hh, bias = params
    ref_f = _lstm_scan_ref(x, w_ih[0], w_hh[0], bias[0], H)
    ref_b = _lstm_scan_ref(x[::-1], w_ih[1], w_hh[1], bias[1], H)[::-1]
    ref_out = jnp.concatenate([ref_f, ref_b], axis=-1)
    ref_hid = jnp.concatenate([ref_f[-1], ref_b[0]], axis=-1)

    # ---- f32 matmul path: tight check against the scan reference ----
    fwd_f32 = jax.jit(functools.partial(
        bilstm_pallas, hidden_dim=H, time_block=8, matmul_dtype=jnp.float32))
    hid_f32, out_f32 = fwd_f32(x, params)
    jax.block_until_ready((hid_f32, out_f32))
    assert out_f32.shape == (T, B, 2 * H) and hid_f32.shape == (B, 2 * H)
    assert jnp.max(jnp.abs(out_f32 - ref_out)) < 5e-4
    assert jnp.max(jnp.abs(hid_f32 - ref_hid)) < 5e-4

    # ---- bf16 matmul path (fast production default): looser tolerance ----
    fwd_bf16 = jax.jit(functools.partial(
        bilstm_pallas, hidden_dim=H, time_block=8, matmul_dtype=jnp.bfloat16))
    hid_bf16, out_bf16 = fwd_bf16(x, params)
    jax.block_until_ready((hid_bf16, out_bf16))
    assert jnp.max(jnp.abs(out_bf16 - ref_out)) < 5e-2
    assert jnp.max(jnp.abs(hid_bf16 - ref_hid)) < 5e-2

    # ---- unaligned config: H=32 (padded to 128 lanes) and T=12 not a
    #      multiple of the time block (exercises padded-timestep masking) ----
    T2, B2, E2, H2 = 12, 4, 16, 32
    x2 = jax.random.normal(jax.random.PRNGKey(1), (T2, B2, E2), jnp.float32)
    params2 = make_params(jax.random.PRNGKey(2), E2, H2)
    hid2, out2 = jax.jit(functools.partial(
        bilstm_pallas, hidden_dim=H2, time_block=8,
        matmul_dtype=jnp.float32))(x2, params2)
    jax.block_until_ready((hid2, out2))
    w2i, w2h, b2 = params2
    r_f = _lstm_scan_ref(x2, w2i[0], w2h[0], b2[0], H2)
    r_b = _lstm_scan_ref(x2[::-1], w2i[1], w2h[1], b2[1], H2)[::-1]
    assert jnp.max(jnp.abs(out2 - jnp.concatenate([r_f, r_b], -1))) < 5e-4
    assert jnp.max(jnp.abs(
        hid2 - jnp.concatenate([r_f[-1], r_b[0]], -1))) < 5e-4

    print("KERNEL_OK")
</pallas_src>

<mosaic_0001>
module attributes {stable_mosaic.version = 11 : i64} {
  func.func @_bilstm_kernel(%arg0: i32, %arg1: memref<1x64x32xf32, #tpu.memory_space<vmem>>, %arg2: memref<1x64x32xf32, #tpu.memory_space<vmem>>, %arg3: memref<2x32x512xf32, #tpu.memory_space<vmem>>, %arg4: memref<2x128x512xf32, #tpu.memory_space<vmem>>, %arg5: memref<2x1x512xf32, #tpu.memory_space<vmem>>, %arg6: memref<8x8x128xf32, #tpu.memory_space<vmem>>, %arg7: memref<8x8x128xf32, #tpu.memory_space<vmem>>, %arg8: memref<64x512xf32, #tpu.memory_space<vmem>>, %arg9: memref<64x512xf32, #tpu.memory_space<vmem>>, %arg10: memref<8x128xf32, #tpu.memory_space<vmem>>, %arg11: memref<8x128xf32, #tpu.memory_space<vmem>>, %arg12: memref<8x128xf32, #tpu.memory_space<vmem>>, %arg13: memref<8x128xf32, #tpu.memory_space<vmem>>) attributes {dimension_semantics = [#tpu.dimension_semantics<arbitrary>], iteration_bounds = array<i64: 2>, scalar_prefetch = 0 : i64, scratch_operands = 6 : i64, tpu.core_type = #tpu.core_type<tc>, window_params = [{transform_indices = @transform_0, window_bounds = array<i64: 1, 64, 32>}, {transform_indices = @transform_1, window_bounds = array<i64: 1, 64, 32>}, {pipeline_mode = #tpu.pipeline_mode<synchronous>, transform_indices = @transform_2, window_bounds = array<i64: 2, 32, 512>}, {pipeline_mode = #tpu.pipeline_mode<synchronous>, transform_indices = @transform_3, window_bounds = array<i64: 2, 128, 512>}, {pipeline_mode = #tpu.pipeline_mode<synchronous>, transform_indices = @transform_4, window_bounds = array<i64: 2, 1, 512>}, {transform_indices = @transform_5, window_bounds = array<i64: 8, 8, 128>}, {transform_indices = @transform_6, window_bounds = array<i64: 8, 8, 128>}]} {
    %c0_i32 = arith.constant 0 : i32
    %0 = arith.cmpi eq, %arg0, %c0_i32 : i32
    %1 = arith.extui %0 : i1 to i32
    %c0_i32_0 = arith.constant 0 : i32
    %2 = arith.cmpi ne, %1, %c0_i32_0 : i32
    scf.if %2 {
      %cst_292 = arith.constant 0.000000e+00 : f32
      %679 = vector.broadcast %cst_292 : f32 to vector<8x128xf32>
      %c0_293 = arith.constant 0 : index
      %c0_294 = arith.constant 0 : index
      %680 = vector.load %arg10[%c0_293, %c0_294] : memref<8x128xf32, #tpu.memory_space<vmem>>, vector<8x128xf32>
      tpu.vector_store %arg10[%c0_293, %c0_294], %679 {strides = array<i32>} : memref<8x128xf32, #tpu.memory_space<vmem>>, vector<8x128xf32>,
      %cst_295 = arith.constant 0.000000e+00 : f32
      %681 = vector.broadcast %cst_295 : f32 to vector<8x128xf32>
      %c0_296 = arith.constant 0 : index
      %c0_297 = arith.constant 0 : index
      %682 = vector.load %arg11[%c0_296, %c0_297] : memref<8x128xf32, #tpu.memory_space<vmem>>, vector<8x128xf32>
      tpu.vector_store %arg11[%c0_296, %c0_297], %681 {strides = array<i32>} : memref<8x128xf32, #tpu.memory_space<vmem>>, vector<8x128xf32>,
      %cst_298 = arith.constant 0.000000e+00 : f32
      %683 = vector.broadcast %cst_298 : f32 to vector<8x128xf32>
      %c0_299 = arith.constant 0 : index
      %c0_300 = arith.constant 0 : index
      %684 = vector.load %arg12[%c0_299, %c0_300] : memref<8x128xf32, #tpu.memory_space<vmem>>, vector<8x128xf32>
      tpu.vector_store %arg12[%c0_299, %c0_300], %683 {strides = array<i32>} : memref<8x128xf32, #tpu.memory_space<vmem>>, vector<8x128xf32>,
      %cst_301 = arith.constant 0.000000e+00 : f32
      %685 = vector.broadcast %cst_301 : f32 to vector<8x128xf32>
      %c0_302 = arith.constant 0 : index
      %c0_303 = arith.constant 0 : index
      %686 = vector.load %arg13[%c0_302, %c0_303] : memref<8x128xf32, #tpu.memory_space<vmem>>, vector<8x128xf32>
      tpu.vector_store %arg13[%c0_302, %c0_303], %685 {strides = array<i32>} : memref<8x128xf32, #tpu.memory_space<vmem>>, vector<8x128xf32>,
    } else {
    }
    %c0 = arith.constant 0 : index
    %c0_1 = arith.constant 0 : index
    %c0_2 = arith.constant 0 : index
    %3 = vector.load %arg1[%c0, %c0_1, %c0_2] : memref<1x64x32xf32, #tpu.memory_space<vmem>>, vector<1x64x32xf32>
    %4 = vector.shape_cast %3 : vector<1x64x32xf32> to vector<64x32xf32>
    %c0_3 = arith.constant 0 : index
    %c0_4 = arith.constant 0 : index
    %c0_5 = arith.constant 0 : index
    %5 = vector.load %arg3[%c0_3, %c0_4, %c0_5] : memref<2x32x512xf32, #tpu.memory_space<vmem>>, vector<1x32x512xf32>
    %6 = vector.shape_cast %5 : vector<1x32x512xf32> to vector<32x512xf32>
    %cst = arith.constant dense<0.000000e+00> : vector<64x512xf32>
    %7 = tpu.matmul %4, %6, %cst {dimension_numbers = #tpu.dot_dimension_numbers<[1], [0], [0], [1], [0, 0, 1, 1], [], []>} : vector<64x32xf32>, vector<32x512xf32>, vector<64x512xf32> -> vector<64x512xf32>
    %c0_6 = arith.constant 0 : index
    %c0_7 = arith.constant 0 : index
    %c0_8 = arith.constant 0 : index
    %8 = vector.load %arg5[%c0_6, %c0_7, %c0_8] : memref<2x1x512xf32, #tpu.memory_space<vmem>>, vector<1x1x512xf32>
    %9 = vector.shape_cast %8 : vector<1x1x512xf32> to vector<1x512xf32>
    %10 = vector.broadcast %9 : vector<1x512xf32> to vector<64x512xf32>
    %11 = arith.addf %7, %10 : vector<64x512xf32>
    %c0_9 = arith.constant 0 : index
    %c0_10 = arith.constant 0 : index
    %12 = vector.load %arg8[%c0_9, %c0_10] : memref<64x512xf32, #tpu.memory_space<vmem>>, vector<64x512xf32>
    tpu.vector_store %arg8[%c0_9, %c0_10], %11 {strides = array<i32>} : memref<64x512xf32, #tpu.memory_space<vmem>>, vector<64x512xf32>,
    %c0_11 = arith.constant 0 : index
    %c0_12 = arith.constant 0 : index
    %c0_13 = arith.constant 0 : index
    %13 = vector.load %arg2[%c0_11, %c0_12, %c0_13] : memref<1x64x32xf32, #tpu.memory_space<vmem>>, vector<1x64x32xf32>
    %14 = vector.shape_cast %13 : vector<1x64x32xf32> to vector<64x32xf32>
    %c1 = arith.constant 1 : index
    %c0_14 = arith.constant 0 : index
    %c0_15 = arith.constant 0 : index
    %15 = vector.load %arg3[%c1, %c0_14, %c0_15] : memref<2x32x512xf32, #tpu.memory_space<vmem>>, vector<1x32x512xf32>
    %16 = vector.shape_cast %15 : vector<1x32x512xf32> to vector<32x512xf32>
    %cst_16 = arith.constant dense<0.000000e+00> : vector<64x512xf32>
    %17 = tpu.matmul %14, %16, %cst_16 {dimension_numbers = #tpu.dot_dimension_numbers<[1], [0], [0], [1], [0, 0, 1, 1], [], []>} : vector<64x32xf32>, vector<32x512xf32>, vector<64x512xf32> -> vector<64x512xf32>
    %c1_17 = arith.constant 1 : index
    %c0_18 = arith.constant 0 : index
    %c0_19 = arith.constant 0 : index
    %18 = vector.load %arg5[%c1_17, %c0_18, %c0_19] : memref<2x1x512xf32, #tpu.memory_space<vmem>>, vector<1x1x512xf32>
    %19 = vector.shape_cast %18 : vector<1x1x512xf32> to vector<1x512xf32>
    %20 = vector.broadcast %19 : vector<1x512xf32> to vector<64x512xf32>
    %21 = arith.addf %17, %20 : vector<64x512xf32>
    %c0_20 = arith.constant 0 : index
    %c0_21 = arith.constant 0 : index
    %22 = vector.load %arg9[%c0_20, %c0_21] : memref<64x512xf32, #tpu.memory_space<vmem>>, vector<64x512xf32>
    tpu.vector_store %arg9[%c0_20, %c0_21], %21 {strides = array<i32>} : memref<64x512xf32, #tpu.memory_space<vmem>>, vector<64x512xf32>,
    %c0_22 = arith.constant 0 : index
    %c0_23 = arith.constant 0 : index
    %c0_24 = arith.constant 0 : index
    %23 = vector.load %arg4[%c0_22, %c0_23, %c0_24] : memref<2x128x512xf32, #tpu.memory_space<vmem>>, vector<1x128x384xf32>
    %24 = vector.shape_cast %23 : vector<1x128x384xf32> to vector<128x384xf32>
    %c0_25 = arith.constant 0 : index
    %c0_26 = arith.constant 0 : index
    %c384 = arith.constant 384 : index
    %25 = vector.load %arg4[%c0_25, %c0_26, %c384] : memref<2x128x512xf32, #tpu.memory_space<vmem>>, vector<1x128x128xf32>
    %26 = vector.shape_cast %25 : vector<1x128x128xf32> to vector<128x128xf32>
    %c1_27 = arith.constant 1 : index
    %c0_28 = arith.constant 0 : index
    %c0_29 = arith.constant 0 : index
    %27 = vector.load %arg4[%c1_27, %c0_28, %c0_29] : memref<2x128x512xf32, #tpu.memory_space<vmem>>, vector<1x128x384xf32>
    %28 = vector.shape_cast %27 : vector<1x128x384xf32> to vector<128x384xf32>
    %c1_30 = arith.constant 1 : index
    %c0_31 = arith.constant 0 : index
    %c384_32 = arith.constant 384 : index
    %29 = vector.load %arg4[%c1_30, %c0_31, %c384_32] : memref<2x128x512xf32, #tpu.memory_space<vmem>>, vector<1x128x128xf32>
    %30 = vector.shape_cast %29 : vector<1x128x128xf32> to vector<128x128xf32>
    %c0_33 = arith.constant 0 : index
    %c0_34 = arith.constant 0 : index
    %31 = vector.load %arg10[%c0_33, %c0_34] : memref<8x128xf32, #tpu.memory_space<vmem>>, vector<8x128xf32>
    %c0_35 = arith.constant 0 : index
    %c0_36 = arith.constant 0 : index
    %32 = vector.load %arg11[%c0_35, %c0_36] : memref<8x128xf32, #tpu.memory_space<vmem>>, vector<8x128xf32>
    %c0_37 = arith.constant 0 : index
    %c0_38 = arith.constant 0 : index
    %33 = vector.load %arg12[%c0_37, %c0_38] : memref<8x128xf32, #tpu.memory_space<vmem>>, vector<8x128xf32>
    %c0_39 = arith.constant 0 : index
    %c0_40 = arith.constant 0 : index
    %34 = vector.load %arg13[%c0_39, %c0_40] : memref<8x128xf32, #tpu.memory_space<vmem>>, vector<8x128xf32>
    %c0_41 = arith.constant 0 : index
    %c0_42 = arith.constant 0 : index
    %35 = vector.load %arg8[%c0_41, %c0_42] : memref<64x512xf32, #tpu.memory_space<vmem>>, vector<8x512xf32>
    %36 = vector.extract_strided_slice %35 {offsets = [0, 0], sizes = [8, 384], strides = [1, 1]} : vector<8x512xf32> to vector<8x384xf32>
    %cst_43 = arith.constant dense<0.000000e+00> : vector<8x384xf32>
    %37 = tpu.matmul %31, %24, %cst_43 {dimension_numbers = #tpu.dot_dimension_numbers<[1], [0], [0], [1], [0, 0, 1, 1], [], []>} : vector<8x128xf32>, vector<128x384xf32>, vector<8x384xf32> -> vector<8x384xf32>
    %38 = arith.addf %36, %37 : vector<8x384xf32>
    %39 = vector.extract_strided_slice %35 {offsets = [0, 384], sizes = [8, 128], strides = [1, 1]} : vector<8x512xf32> to vector<8x128xf32>
    %cst_44 = arith.constant dense<0.000000e+00> : vector<8x128xf32>
    %40 = tpu.matmul %31, %26, %cst_44 {dimension_numbers = #tpu.dot_dimension_numbers<[1], [0], [0], [1], [0, 0, 1, 1], [], []>} : vector<8x128xf32>, vector<128x128xf32>, vector<8x128xf32> -> vector<8x128xf32>
    %41 = arith.addf %39, %40 : vector<8x128xf32>
    %42 = vector.extract_strided_slice %38 {offsets = [0, 0], sizes = [8, 128], strides = [1, 1]} : vector<8x384xf32> to vector<8x128xf32>
    %cst_45 = arith.constant 5.000000e-01 : f32
    %43 = vector.broadcast %cst_45 : f32 to vector<8x128xf32>
    %44 = arith.mulf %43, %42 : vector<8x128xf32>
    %45 = math.tanh %44 : vector<8x128xf32>
    %cst_46 = arith.constant 5.000000e-01 : f32
    %46 = vector.broadcast %cst_46 : f32 to vector<8x128xf32>
    %47 = arith.mulf %46, %45 : vector<8x128xf32>
    %cst_47 = arith.constant 5.000000e-01 : f32
    %48 = vector.broadcast %cst_47 : f32 to vector<8x128xf32>
    %49 = arith.addf %47, %48 : vector<8x128xf32>
    %50 = vector.extract_strided_slice %38 {offsets = [0, 128], sizes = [8, 128], strides = [1, 1]} : vector<8x384xf32> to vector<8x128xf32>
    %cst_48 = arith.constant 5.000000e-01 : f32
    %51 = vector.broadcast %cst_48 : f32 to vector<8x128xf32>
    %52 = arith.mulf %51, %50 : vector<8x128xf32>
    %53 = math.tanh %52 : vector<8x128xf32>
    %cst_49 = arith.constant 5.000000e-01 : f32
    %54 = vector.broadcast %cst_49 : f32 to vector<8x128xf32>
    %55 = arith.mulf %54, %53 : vector<8x128xf32>
    %cst_50 = arith.constant 5.000000e-01 : f32
    %56 = vector.broadcast %cst_50 : f32 to vector<8x128xf32>
    %57 = arith.addf %55, %56 : vector<8x128xf32>
    %58 = vector.extract_strided_slice %38 {offsets = [0, 256], sizes = [8, 128], strides = [1, 1]} : vector<8x384xf32> to vector<8x128xf32>
    %59 = math.tanh %58 : vector<8x128xf32>
    %60 = arith.mulf %57, %32 : vector<8x128xf32>
    %61 = arith.mulf %49, %59 : vector<8x128xf32>
    %62 = arith.addf %60, %61 : vector<8x128xf32>
    %cst_51 = arith.constant 5.000000e-01 : f32
    %63 = vector.broadcast %cst_51 : f32 to vector<8x128xf32>
    %64 = arith.mulf %63, %41 : vector<8x128xf32>
    %65 = math.tanh %64 : vector<8x128xf32>
    %cst_52 = arith.constant 5.000000e-01 : f32
    %66 = vector.broadcast %cst_52 : f32 to vector<8x128xf32>
    %67 = arith.mulf %66, %65 : vector<8x128xf32>
    %cst_53 = arith.constant 5.000000e-01 : f32
    %68 = vector.broadcast %cst_53 : f32 to vector<8x128xf32>
    %69 = arith.addf %67, %68 : vector<8x128xf32>
    %70 = math.tanh %62 : vector<8x128xf32>
    %71 = arith.mulf %69, %70 : vector<8x128xf32>
    %c0_54 = arith.constant 0 : index
    %c0_55 = arith.constant 0 : index
    %c0_56 = arith.constant 0 : index
    %72 = vector.load %arg6[%c0_54, %c0_55, %c0_56] : memref<8x8x128xf32, #tpu.memory_space<vmem>>, vector<1x8x128xf32>
    %73 = vector.shape_cast %72 : vector<1x8x128xf32> to vector<8x128xf32>
    %74 = vector.shape_cast %71 : vector<8x128xf32> to vector<1x8x128xf32>
    tpu.vector_store %arg6[%c0_54, %c0_55, %c0_56], %74 {strides = array<i32>} : memref<8x8x128xf32, #tpu.memory_space<vmem>>, vector<1x8x128xf32>,
    %c56 = arith.constant 56 : index
    %c0_57 = arith.constant 0 : index
    %75 = vector.load %arg9[%c56, %c0_57] : memref<64x512xf32, #tpu.memory_space<vmem>>, vector<8x512xf32>
    %76 = vector.extract_strided_slice %75 {offsets = [0, 0], sizes = [8, 384], strides = [1, 1]} : vector<8x512xf32> to vector<8x384xf32>
    %cst_58 = arith.constant dense<0.000000e+00> : vector<8x384xf32>
    %77 = tpu.matmul %33, %28, %cst_58 {dimension_numbers = #tpu.dot_dimension_numbers<[1], [0], [0], [1], [0, 0, 1, 1], [], []>} : vector<8x128xf32>, vector<128x384xf32>, vector<8x384xf32> -> vector<8x384xf32>
    %78 = arith.addf %76, %77 : vector<8x384xf32>
    %79 = vector.extract_strided_slice %75 {offsets = [0, 384], sizes = [8, 128], strides = [1, 1]} : vector<8x512xf32> to vector<8x128xf32>
    %cst_59 = arith.constant dense<0.000000e+00> : vector<8x128xf32>
    %80 = tpu.matmul %33, %30, %cst_59 {dimension_numbers = #tpu.dot_dimension_numbers<[1], [0], [0], [1], [0, 0, 1, 1], [], []>} : vector<8x128xf32>, vector<128x128xf32>, vector<8x128xf32> -> vector<8x128xf32>
    %81 = arith.addf %79, %80 : vector<8x128xf32>
    %82 = vector.extract_strided_slice %78 {offsets = [0, 0], sizes = [8, 128], strides = [1, 1]} : vector<8x384xf32> to vector<8x128xf32>
    %cst_60 = arith.constant 5.000000e-01 : f32
    %83 = vector.broadcast %cst_60 : f32 to vector<8x128xf32>
    %84 = arith.mulf %83, %82 : vector<8x128xf32>
    %85 = math.tanh %84 : vector<8x128xf32>
    %cst_61 = arith.constant 5.000000e-01 : f32
    %86 = vector.broadcast %cst_61 : f32 to vector<8x128xf32>
    %87 = arith.mulf %86, %85 : vector<8x128xf32>
    %cst_62 = arith.constant 5.000000e-01 : f32
    %88 = vector.broadcast %cst_62 : f32 to vector<8x128xf32>
    %89 = arith.addf %87, %88 : vector<8x128xf32>
    %90 = vector.extract_strided_slice %78 {offsets = [0, 128], sizes = [8, 128], strides = [1, 1]} : vector<8x384xf32> to vector<8x128xf32>
    %cst_63 = arith.constant 5.000000e-01 : f32
    %91 = vector.broadcast %cst_63 : f32 to vector<8x128xf32>
    %92 = arith.mulf %91, %90 : vector<8x128xf32>
    %93 = math.tanh %92 : vector<8x128xf32>
    %cst_64 = arith.constant 5.000000e-01 : f32
    %94 = vector.broadcast %cst_64 : f32 to vector<8x128xf32>
    %95 = arith.mulf %94, %93 : vector<8x128xf32>
    %cst_65 = arith.constant 5.000000e-01 : f32
    %96 = vector.broadcast %cst_65 : f32 to vector<8x128xf32>
    %97 = arith.addf %95, %96 : vector<8x128xf32>
    %98 = vector.extract_strided_slice %78 {offsets = [0, 256], sizes = [8, 128], strides = [1, 1]} : vector<8x384xf32> to vector<8x128xf32>
    %99 = math.tanh %98 : vector<8x128xf32>
    %100 = arith.mulf %97, %34 : vector<8x128xf32>
    %101 = arith.mulf %89, %99 : vector<8x128xf32>
    %102 = arith.addf %100, %101 : vector<8x128xf32>
    %cst_66 = arith.constant 5.000000e-01 : f32
    %103 = vector.broadcast %cst_66 : f32 to vector<8x128xf32>
    %104 = arith.mulf %103, %81 : vector<8x128xf32>
    %105 = math.tanh %104 : vector<8x128xf32>
    %cst_67 = arith.constant 5.000000e-01 : f32
    %106 = vector.broadcast %cst_67 : f32 to vector<8x128xf32>
    %107 = arith.mulf %106, %105 : vector<8x128xf32>
    %cst_68 = arith.constant 5.000000e-01 : f32
    %108 = vector.broadcast %cst_68 : f32 to vector<8x128xf32>
    %109 = arith.addf %107, %108 : vector<8x128xf32>
    %110 = math.tanh %102 : vector<8x128xf32>
    %111 = arith.mulf %109, %110 : vector<8x128xf32>
    %c7 = arith.constant 7 : index
    %c0_69 = arith.constant 0 : index
    %c0_70 = arith.constant 0 : index
    %112 = vector.load %arg7[%c7, %c0_69, %c0_70] : memref<8x8x128xf32, #tpu.memory_space<vmem>>, vector<1x8x128xf32>
    %113 = vector.shape_cast %112 : vector<1x8x128xf32> to vector<8x128xf32>
    %114 = vector.shape_cast %111 : vector<8x128xf32> to vector<1x8x128xf32>
    tpu.vector_store %arg7[%c7, %c0_69, %c0_70], %114 {strides = array<i32>} : memref<8x8x128xf32, #tpu.memory_space<vmem>>, vector<1x8x128xf32>,
    %c8 = arith.constant 8 : index
    %c0_71 = arith.constant 0 : index
    %115 = vector.load %arg8[%c8, %c0_71] : memref<64x512xf32, #tpu.memory_space<vmem>>, vector<8x512xf32>
    %116 = vector.extract_strided_slice %115 {offsets = [0, 0], sizes = [8, 384], strides = [1, 1]} : vector<8x512xf32> to vector<8x384xf32>
    %cst_72 = arith.constant dense<0.000000e+00> : vector<8x384xf32>
    %117 = tpu.matmul %71, %24, %cst_72 {dimension_numbers = #tpu.dot_dimension_numbers<[1], [0], [0], [1], [0, 0, 1, 1], [], []>} : vector<8x128xf32>, vector<128x384xf32>, vector<8x384xf32> -> vector<8x384xf32>
    %118 = arith.addf %116, %117 : vector<8x384xf32>
    %119 = vector.extract_strided_slice %115 {offsets = [0, 384], sizes = [8, 128], strides = [1, 1]} : vector<8x512xf32> to vector<8x128xf32>
    %cst_73 = arith.constant dense<0.000000e+00> : vector<8x128xf32>
    %120 = tpu.matmul %71, %26, %cst_73 {dimension_numbers = #tpu.dot_dimension_numbers<[1], [0], [0], [1], [0, 0, 1, 1], [], []>} : vector<8x128xf32>, vector<128x128xf32>, vector<8x128xf32> -> vector<8x128xf32>
    %121 = arith.addf %119, %120 : vector<8x128xf32>
    %122 = vector.extract_strided_slice %118 {offsets = [0, 0], sizes = [8, 128], strides = [1, 1]} : vector<8x384xf32> to vector<8x128xf32>
    %cst_74 = arith.constant 5.000000e-01 : f32
    %123 = vector.broadcast %cst_74 : f32 to vector<8x128xf32>
    %124 = arith.mulf %123, %122 : vector<8x128xf32>
    %125 = math.tanh %124 : vector<8x128xf32>
    %cst_75 = arith.constant 5.000000e-01 : f32
    %126 = vector.broadcast %cst_75 : f32 to vector<8x128xf32>
    %127 = arith.mulf %126, %125 : vector<8x128xf32>
    %cst_76 = arith.constant 5.000000e-01 : f32
    %128 = vector.broadcast %cst_76 : f32 to vector<8x128xf32>
    %129 = arith.addf %127, %128 : vector<8x128xf32>
    %130 = vector.extract_strided_slice %118 {offsets = [0, 128], sizes = [8, 128], strides = [1, 1]} : vector<8x384xf32> to vector<8x128xf32>
    %cst_77 = arith.constant 5.000000e-01 : f32
    %131 = vector.broadcast %cst_77 : f32 to vector<8x128xf32>
    %132 = arith.mulf %131, %130 : vector<8x128xf32>
    %133 = math.tanh %132 : vector<8x128xf32>
    %cst_78 = arith.constant 5.000000e-01 : f32
    %134 = vector.broadcast %cst_78 : f32 to vector<8x128xf32>
    %135 = arith.mulf %134, %133 : vector<8x128xf32>
    %cst_79 = arith.constant 5.000000e-01 : f32
    %136 = vector.broadcast %cst_79 : f32 to vector<8x128xf32>
    %137 = arith.addf %135, %136 : vector<8x128xf32>
    %138 = vector.extract_strided_slice %118 {offsets = [0, 256], sizes = [8, 128], strides = [1, 1]} : vector<8x384xf32> to vector<8x128xf32>
    %139 = math.tanh %138 : vector<8x128xf32>
    %140 = arith.mulf %137, %62 : vector<8x128xf32>
    %141 = arith.mulf %129, %139 : vector<8x128xf32>
    %142 = arith.addf %140, %141 : vector<8x128xf32>
    %cst_80 = arith.constant 5.000000e-01 : f32
    %143 = vector.broadcast %cst_80 : f32 to vector<8x128xf32>
    %144 = arith.mulf %143, %121 : vector<8x128xf32>
    %145 = math.tanh %144 : vector<8x128xf32>
    %cst_81 = arith.constant 5.000000e-01 : f32
    %146 = vector.broadcast %cst_81 : f32 to vector<8x128xf32>
    %147 = arith.mulf %146, %145 : vector<8x128xf32>
    %cst_82 = arith.constant 5.000000e-01 : f32
    %148 = vector.broadcast %cst_82 : f32 to vector<8x128xf32>
    %149 = arith.addf %147, %148 : vector<8x128xf32>
    %150 = math.tanh %142 : vector<8x128xf32>
    %151 = arith.mulf %149, %150 : vector<8x128xf32>
    %c1_83 = arith.constant 1 : index
    %c0_84 = arith.constant 0 : index
    %c0_85 = arith.constant 0 : index
    %152 = vector.load %arg6[%c1_83, %c0_84, %c0_85] : memref<8x8x128xf32, #tpu.memory_space<vmem>>, vector<1x8x128xf32>
    %153 = vector.shape_cast %152 : vector<1x8x128xf32> to vector<8x128xf32>
    %154 = vector.shape_cast %151 : vector<8x128xf32> to vector<1x8x128xf32>
    tpu.vector_store %arg6[%c1_83, %c0_84, %c0_85], %154 {strides = array<i32>} : memref<8x8x128xf32, #tpu.memory_space<vmem>>, vector<1x8x128xf32>,
    %c48 = arith.constant 48 : index
    %c0_86 = arith.constant 0 : index
    %155 = vector.load %arg9[%c48, %c0_86] : memref<64x512xf32, #tpu.memory_space<vmem>>, vector<8x512xf32>
    %156 = vector.extract_strided_slice %155 {offsets = [0, 0], sizes = [8, 384], strides = [1, 1]} : vector<8x512xf32> to vector<8x384xf32>
    %cst_87 = arith.constant dense<0.000000e+00> : vector<8x384xf32>
    %157 = tpu.matmul %111, %28, %cst_87 {dimension_numbers = #tpu.dot_dimension_numbers<[1], [0], [0], [1], [0, 0, 1, 1], [], []>} : vector<8x128xf32>, vector<128x384xf32>, vector<8x384xf32> -> vector<8x384xf32>
    %158 = arith.addf %156, %157 : vector<8x384xf32>
    %159 = vector.extract_strided_slice %155 {offsets = [0, 384], sizes = [8, 128], strides = [1, 1]} : vector<8x512xf32> to vector<8x128xf32>
    %cst_88 = arith.constant dense<0.000000e+00> : vector<8x128xf32>
    %160 = tpu.matmul %111, %30, %cst_88 {dimension_numbers = #tpu.dot_dimension_numbers<[1], [0], [0], [1], [0, 0, 1, 1], [], []>} : vector<8x128xf32>, vector<128x128xf32>, vector<8x128xf32> -> vector<8x128xf32>
    %161 = arith.addf %159, %160 : vector<8x128xf32>
    %162 = vector.extract_strided_slice %158 {offsets = [0, 0], sizes = [8, 128], strides = [1, 1]} : vector<8x384xf32> to vector<8x128xf32>
    %cst_89 = arith.constant 5.000000e-01 : f32
    %163 = vector.broadcast %cst_89 : f32 to vector<8x128xf32>
    %164 = arith.mulf %163, %162 : vector<8x128xf32>
    %165 = math.tanh %164 : vector<8x128xf32>
    %cst_90 = arith.constant 5.000000e-01 : f32
    %166 = vector.broadcast %cst_90 : f32 to vector<8x128xf32>
    %167 = arith.mulf %166, %165 : vector<8x128xf32>
    %cst_91 = arith.constant 5.000000e-01 : f32
    %168 = vector.broadcast %cst_91 : f32 to vector<8x128xf32>
    %169 = arith.addf %167, %168 : vector<8x128xf32>
    %170 = vector.extract_strided_slice %158 {offsets = [0, 128], sizes = [8, 128], strides = [1, 1]} : vector<8x384xf32> to vector<8x128xf32>
    %cst_92 = arith.constant 5.000000e-01 : f32
    %171 = vector.broadcast %cst_92 : f32 to vector<8x128xf32>
    %172 = arith.mulf %171, %170 : vector<8x128xf32>
    %173 = math.tanh %172 : vector<8x128xf32>
    %cst_93 = arith.constant 5.000000e-01 : f32
    %174 = vector.broadcast %cst_93 : f32 to vector<8x128xf32>
    %175 = arith.mulf %174, %173 : vector<8x128xf32>
    %cst_94 = arith.constant 5.000000e-01 : f32
    %176 = vector.broadcast %cst_94 : f32 to vector<8x128xf32>
    %177 = arith.addf %175, %176 : vector<8x128xf32>
    %178 = vector.extract_strided_slice %158 {offsets = [0, 256], sizes = [8, 128], strides = [1, 1]} : vector<8x384xf32> to vector<8x128xf32>
    %179 = math.tanh %178 : vector<8x128xf32>
    %180 = arith.mulf %177, %102 : vector<8x128xf32>
    %181 = arith.mulf %169, %179 : vector<8x128xf32>
    %182 = arith.addf %180, %181 : vector<8x128xf32>
    %cst_95 = arith.constant 5.000000e-01 : f32
    %183 = vector.broadcast %cst_95 : f32 to vector<8x128xf32>
    %184 = arith.mulf %183, %161 : vector<8x128xf32>
    %185 = math.tanh %184 : vector<8x128xf32>
    %cst_96 = arith.constant 5.000000e-01 : f32
    %186 = vector.broadcast %cst_96 : f32 to vector<8x128xf32>
    %187 = arith.mulf %186, %185 : vector<8x128xf32>
    %cst_97 = arith.constant 5.000000e-01 : f32
    %188 = vector.broadcast %cst_97 : f32 to vector<8x128xf32>
    %189 = arith.addf %187, %188 : vector<8x128xf32>
    %190 = math.tanh %182 : vector<8x128xf32>
    %191 = arith.mulf %189, %190 : vector<8x128xf32>
    %c6 = arith.constant 6 : index
    %c0_98 = arith.constant 0 : index
    %c0_99 = arith.constant 0 : index
    %192 = vector.load %arg7[%c6, %c0_98, %c0_99] : memref<8x8x128xf32, #tpu.memory_space<vmem>>, vector<1x8x128xf32>
    %193 = vector.shape_cast %192 : vector<1x8x128xf32> to vector<8x128xf32>
    %194 = vector.shape_cast %191 : vector<8x128xf32> to vector<1x8x128xf32>
    tpu.vector_store %arg7[%c6, %c0_98, %c0_99], %194 {strides = array<i32>} : memref<8x8x128xf32, #tpu.memory_space<vmem>>, vector<1x8x128xf32>,
    %c16 = arith.constant 16 : index
    %c0_100 = arith.constant 0 : index
    %195 = vector.load %arg8[%c16, %c0_100] : memref<64x512xf32, #tpu.memory_space<vmem>>, vector<8x512xf32>
    %196 = vector.extract_strided_slice %195 {offsets = [0, 0], sizes = [8, 384], strides = [1, 1]} : vector<8x512xf32> to vector<8x384xf32>
    %cst_101 = arith.constant dense<0.000000e+00> : vector<8x384xf32>
    %197 = tpu.matmul %151, %24, %cst_101 {dimension_numbers = #tpu.dot_dimension_numbers<[1], [0], [0], [1], [0, 0, 1, 1], [], []>} : vector<8x128xf32>, vector<128x384xf32>, vector<8x384xf32> -> vector<8x384xf32>
    %198 = arith.addf %196, %197 : vector<8x384xf32>
    %199 = vector.extract_strided_slice %195 {offsets = [0, 384], sizes = [8, 128], strides = [1, 1]} : vector<8x512xf32> to vector<8x128xf32>
    %cst_102 = arith.constant dense<0.000000e+00> : vector<8x128xf32>
    %200 = tpu.matmul %151, %26, %cst_102 {dimension_numbers = #tpu.dot_dimension_numbers<[1], [0], [0], [1], [0, 0, 1, 1], [], []>} : vector<8x128xf32>, vector<128x128xf32>, vector<8x128xf32> -> vector<8x128xf32>
    %201 = arith.addf %199, %200 : vector<8x128xf32>
    %202 = vector.extract_strided_slice %198 {offsets = [0, 0], sizes = [8, 128], strides = [1, 1]} : vector<8x384xf32> to vector<8x128xf32>
    %cst_103 = arith.constant 5.000000e-01 : f32
    %203 = vector.broadcast %cst_103 : f32 to vector<8x128xf32>
    %204 = arith.mulf %203, %202 : vector<8x128xf32>
    %205 = math.tanh %204 : vector<8x128xf32>
    %cst_104 = arith.constant 5.000000e-01 : f32
    %206 = vector.broadcast %cst_104 : f32 to vector<8x128xf32>
    %207 = arith.mulf %206, %205 : vector<8x128xf32>
    %cst_105 = arith.constant 5.000000e-01 : f32
    %208 = vector.broadcast %cst_105 : f32 to vector<8x128xf32>
    %209 = arith.addf %207, %208 : vector<8x128xf32>
    %210 = vector.extract_strided_slice %198 {offsets = [0, 128], sizes = [8, 128], strides = [1, 1]} : vector<8x384xf32> to vector<8x128xf32>
    %cst_106 = arith.constant 5.000000e-01 : f32
    %211 = vector.broadcast %cst_106 : f32 to vector<8x128xf32>
    %212 = arith.mulf %211, %210 : vector<8x128xf32>
    %213 = math.tanh %212 : vector<8x128xf32>
    %cst_107 = arith.constant 5.000000e-01 : f32
    %214 = vector.broadcast %cst_107 : f32 to vector<8x128xf32>
    %215 = arith.mulf %214, %213 : vector<8x128xf32>
    %cst_108 = arith.constant 5.000000e-01 : f32
    %216 = vector.broadcast %cst_108 : f32 to vector<8x128xf32>
    %217 = arith.addf %215, %216 : vector<8x128xf32>
    %218 = vector.extract_strided_slice %198 {offsets = [0, 256], sizes = [8, 128], strides = [1, 1]} : vector<8x384xf32> to vector<8x128xf32>
    %219 = math.tanh %218 : vector<8x128xf32>
    %220 = arith.mulf %217, %142 : vector<8x128xf32>
    %221 = arith.mulf %209, %219 : vector<8x128xf32>
    %222 = arith.addf %220, %221 : vector<8x128xf32>
    %cst_109 = arith.constant 5.000000e-01 : f32
    %223 = vector.broadcast %cst_109 : f32 to vector<8x128xf32>
    %224 = arith.mulf %223, %201 : vector<8x128xf32>
    %225 = math.tanh %224 : vector<8x128xf32>
    %cst_110 = arith.constant 5.000000e-01 : f32
    %226 = vector.broadcast %cst_110 : f32 to vector<8x128xf32>
    %227 = arith.mulf %226, %225 : vector<8x128xf32>
    %cst_111 = arith.constant 5.000000e-01 : f32
    %228 = vector.broadcast %cst_111 : f32 to vector<8x128xf32>
    %229 = arith.addf %227, %228 : vector<8x128xf32>
    %230 = math.tanh %222 : vector<8x128xf32>
    %231 = arith.mulf %229, %230 : vector<8x128xf32>
    %c2 = arith.constant 2 : index
    %c0_112 = arith.constant 0 : index
    %c0_113 = arith.constant 0 : index
    %232 = vector.load %arg6[%c2, %c0_112, %c0_113] : memref<8x8x128xf32, #tpu.memory_space<vmem>>, vector<1x8x128xf32>
    %233 = vector.shape_cast %232 : vector<1x8x128xf32> to vector<8x128xf32>
    %234 = vector.shape_cast %231 : vector<8x128xf32> to vector<1x8x128xf32>
    tpu.vector_store %arg6[%c2, %c0_112, %c0_113], %234 {strides = array<i32>} : memref<8x8x128xf32, #tpu.memory_space<vmem>>, vector<1x8x128xf32>,
    %c40 = arith.constant 40 : index
    %c0_114 = arith.constant 0 : index
    %235 = vector.load %arg9[%c40, %c0_114] : memref<64x512xf32, #tpu.memory_space<vmem>>, vector<8x512xf32>
    %236 = vector.extract_strided_slice %235 {offsets = [0, 0], sizes = [8, 384], strides = [1, 1]} : vector<8x512xf32> to vector<8x384xf32>
    %cst_115 = arith.constant dense<0.000000e+00> : vector<8x384xf32>
    %237 = tpu.matmul %191, %28, %cst_115 {dimension_numbers = #tpu.dot_dimension_numbers<[1], [0], [0], [1], [0, 0, 1, 1], [], []>} : vector<8x128xf32>, vector<128x384xf32>, vector<8x384xf32> -> vector<8x384xf32>
    %238 = arith.addf %236, %237 : vector<8x384xf32>
    %239 = vector.extract_strided_slice %235 {offsets = [0, 384], sizes = [8, 128], strides = [1, 1]} : vector<8x512xf32> to vector<8x128xf32>
    %cst_116 = arith.constant dense<0.000000e+00> : vector<8x128xf32>
    %240 = tpu.matmul %191, %30, %cst_116 {dimension_numbers = #tpu.dot_dimension_numbers<[1], [0], [0], [1], [0, 0, 1, 1], [], []>} : vector<8x128xf32>, vector<128x128xf32>, vector<8x128xf32> -> vector<8x128xf32>
    %241 = arith.addf %239, %240 : vector<8x128xf32>
    %242 = vector.extract_strided_slice %238 {offsets = [0, 0], sizes = [8, 128], strides = [1, 1]} : vector<8x384xf32> to vector<8x128xf32>
    %cst_117 = arith.constant 5.000000e-01 : f32
    %243 = vector.broadcast %cst_117 : f32 to vector<8x128xf32>
    %244 = arith.mulf %243, %242 : vector<8x128xf32>
    %245 = math.tanh %244 : vector<8x128xf32>
    %cst_118 = arith.constant 5.000000e-01 : f32
    %246 = vector.broadcast %cst_118 : f32 to vector<8x128xf32>
    %247 = arith.mulf %246, %245 : vector<8x128xf32>
    %cst_119 = arith.constant 5.000000e-01 : f32
    %248 = vector.broadcast %cst_119 : f32 to vector<8x128xf32>
    %249 = arith.addf %247, %248 : vector<8x128xf32>
    %250 = vector.extract_strided_slice %238 {offsets = [0, 128], sizes = [8, 128], strides = [1, 1]} : vector<8x384xf32> to vector<8x128xf32>
    %cst_120 = arith.constant 5.000000e-01 : f32
    %251 = vector.broadcast %cst_120 : f32 to vector<8x128xf32>
    %252 = arith.mulf %251, %250 : vector<8x128xf32>
    %253 = math.tanh %252 : vector<8x128xf32>
    %cst_121 = arith.constant 5.000000e-01 : f32
    %254 = vector.broadcast %cst_121 : f32 to vector<8x128xf32>
    %255 = arith.mulf %254, %253 : vector<8x128xf32>
    %cst_122 = arith.constant 5.000000e-01 : f32
    %256 = vector.broadcast %cst_122 : f32 to vector<8x128xf32>
    %257 = arith.addf %255, %256 : vector<8x128xf32>
    %258 = vector.extract_strided_slice %238 {offsets = [0, 256], sizes = [8, 128], strides = [1, 1]} : vector<8x384xf32> to vector<8x128xf32>
    %259 = math.tanh %258 : vector<8x128xf32>
    %260 = arith.mulf %257, %182 : vector<8x128xf32>
    %261 = arith.mulf %249, %259 : vector<8x128xf32>
    %262 = arith.addf %260, %261 : vector<8x128xf32>
    %cst_123 = arith.constant 5.000000e-01 : f32
    %263 = vector.broadcast %cst_123 : f32 to vector<8x128xf32>
    %264 = arith.mulf %263, %241 : vector<8x128xf32>
    %265 = math.tanh %264 : vector<8x128xf32>
    %cst_124 = arith.constant 5.000000e-01 : f32
    %266 = vector.broadcast %cst_124 : f32 to vector<8x128xf32>
    %267 = arith.mulf %266, %265 : vector<8x128xf32>
    %cst_125 = arith.constant 5.000000e-01 : f32
    %268 = vector.broadcast %cst_125 : f32 to vector<8x128xf32>
    %269 = arith.addf %267, %268 : vector<8x128xf32>
    %270 = math.tanh %262 : vector<8x128xf32>
    %271 = arith.mulf %269, %270 : vector<8x128xf32>
    %c5 = arith.constant 5 : index
    %c0_126 = arith.constant 0 : index
    %c0_127 = arith.constant 0 : index
    %272 = vector.load %arg7[%c5, %c0_126, %c0_127] : memref<8x8x128xf32, #tpu.memory_space<vmem>>, vector<1x8x128xf32>
    %273 = vector.shape_cast %272 : vector<1x8x128xf32> to vector<8x128xf32>
    %274 = vector.shape_cast %271 : vector<8x128xf32> to vector<1x8x128xf32>
    tpu.vector_store %arg7[%c5, %c0_126, %c0_127], %274 {strides = array<i32>} : memref<8x8x128xf32, #tpu.memory_space<vmem>>, vector<1x8x128xf32>,
    %c24 = arith.constant 24 : index
    %c0_128 = arith.constant 0 : index
    %275 = vector.load %arg8[%c24, %c0_128] : memref<64x512xf32, #tpu.memory_space<vmem>>, vector<8x512xf32>
    %276 = vector.extract_strided_slice %275 {offsets = [0, 0], sizes = [8, 384], strides = [1, 1]} : vector<8x512xf32> to vector<8x384xf32>
    %cst_129 = arith.constant dense<0.000000e+00> : vector<8x384xf32>
    %277 = tpu.matmul %231, %24, %cst_129 {dimension_numbers = #tpu.dot_dimension_numbers<[1], [0], [0], [1], [0, 0, 1, 1], [], []>} : vector<8x128xf32>, vector<128x384xf32>, vector<8x384xf32> -> vector<8x384xf32>
    %278 = arith.addf %276, %277 : vector<8x384xf32>
    %279 = vector.extract_strided_slice %275 {offsets = [0, 384], sizes = [8, 128], strides = [1, 1]} : vector<8x512xf32> to vector<8x128xf32>
    %cst_130 = arith.constant dense<0.000000e+00> : vector<8x128xf32>
    %280 = tpu.matmul %231, %26, %cst_130 {dimension_numbers = #tpu.dot_dimension_numbers<[1], [0], [0], [1], [0, 0, 1, 1], [], []>} : vector<8x128xf32>, vector<128x128xf32>, vector<8x128xf32> -> vector<8x128xf32>
    %281 = arith.addf %279, %280 : vector<8x128xf32>
    %282 = vector.extract_strided_slice %278 {offsets = [0, 0], sizes = [8, 128], strides = [1, 1]} : vector<8x384xf32> to vector<8x128xf32>
    %cst_131 = arith.constant 5.000000e-01 : f32
    %283 = vector.broadcast %cst_131 : f32 to vector<8x128xf32>
    %284 = arith.mulf %283, %282 : vector<8x128xf32>
    %285 = math.tanh %284 : vector<8x128xf32>
    %cst_132 = arith.constant 5.000000e-01 : f32
    %286 = vector.broadcast %cst_132 : f32 to vector<8x128xf32>
    %287 = arith.mulf %286, %285 : vector<8x128xf32>
    %cst_133 = arith.constant 5.000000e-01 : f32
    %288 = vector.broadcast %cst_133 : f32 to vector<8x128xf32>
    %289 = arith.addf %287, %288 : vector<8x128xf32>
    %290 = vector.extract_strided_slice %278 {offsets = [0, 128], sizes = [8, 128], strides = [1, 1]} : vector<8x384xf32> to vector<8x128xf32>
    %cst_134 = arith.constant 5.000000e-01 : f32
    %291 = vector.broadcast %cst_134 : f32 to vector<8x128xf32>
    %292 = arith.mulf %291, %290 : vector<8x128xf32>
    %293 = math.tanh %292 : vector<8x128xf32>
    %cst_135 = arith.constant 5.000000e-01 : f32
    %294 = vector.broadcast %cst_135 : f32 to vector<8x128xf32>
    %295 = arith.mulf %294, %293 : vector<8x128xf32>
    %cst_136 = arith.constant 5.000000e-01 : f32
    %296 = vector.broadcast %cst_136 : f32 to vector<8x128xf32>
    %297 = arith.addf %295, %296 : vector<8x128xf32>
    %298 = vector.extract_strided_slice %278 {offsets = [0, 256], sizes = [8, 128], strides = [1, 1]} : vector<8x384xf32> to vector<8x128xf32>
    %299 = math.tanh %298 : vector<8x128xf32>
    %300 = arith.mulf %297, %222 : vector<8x128xf32>
    %301 = arith.mulf %289, %299 : vector<8x128xf32>
    %302 = arith.addf %300, %301 : vector<8x128xf32>
    %cst_137 = arith.constant 5.000000e-01 : f32
    %303 = vector.broadcast %cst_137 : f32 to vector<8x128xf32>
    %304 = arith.mulf %303, %281 : vector<8x128xf32>
    %305 = math.tanh %304 : vector<8x128xf32>
    %cst_138 = arith.constant 5.000000e-01 : f32
    %306 = vector.broadcast %cst_138 : f32 to vector<8x128xf32>
    %307 = arith.mulf %306, %305 : vector<8x128xf32>
    %cst_139 = arith.constant 5.000000e-01 : f32
    %308 = vector.broadcast %cst_139 : f32 to vector<8x128xf32>
    %309 = arith.addf %307, %308 : vector<8x128xf32>
    %310 = math.tanh %302 : vector<8x128xf32>
    %311 = arith.mulf %309, %310 : vector<8x128xf32>
    %c3 = arith.constant 3 : index
    %c0_140 = arith.constant 0 : index
    %c0_141 = arith.constant 0 : index
    %312 = vector.load %arg6[%c3, %c0_140, %c0_141] : memref<8x8x128xf32, #tpu.memory_space<vmem>>, vector<1x8x128xf32>
    %313 = vector.shape_cast %312 : vector<1x8x128xf32> to vector<8x128xf32>
    %314 = vector.shape_cast %311 : vector<8x128xf32> to vector<1x8x128xf32>
    tpu.vector_store %arg6[%c3, %c0_140, %c0_141], %314 {strides = array<i32>} : memref<8x8x128xf32, #tpu.memory_space<vmem>>, vector<1x8x128xf32>,
    %c32 = arith.constant 32 : index
    %c0_142 = arith.constant 0 : index
    %315 = vector.load %arg9[%c32, %c0_142] : memref<64x512xf32, #tpu.memory_space<vmem>>, vector<8x512xf32>
    %316 = vector.extract_strided_slice %315 {offsets = [0, 0], sizes = [8, 384], strides = [1, 1]} : vector<8x512xf32> to vector<8x384xf32>
    %cst_143 = arith.constant dense<0.000000e+00> : vector<8x384xf32>
    %317 = tpu.matmul %271, %28, %cst_143 {dimension_numbers = #tpu.dot_dimension_numbers<[1], [0], [0], [1], [0, 0, 1, 1], [], []>} : vector<8x128xf32>, vector<128x384xf32>, vector<8x384xf32> -> vector<8x384xf32>
    %318 = arith.addf %316, %317 : vector<8x384xf32>
    %319 = vector.extract_strided_slice %315 {offsets = [0, 384], sizes = [8, 128], strides = [1, 1]} : vector<8x512xf32> to vector<8x128xf32>
    %cst_144 = arith.constant dense<0.000000e+00> : vector<8x128xf32>
    %320 = tpu.matmul %271, %30, %cst_144 {dimension_numbers = #tpu.dot_dimension_numbers<[1], [0], [0], [1], [0, 0, 1, 1], [], []>} : vector<8x128xf32>, vector<128x128xf32>, vector<8x128xf32> -> vector<8x128xf32>
    %321 = arith.addf %319, %320 : vector<8x128xf32>
    %322 = vector.extract_strided_slice %318 {offsets = [0, 0], sizes = [8, 128], strides = [1, 1]} : vector<8x384xf32> to vector<8x128xf32>
    %cst_145 = arith.constant 5.000000e-01 : f32
    %323 = vector.broadcast %cst_145 : f32 to vector<8x128xf32>
    %324 = arith.mulf %323, %322 : vector<8x128xf32>
    %325 = math.tanh %324 : vector<8x128xf32>
    %cst_146 = arith.constant 5.000000e-01 : f32
    %326 = vector.broadcast %cst_146 : f32 to vector<8x128xf32>
    %327 = arith.mulf %326, %325 : vector<8x128xf32>
    %cst_147 = arith.constant 5.000000e-01 : f32
    %328 = vector.broadcast %cst_147 : f32 to vector<8x128xf32>
    %329 = arith.addf %327, %328 : vector<8x128xf32>
    %330 = vector.extract_strided_slice %318 {offsets = [0, 128], sizes = [8, 128], strides = [1, 1]} : vector<8x384xf32> to vector<8x128xf32>
    %cst_148 = arith.constant 5.000000e-01 : f32
    %331 = vector.broadcast %cst_148 : f32 to vector<8x128xf32>
    %332 = arith.mulf %331, %330 : vector<8x128xf32>
    %333 = math.tanh %332 : vector<8x128xf32>
    %cst_149 = arith.constant 5.000000e-01 : f32
    %334 = vector.broadcast %cst_149 : f32 to vector<8x128xf32>
    %335 = arith.mulf %334, %333 : vector<8x128xf32>
    %cst_150 = arith.constant 5.000000e-01 : f32
    %336 = vector.broadcast %cst_150 : f32 to vector<8x128xf32>
    %337 = arith.addf %335, %336 : vector<8x128xf32>
    %338 = vector.extract_strided_slice %318 {offsets = [0, 256], sizes = [8, 128], strides = [1, 1]} : vector<8x384xf32> to vector<8x128xf32>
    %339 = math.tanh %338 : vector<8x128xf32>
    %340 = arith.mulf %337, %262 : vector<8x128xf32>
    %341 = arith.mulf %329, %339 : vector<8x128xf32>
    %342 = arith.addf %340, %341 : vector<8x128xf32>
    %cst_151 = arith.constant 5.000000e-01 : f32
    %343 = vector.broadcast %cst_151 : f32 to vector<8x128xf32>
    %344 = arith.mulf %343, %321 : vector<8x128xf32>
    %345 = math.tanh %344 : vector<8x128xf32>
    %cst_152 = arith.constant 5.000000e-01 : f32
    %346 = vector.broadcast %cst_152 : f32 to vector<8x128xf32>
    %347 = arith.mulf %346, %345 : vector<8x128xf32>
    %cst_153 = arith.constant 5.000000e-01 : f32
    %348 = vector.broadcast %cst_153 : f32 to vector<8x128xf32>
    %349 = arith.addf %347, %348 : vector<8x128xf32>
    %350 = math.tanh %342 : vector<8x128xf32>
    %351 = arith.mulf %349, %350 : vector<8x128xf32>
    %c4 = arith.constant 4 : index
    %c0_154 = arith.constant 0 : index
    %c0_155 = arith.constant 0 : index
    %352 = vector.load %arg7[%c4, %c0_154, %c0_155] : memref<8x8x128xf32, #tpu.memory_space<vmem>>, vector<1x8x128xf32>
    %353 = vector.shape_cast %352 : vector<1x8x128xf32> to vector<8x128xf32>
    %354 = vector.shape_cast %351 : vector<8x128xf32> to vector<1x8x128xf32>
    tpu.vector_store %arg7[%c4, %c0_154, %c0_155], %354 {strides = array<i32>} : memref<8x8x128xf32, #tpu.memory_space<vmem>>, vector<1x8x128xf32>,
    %c32_156 = arith.constant 32 : index
    %c0_157 = arith.constant 0 : index
    %355 = vector.load %arg8[%c32_156, %c0_157] : memref<64x512xf32, #tpu.memory_space<vmem>>, vector<8x512xf32>
    %356 = vector.extract_strided_slice %355 {offsets = [0, 0], sizes = [8, 384], strides = [1, 1]} : vector<8x512xf32> to vector<8x384xf32>
    %cst_158 = arith.constant dense<0.000000e+00> : vector<8x384xf32>
    %357 = tpu.matmul %311, %24, %cst_158 {dimension_numbers = #tpu.dot_dimension_numbers<[1], [0], [0], [1], [0, 0, 1, 1], [], []>} : vector<8x128xf32>, vector<128x384xf32>, vector<8x384xf32> -> vector<8x384xf32>
    %358 = arith.addf %356, %357 : vector<8x384xf32>
    %359 = vector.extract_strided_slice %355 {offsets = [0, 384], sizes = [8, 128], strides = [1, 1]} : vector<8x512xf32> to vector<8x128xf32>
    %cst_159 = arith.constant dense<0.000000e+00> : vector<8x128xf32>
    %360 = tpu.matmul %311, %26, %cst_159 {dimension_numbers = #tpu.dot_dimension_numbers<[1], [0], [0], [1], [0, 0, 1, 1], [], []>} : vector<8x128xf32>, vector<128x128xf32>, vector<8x128xf32> -> vector<8x128xf32>
    %361 = arith.addf %359, %360 : vector<8x128xf32>
    %362 = vector.extract_strided_slice %358 {offsets = [0, 0], sizes = [8, 128], strides = [1, 1]} : vector<8x384xf32> to vector<8x128xf32>
    %cst_160 = arith.constant 5.000000e-01 : f32
    %363 = vector.broadcast %cst_160 : f32 to vector<8x128xf32>
    %364 = arith.mulf %363, %362 : vector<8x128xf32>
    %365 = math.tanh %364 : vector<8x128xf32>
    %cst_161 = arith.constant 5.000000e-01 : f32
    %366 = vector.broadcast %cst_161 : f32 to vector<8x128xf32>
    %367 = arith.mulf %366, %365 : vector<8x128xf32>
    %cst_162 = arith.constant 5.000000e-01 : f32
    %368 = vector.broadcast %cst_162 : f32 to vector<8x128xf32>
    %369 = arith.addf %367, %368 : vector<8x128xf32>
    %370 = vector.extract_strided_slice %358 {offsets = [0, 128], sizes = [8, 128], strides = [1, 1]} : vector<8x384xf32> to vector<8x128xf32>
    %cst_163 = arith.constant 5.000000e-01 : f32
    %371 = vector.broadcast %cst_163 : f32 to vector<8x128xf32>
    %372 = arith.mulf %371, %370 : vector<8x128xf32>
    %373 = math.tanh %372 : vector<8x128xf32>
    %cst_164 = arith.constant 5.000000e-01 : f32
    %374 = vector.broadcast %cst_164 : f32 to vector<8x128xf32>
    %375 = arith.mulf %374, %373 : vector<8x128xf32>
    %cst_165 = arith.constant 5.000000e-01 : f32
    %376 = vector.broadcast %cst_165 : f32 to vector<8x128xf32>
    %377 = arith.addf %375, %376 : vector<8x128xf32>
    %378 = vector.extract_strided_slice %358 {offsets = [0, 256], sizes = [8, 128], strides = [1, 1]} : vector<8x384xf32> to vector<8x128xf32>
    %379 = math.tanh %378 : vector<8x128xf32>
    %380 = arith.mulf %377, %302 : vector<8x128xf32>
    %381 = arith.mulf %369, %379 : vector<8x128xf32>
    %382 = arith.addf %380, %381 : vector<8x128xf32>
    %cst_166 = arith.constant 5.000000e-01 : f32
    %383 = vector.broadcast %cst_166 : f32 to vector<8x128xf32>
    %384 = arith.mulf %383, %361 : vector<8x128xf32>
    %385 = math.tanh %384 : vector<8x128xf32>
    %cst_167 = arith.constant 5.000000e-01 : f32
    %386 = vector.broadcast %cst_167 : f32 to vector<8x128xf32>
    %387 = arith.mulf %386, %385 : vector<8x128xf32>
    %cst_168 = arith.constant 5.000000e-01 : f32
    %388 = vector.broadcast %cst_168 : f32 to vector<8x128xf32>
    %389 = arith.addf %387, %388 : vector<8x128xf32>
    %390 = math.tanh %382 : vector<8x128xf32>
    %391 = arith.mulf %389, %390 : vector<8x128xf32>
    %c4_169 = arith.constant 4 : index
    %c0_170 = arith.constant 0 : index
    %c0_171 = arith.constant 0 : index
    %392 = vector.load %arg6[%c4_169, %c0_170, %c0_171] : memref<8x8x128xf32, #tpu.memory_space<vmem>>, vector<1x8x128xf32>
    %393 = vector.shape_cast %392 : vector<1x8x128xf32> to vector<8x128xf32>
    %394 = vector.shape_cast %391 : vector<8x128xf32> to vector<1x8x128xf32>
    tpu.vector_store %arg6[%c4_169, %c0_170, %c0_171], %394 {strides = array<i32>} : memref<8x8x128xf32, #tpu.memory_space<vmem>>, vector<1x8x128xf32>,
    %c24_172 = arith.constant 24 : index
    %c0_173 = arith.constant 0 : index
    %395 = vector.load %arg9[%c24_172, %c0_173] : memref<64x512xf32, #tpu.memory_space<vmem>>, vector<8x512xf32>
    %396 = vector.extract_strided_slice %395 {offsets = [0, 0], sizes = [8, 384], strides = [1, 1]} : vector<8x512xf32> to vector<8x384xf32>
    %cst_174 = arith.constant dense<0.000000e+00> : vector<8x384xf32>
    %397 = tpu.matmul %351, %28, %cst_174 {dimension_numbers = #tpu.dot_dimension_numbers<[1], [0], [0], [1], [0, 0, 1, 1], [], []>} : vector<8x128xf32>, vector<128x384xf32>, vector<8x384xf32> -> vector<8x384xf32>
    %398 = arith.addf %396, %397 : vector<8x384xf32>
    %399 = vector.extract_strided_slice %395 {offsets = [0, 384], sizes = [8, 128], strides = [1, 1]} : vector<8x512xf32> to vector<8x128xf32>
    %cst_175 = arith.constant dense<0.000000e+00> : vector<8x128xf32>
    %400 = tpu.matmul %351, %30, %cst_175 {dimension_numbers = #tpu.dot_dimension_numbers<[1], [0], [0], [1], [0, 0, 1, 1], [], []>} : vector<8x128xf32>, vector<128x128xf32>, vector<8x128xf32> -> vector<8x128xf32>
    %401 = arith.addf %399, %400 : vector<8x128xf32>
    %402 = vector.extract_strided_slice %398 {offsets = [0, 0], sizes = [8, 128], strides = [1, 1]} : vector<8x384xf32> to vector<8x128xf32>
    %cst_176 = arith.constant 5.000000e-01 : f32
    %403 = vector.broadcast %cst_176 : f32 to vector<8x128xf32>
    %404 = arith.mulf %403, %402 : vector<8x128xf32>
    %405 = math.tanh %404 : vector<8x128xf32>
    %cst_177 = arith.constant 5.000000e-01 : f32
    %406 = vector.broadcast %cst_177 : f32 to vector<8x128xf32>
    %407 = arith.mulf %406, %405 : vector<8x128xf32>
    %cst_178 = arith.constant 5.000000e-01 : f32
    %408 = vector.broadcast %cst_178 : f32 to vector<8x128xf32>
    %409 = arith.addf %407, %408 : vector<8x128xf32>
    %410 = vector.extract_strided_slice %398 {offsets = [0, 128], sizes = [8, 128], strides = [1, 1]} : vector<8x384xf32> to vector<8x128xf32>
    %cst_179 = arith.constant 5.000000e-01 : f32
    %411 = vector.broadcast %cst_179 : f32 to vector<8x128xf32>
    %412 = arith.mulf %411, %410 : vector<8x128xf32>
    %413 = math.tanh %412 : vector<8x128xf32>
    %cst_180 = arith.constant 5.000000e-01 : f32
    %414 = vector.broadcast %cst_180 : f32 to vector<8x128xf32>
    %415 = arith.mulf %414, %413 : vector<8x128xf32>
    %cst_181 = arith.constant 5.000000e-01 : f32
    %416 = vector.broadcast %cst_181 : f32 to vector<8x128xf32>
    %417 = arith.addf %415, %416 : vector<8x128xf32>
    %418 = vector.extract_strided_slice %398 {offsets = [0, 256], sizes = [8, 128], strides = [1, 1]} : vector<8x384xf32> to vector<8x128xf32>
    %419 = math.tanh %418 : vector<8x128xf32>
    %420 = arith.mulf %417, %342 : vector<8x128xf32>
    %421 = arith.mulf %409, %419 : vector<8x128xf32>
    %422 = arith.addf %420, %421 : vector<8x128xf32>
    %cst_182 = arith.constant 5.000000e-01 : f32
    %423 = vector.broadcast %cst_182 : f32 to vector<8x128xf32>
    %424 = arith.mulf %423, %401 : vector<8x128xf32>
    %425 = math.tanh %424 : vector<8x128xf32>
    %cst_183 = arith.constant 5.000000e-01 : f32
    %426 = vector.broadcast %cst_183 : f32 to vector<8x128xf32>
    %427 = arith.mulf %426, %425 : vector<8x128xf32>
    %cst_184 = arith.constant 5.000000e-01 : f32
    %428 = vector.broadcast %cst_184 : f32 to vector<8x128xf32>
    %429 = arith.addf %427, %428 : vector<8x128xf32>
    %430 = math.tanh %422 : vector<8x128xf32>
    %431 = arith.mulf %429, %430 : vector<8x128xf32>
    %c3_185 = arith.constant 3 : index
    %c0_186 = arith.constant 0 : index
    %c0_187 = arith.constant 0 : index
    %432 = vector.load %arg7[%c3_185, %c0_186, %c0_187] : memref<8x8x128xf32, #tpu.memory_space<vmem>>, vector<1x8x128xf32>
    %433 = vector.shape_cast %432 : vector<1x8x128xf32> to vector<8x128xf32>
    %434 = vector.shape_cast %431 : vector<8x128xf32> to vector<1x8x128xf32>
    tpu.vector_store %arg7[%c3_185, %c0_186, %c0_187], %434 {strides = array<i32>} : memref<8x8x128xf32, #tpu.memory_space<vmem>>, vector<1x8x128xf32>,
    %c40_188 = arith.constant 40 : index
    %c0_189 = arith.constant 0 : index
    %435 = vector.load %arg8[%c40_188, %c0_189] : memref<64x512xf32, #tpu.memory_space<vmem>>, vector<8x512xf32>
    %436 = vector.extract_strided_slice %435 {offsets = [0, 0], sizes = [8, 384], strides = [1, 1]} : vector<8x512xf32> to vector<8x384xf32>
    %cst_190 = arith.constant dense<0.000000e+00> : vector<8x384xf32>
    %437 = tpu.matmul %391, %24, %cst_190 {dimension_numbers = #tpu.dot_dimension_numbers<[1], [0], [0], [1], [0, 0, 1, 1], [], []>} : vector<8x128xf32>, vector<128x384xf32>, vector<8x384xf32> -> vector<8x384xf32>
    %438 = arith.addf %436, %437 : vector<8x384xf32>
    %439 = vector.extract_strided_slice %435 {offsets = [0, 384], sizes = [8, 128], strides = [1, 1]} : vector<8x512xf32> to vector<8x128xf32>
    %cst_191 = arith.constant dense<0.000000e+00> : vector<8x128xf32>
    %440 = tpu.matmul %391, %26, %cst_191 {dimension_numbers = #tpu.dot_dimension_numbers<[1], [0], [0], [1], [0, 0, 1, 1], [], []>} : vector<8x128xf32>, vector<128x128xf32>, vector<8x128xf32> -> vector<8x128xf32>
    %441 = arith.addf %439, %440 : vector<8x128xf32>
    %442 = vector.extract_strided_slice %438 {offsets = [0, 0], sizes = [8, 128], strides = [1, 1]} : vector<8x384xf32> to vector<8x128xf32>
    %cst_192 = arith.constant 5.000000e-01 : f32
    %443 = vector.broadcast %cst_192 : f32 to vector<8x128xf32>
    %444 = arith.mulf %443, %442 : vector<8x128xf32>
    %445 = math.tanh %444 : vector<8x128xf32>
    %cst_193 = arith.constant 5.000000e-01 : f32
    %446 = vector.broadcast %cst_193 : f32 to vector<8x128xf32>
    %447 = arith.mulf %446, %445 : vector<8x128xf32>
    %cst_194 = arith.constant 5.000000e-01 : f32
    %448 = vector.broadcast %cst_194 : f32 to vector<8x128xf32>
    %449 = arith.addf %447, %448 : vector<8x128xf32>
    %450 = vector.extract_strided_slice %438 {offsets = [0, 128], sizes = [8, 128], strides = [1, 1]} : vector<8x384xf32> to vector<8x128xf32>
    %cst_195 = arith.constant 5.000000e-01 : f32
    %451 = vector.broadcast %cst_195 : f32 to vector<8x128xf32>
    %452 = arith.mulf %451, %450 : vector<8x128xf32>
    %453 = math.tanh %452 : vector<8x128xf32>
    %cst_196 = arith.constant 5.000000e-01 : f32
    %454 = vector.broadcast %cst_196 : f32 to vector<8x128xf32>
    %455 = arith.mulf %454, %453 : vector<8x128xf32>
    %cst_197 = arith.constant 5.000000e-01 : f32
    %456 = vector.broadcast %cst_197 : f32 to vector<8x128xf32>
    %457 = arith.addf %455, %456 : vector<8x128xf32>
    %458 = vector.extract_strided_slice %438 {offsets = [0, 256], sizes = [8, 128], strides = [1, 1]} : vector<8x384xf32> to vector<8x128xf32>
    %459 = math.tanh %458 : vector<8x128xf32>
    %460 = arith.mulf %457, %382 : vector<8x128xf32>
    %461 = arith.mulf %449, %459 : vector<8x128xf32>
    %462 = arith.addf %460, %461 : vector<8x128xf32>
    %cst_198 = arith.constant 5.000000e-01 : f32
    %463 = vector.broadcast %cst_198 : f32 to vector<8x128xf32>
    %464 = arith.mulf %463, %441 : vector<8x128xf32>
    %465 = math.tanh %464 : vector<8x128xf32>
    %cst_199 = arith.constant 5.000000e-01 : f32
    %466 = vector.broadcast %cst_199 : f32 to vector<8x128xf32>
    %467 = arith.mulf %466, %465 : vector<8x128xf32>
    %cst_200 = arith.constant 5.000000e-01 : f32
    %468 = vector.broadcast %cst_200 : f32 to vector<8x128xf32>
    %469 = arith.addf %467, %468 : vector<8x128xf32>
    %470 = math.tanh %462 : vector<8x128xf32>
    %471 = arith.mulf %469, %470 : vector<8x128xf32>
    %c5_201 = arith.constant 5 : index
    %c0_202 = arith.constant 0 : index
    %c0_203 = arith.constant 0 : index
    %472 = vector.load %arg6[%c5_201, %c0_202, %c0_203] : memref<8x8x128xf32, #tpu.memory_space<vmem>>, vector<1x8x128xf32>
    %473 = vector.shape_cast %472 : vector<1x8x128xf32> to vector<8x128xf32>
    %474 = vector.shape_cast %471 : vector<8x128xf32> to vector<1x8x128xf32>
    tpu.vector_store %arg6[%c5_201, %c0_202, %c0_203], %474 {strides = array<i32>} : memref<8x8x128xf32, #tpu.memory_space<vmem>>, vector<1x8x128xf32>,
    %c16_204 = arith.constant 16 : index
    %c0_205 = arith.constant 0 : index
    %475 = vector.load %arg9[%c16_204, %c0_205] : memref<64x512xf32, #tpu.memory_space<vmem>>, vector<8x512xf32>
    %476 = vector.extract_strided_slice %475 {offsets = [0, 0], sizes = [8, 384], strides = [1, 1]} : vector<8x512xf32> to vector<8x384xf32>
    %cst_206 = arith.constant dense<0.000000e+00> : vector<8x384xf32>
    %477 = tpu.matmul %431, %28, %cst_206 {dimension_numbers = #tpu.dot_dimension_numbers<[1], [0], [0], [1], [0, 0, 1, 1], [], []>} : vector<8x128xf32>, vector<128x384xf32>, vector<8x384xf32> -> vector<8x384xf32>
    %478 = arith.addf %476, %477 : vector<8x384xf32>
    %479 = vector.extract_strided_slice %475 {offsets = [0, 384], sizes = [8, 128], strides = [1, 1]} : vector<8x512xf32> to vector<8x128xf32>
    %cst_207 = arith.constant dense<0.000000e+00> : vector<8x128xf32>
    %480 = tpu.matmul %431, %30, %cst_207 {dimension_numbers = #tpu.dot_dimension_numbers<[1], [0], [0], [1], [0, 0, 1, 1], [], []>} : vector<8x128xf32>, vector<128x128xf32>, vector<8x128xf32> -> vector<8x128xf32>
    %481 = arith.addf %479, %480 : vector<8x128xf32>
    %482 = vector.extract_strided_slice %478 {offsets = [0, 0], sizes = [8, 128], strides = [1, 1]} : vector<8x384xf32> to vector<8x128xf32>
    %cst_208 = arith.constant 5.000000e-01 : f32
    %483 = vector.broadcast %cst_208 : f32 to vector<8x128xf32>
    %484 = arith.mulf %483, %482 : vector<8x128xf32>
    %485 = math.tanh %484 : vector<8x128xf32>
    %cst_209 = arith.constant 5.000000e-01 : f32
    %486 = vector.broadcast %cst_209 : f32 to vector<8x128xf32>
    %487 = arith.mulf %486, %485 : vector<8x128xf32>
    %cst_210 = arith.constant 5.000000e-01 : f32
    %488 = vector.broadcast %cst_210 : f32 to vector<8x128xf32>
    %489 = arith.addf %487, %488 : vector<8x128xf32>
    %490 = vector.extract_strided_slice %478 {offsets = [0, 128], sizes = [8, 128], strides = [1, 1]} : vector<8x384xf32> to vector<8x128xf32>
    %cst_211 = arith.constant 5.000000e-01 : f32
    %491 = vector.broadcast %cst_211 : f32 to vector<8x128xf32>
    %492 = arith.mulf %491, %490 : vector<8x128xf32>
    %493 = math.tanh %492 : vector<8x128xf32>
    %cst_212 = arith.constant 5.000000e-01 : f32
    %494 = vector.broadcast %cst_212 : f32 to vector<8x128xf32>
    %495 = arith.mulf %494, %493 : vector<8x128xf32>
    %cst_213 = arith.constant 5.000000e-01 : f32
    %496 = vector.broadcast %cst_213 : f32 to vector<8x128xf32>
    %497 = arith.addf %495, %496 : vector<8x128xf32>
    %498 = vector.extract_strided_slice %478 {offsets = [0, 256], sizes = [8, 128], strides = [1, 1]} : vector<8x384xf32> to vector<8x128xf32>
    %499 = math.tanh %498 : vector<8x128xf32>
    %500 = arith.mulf %497, %422 : vector<8x128xf32>
    %501 = arith.mulf %489, %499 : vector<8x128xf32>
    %502 = arith.addf %500, %501 : vector<8x128xf32>
    %cst_214 = arith.constant 5.000000e-01 : f32
    %503 = vector.broadcast %cst_214 : f32 to vector<8x128xf32>
    %504 = arith.mulf %503, %481 : vector<8x128xf32>
    %505 = math.tanh %504 : vector<8x128xf32>
    %cst_215 = arith.constant 5.000000e-01 : f32
    %506 = vector.broadcast %cst_215 : f32 to vector<8x128xf32>
    %507 = arith.mulf %506, %505 : vector<8x128xf32>
    %cst_216 = arith.constant 5.000000e-01 : f32
    %508 = vector.broadcast %cst_216 : f32 to vector<8x128xf32>
    %509 = arith.addf %507, %508 : vector<8x128xf32>
    %510 = math.tanh %502 : vector<8x128xf32>
    %511 = arith.mulf %509, %510 : vector<8x128xf32>
    %c2_217 = arith.constant 2 : index
    %c0_218 = arith.constant 0 : index
    %c0_219 = arith.constant 0 : index
    %512 = vector.load %arg7[%c2_217, %c0_218, %c0_219] : memref<8x8x128xf32, #tpu.memory_space<vmem>>, vector<1x8x128xf32>
    %513 = vector.shape_cast %512 : vector<1x8x128xf32> to vector<8x128xf32>
    %514 = vector.shape_cast %511 : vector<8x128xf32> to vector<1x8x128xf32>
    tpu.vector_store %arg7[%c2_217, %c0_218, %c0_219], %514 {strides = array<i32>} : memref<8x8x128xf32, #tpu.memory_space<vmem>>, vector<1x8x128xf32>,
    %c48_220 = arith.constant 48 : index
    %c0_221 = arith.constant 0 : index
    %515 = vector.load %arg8[%c48_220, %c0_221] : memref<64x512xf32, #tpu.memory_space<vmem>>, vector<8x512xf32>
    %516 = vector.extract_strided_slice %515 {offsets = [0, 0], sizes = [8, 384], strides = [1, 1]} : vector<8x512xf32> to vector<8x384xf32>
    %cst_222 = arith.constant dense<0.000000e+00> : vector<8x384xf32>
    %517 = tpu.matmul %471, %24, %cst_222 {dimension_numbers = #tpu.dot_dimension_numbers<[1], [0], [0], [1], [0, 0, 1, 1], [], []>} : vector<8x128xf32>, vector<128x384xf32>, vector<8x384xf32> -> vector<8x384xf32>
    %518 = arith.addf %516, %517 : vector<8x384xf32>
    %519 = vector.extract_strided_slice %515 {offsets = [0, 384], sizes = [8, 128], strides = [1, 1]} : vector<8x512xf32> to vector<8x128xf32>
    %cst_223 = arith.constant dense<0.000000e+00> : vector<8x128xf32>
    %520 = tpu.matmul %471, %26, %cst_223 {dimension_numbers = #tpu.dot_dimension_numbers<[1], [0], [0], [1], [0, 0, 1, 1], [], []>} : vector<8x128xf32>, vector<128x128xf32>, vector<8x128xf32> -> vector<8x128xf32>
    %521 = arith.addf %519, %520 : vector<8x128xf32>
    %522 = vector.extract_strided_slice %518 {offsets = [0, 0], sizes = [8, 128], strides = [1, 1]} : vector<8x384xf32> to vector<8x128xf32>
    %cst_224 = arith.constant 5.000000e-01 : f32
    %523 = vector.broadcast %cst_224 : f32 to vector<8x128xf32>
    %524 = arith.mulf %523, %522 : vector<8x128xf32>
    %525 = math.tanh %524 : vector<8x128xf32>
    %cst_225 = arith.constant 5.000000e-01 : f32
    %526 = vector.broadcast %cst_225 : f32 to vector<8x128xf32>
    %527 = arith.mulf %526, %525 : vector<8x128xf32>
    %cst_226 = arith.constant 5.000000e-01 : f32
    %528 = vector.broadcast %cst_226 : f32 to vector<8x128xf32>
    %529 = arith.addf %527, %528 : vector<8x128xf32>
    %530 = vector.extract_strided_slice %518 {offsets = [0, 128], sizes = [8, 128], strides = [1, 1]} : vector<8x384xf32> to vector<8x128xf32>
    %cst_227 = arith.constant 5.000000e-01 : f32
    %531 = vector.broadcast %cst_227 : f32 to vector<8x128xf32>
    %532 = arith.mulf %531, %530 : vector<8x128xf32>
    %533 = math.tanh %532 : vector<8x128xf32>
    %cst_228 = arith.constant 5.000000e-01 : f32
    %534 = vector.broadcast %cst_228 : f32 to vector<8x128xf32>
    %535 = arith.mulf %534, %533 : vector<8x128xf32>
    %cst_229 = arith.constant 5.000000e-01 : f32
    %536 = vector.broadcast %cst_229 : f32 to vector<8x128xf32>
    %537 = arith.addf %535, %536 : vector<8x128xf32>
    %538 = vector.extract_strided_slice %518 {offsets = [0, 256], sizes = [8, 128], strides = [1, 1]} : vector<8x384xf32> to vector<8x128xf32>
    %539 = math.tanh %538 : vector<8x128xf32>
    %540 = arith.mulf %537, %462 : vector<8x128xf32>
    %541 = arith.mulf %529, %539 : vector<8x128xf32>
    %542 = arith.addf %540, %541 : vector<8x128xf32>
    %cst_230 = arith.constant 5.000000e-01 : f32
    %543 = vector.broadcast %cst_230 : f32 to vector<8x128xf32>
    %544 = arith.mulf %543, %521 : vector<8x128xf32>
    %545 = math.tanh %544 : vector<8x128xf32>
    %cst_231 = arith.constant 5.000000e-01 : f32
    %546 = vector.broadcast %cst_231 : f32 to vector<8x128xf32>
    %547 = arith.mulf %546, %545 : vector<8x128xf32>
    %cst_232 = arith.constant 5.000000e-01 : f32
    %548 = vector.broadcast %cst_232 : f32 to vector<8x128xf32>
    %549 = arith.addf %547, %548 : vector<8x128xf32>
    %550 = math.tanh %542 : vector<8x128xf32>
    %551 = arith.mulf %549, %550 : vector<8x128xf32>
    %c6_233 = arith.constant 6 : index
    %c0_234 = arith.constant 0 : index
    %c0_235 = arith.constant 0 : index
    %552 = vector.load %arg6[%c6_233, %c0_234, %c0_235] : memref<8x8x128xf32, #tpu.memory_space<vmem>>, vector<1x8x128xf32>
    %553 = vector.shape_cast %552 : vector<1x8x128xf32> to vector<8x128xf32>
    %554 = vector.shape_cast %551 : vector<8x128xf32> to vector<1x8x128xf32>
    tpu.vector_store %arg6[%c6_233, %c0_234, %c0_235], %554 {strides = array<i32>} : memref<8x8x128xf32, #tpu.memory_space<vmem>>, vector<1x8x128xf32>,
    %c8_236 = arith.constant 8 : index
    %c0_237 = arith.constant 0 : index
    %555 = vector.load %arg9[%c8_236, %c0_237] : memref<64x512xf32, #tpu.memory_space<vmem>>, vector<8x512xf32>
    %556 = vector.extract_strided_slice %555 {offsets = [0, 0], sizes = [8, 384], strides = [1, 1]} : vector<8x512xf32> to vector<8x384xf32>
    %cst_238 = arith.constant dense<0.000000e+00> : vector<8x384xf32>
    %557 = tpu.matmul %511, %28, %cst_238 {dimension_numbers = #tpu.dot_dimension_numbers<[1], [0], [0], [1], [0, 0, 1, 1], [], []>} : vector<8x128xf32>, vector<128x384xf32>, vector<8x384xf32> -> vector<8x384xf32>
    %558 = arith.addf %556, %557 : vector<8x384xf32>
    %559 = vector.extract_strided_slice %555 {offsets = [0, 384], sizes = [8, 128], strides = [1, 1]} : vector<8x512xf32> to vector<8x128xf32>
    %cst_239 = arith.constant dense<0.000000e+00> : vector<8x128xf32>
    %560 = tpu.matmul %511, %30, %cst_239 {dimension_numbers = #tpu.dot_dimension_numbers<[1], [0], [0], [1], [0, 0, 1, 1], [], []>} : vector<8x128xf32>, vector<128x128xf32>, vector<8x128xf32> -> vector<8x128xf32>
    %561 = arith.addf %559, %560 : vector<8x128xf32>
    %562 = vector.extract_strided_slice %558 {offsets = [0, 0], sizes = [8, 128], strides = [1, 1]} : vector<8x384xf32> to vector<8x128xf32>
    %cst_240 = arith.constant 5.000000e-01 : f32
    %563 = vector.broadcast %cst_240 : f32 to vector<8x128xf32>
    %564 = arith.mulf %563, %562 : vector<8x128xf32>
    %565 = math.tanh %564 : vector<8x128xf32>
    %cst_241 = arith.constant 5.000000e-01 : f32
    %566 = vector.broadcast %cst_241 : f32 to vector<8x128xf32>
    %567 = arith.mulf %566, %565 : vector<8x128xf32>
    %cst_242 = arith.constant 5.000000e-01 : f32
    %568 = vector.broadcast %cst_242 : f32 to vector<8x128xf32>
    %569 = arith.addf %567, %568 : vector<8x128xf32>
    %570 = vector.extract_strided_slice %558 {offsets = [0, 128], sizes = [8, 128], strides = [1, 1]} : vector<8x384xf32> to vector<8x128xf32>
    %cst_243 = arith.constant 5.000000e-01 : f32
    %571 = vector.broadcast %cst_243 : f32 to vector<8x128xf32>
    %572 = arith.mulf %571, %570 : vector<8x128xf32>
    %573 = math.tanh %572 : vector<8x128xf32>
    %cst_244 = arith.constant 5.000000e-01 : f32
    %574 = vector.broadcast %cst_244 : f32 to vector<8x128xf32>
    %575 = arith.mulf %574, %573 : vector<8x128xf32>
    %cst_245 = arith.constant 5.000000e-01 : f32
    %576 = vector.broadcast %cst_245 : f32 to vector<8x128xf32>
    %577 = arith.addf %575, %576 : vector<8x128xf32>
    %578 = vector.extract_strided_slice %558 {offsets = [0, 256], sizes = [8, 128], strides = [1, 1]} : vector<8x384xf32> to vector<8x128xf32>
    %579 = math.tanh %578 : vector<8x128xf32>
    %580 = arith.mulf %577, %502 : vector<8x128xf32>
    %581 = arith.mulf %569, %579 : vector<8x128xf32>
    %582 = arith.addf %580, %581 : vector<8x128xf32>
    %cst_246 = arith.constant 5.000000e-01 : f32
    %583 = vector.broadcast %cst_246 : f32 to vector<8x128xf32>
    %584 = arith.mulf %583, %561 : vector<8x128xf32>
    %585 = math.tanh %584 : vector<8x128xf32>
    %cst_247 = arith.constant 5.000000e-01 : f32
    %586 = vector.broadcast %cst_247 : f32 to vector<8x128xf32>
    %587 = arith.mulf %586, %585 : vector<8x128xf32>
    %cst_248 = arith.constant 5.000000e-01 : f32
    %588 = vector.broadcast %cst_248 : f32 to vector<8x128xf32>
    %589 = arith.addf %587, %588 : vector<8x128xf32>
    %590 = math.tanh %582 : vector<8x128xf32>
    %591 = arith.mulf %589, %590 : vector<8x128xf32>
    %c1_249 = arith.constant 1 : index
    %c0_250 = arith.constant 0 : index
    %c0_251 = arith.constant 0 : index
    %592 = vector.load %arg7[%c1_249, %c0_250, %c0_251] : memref<8x8x128xf32, #tpu.memory_space<vmem>>, vector<1x8x128xf32>
    %593 = vector.shape_cast %592 : vector<1x8x128xf32> to vector<8x128xf32>
    %594 = vector.shape_cast %591 : vector<8x128xf32> to vector<1x8x128xf32>
    tpu.vector_store %arg7[%c1_249, %c0_250, %c0_251], %594 {strides = array<i32>} : memref<8x8x128xf32, #tpu.memory_space<vmem>>, vector<1x8x128xf32>,
    %c56_252 = arith.constant 56 : index
    %c0_253 = arith.constant 0 : index
    %595 = vector.load %arg8[%c56_252, %c0_253] : memref<64x512xf32, #tpu.memory_space<vmem>>, vector<8x512xf32>
    %596 = vector.extract_strided_slice %595 {offsets = [0, 0], sizes = [8, 384], strides = [1, 1]} : vector<8x512xf32> to vector<8x384xf32>
    %cst_254 = arith.constant dense<0.000000e+00> : vector<8x384xf32>
    %597 = tpu.matmul %551, %24, %cst_254 {dimension_numbers = #tpu.dot_dimension_numbers<[1], [0], [0], [1], [0, 0, 1, 1], [], []>} : vector<8x128xf32>, vector<128x384xf32>, vector<8x384xf32> -> vector<8x384xf32>
    %598 = arith.addf %596, %597 : vector<8x384xf32>
    %599 = vector.extract_strided_slice %595 {offsets = [0, 384], sizes = [8, 128], strides = [1, 1]} : vector<8x512xf32> to vector<8x128xf32>
    %cst_255 = arith.constant dense<0.000000e+00> : vector<8x128xf32>
    %600 = tpu.matmul %551, %26, %cst_255 {dimension_numbers = #tpu.dot_dimension_numbers<[1], [0], [0], [1], [0, 0, 1, 1], [], []>} : vector<8x128xf32>, vector<128x128xf32>, vector<8x128xf32> -> vector<8x128xf32>
    %601 = arith.addf %599, %600 : vector<8x128xf32>
    %602 = vector.extract_strided_slice %598 {offsets = [0, 0], sizes = [8, 128], strides = [1, 1]} : vector<8x384xf32> to vector<8x128xf32>
    %cst_256 = arith.constant 5.000000e-01 : f32
    %603 = vector.broadcast %cst_256 : f32 to vector<8x128xf32>
    %604 = arith.mulf %603, %602 : vector<8x128xf32>
    %605 = math.tanh %604 : vector<8x128xf32>
    %cst_257 = arith.constant 5.000000e-01 : f32
    %606 = vector.broadcast %cst_257 : f32 to vector<8x128xf32>
    %607 = arith.mulf %606, %605 : vector<8x128xf32>
    %cst_258 = arith.constant 5.000000e-01 : f32
    %608 = vector.broadcast %cst_258 : f32 to vector<8x128xf32>
    %609 = arith.addf %607, %608 : vector<8x128xf32>
    %610 = vector.extract_strided_slice %598 {offsets = [0, 128], sizes = [8, 128], strides = [1, 1]} : vector<8x384xf32> to vector<8x128xf32>
    %cst_259 = arith.constant 5.000000e-01 : f32
    %611 = vector.broadcast %cst_259 : f32 to vector<8x128xf32>
    %612 = arith.mulf %611, %610 : vector<8x128xf32>
    %613 = math.tanh %612 : vector<8x128xf32>
    %cst_260 = arith.constant 5.000000e-01 : f32
    %614 = vector.broadcast %cst_260 : f32 to vector<8x128xf32>
    %615 = arith.mulf %614, %613 : vector<8x128xf32>
    %cst_261 = arith.constant 5.000000e-01 : f32
    %616 = vector.broadcast %cst_261 : f32 to vector<8x128xf32>
    %617 = arith.addf %615, %616 : vector<8x128xf32>
    %618 = vector.extract_strided_slice %598 {offsets = [0, 256], sizes = [8, 128], strides = [1, 1]} : vector<8x384xf32> to vector<8x128xf32>
    %619 = math.tanh %618 : vector<8x128xf32>
    %620 = arith.mulf %617, %542 : vector<8x128xf32>
    %621 = arith.mulf %609, %619 : vector<8x128xf32>
    %622 = arith.addf %620, %621 : vector<8x128xf32>
    %cst_262 = arith.constant 5.000000e-01 : f32
    %623 = vector.broadcast %cst_262 : f32 to vector<8x128xf32>
    %624 = arith.mulf %623, %601 : vector<8x128xf32>
    %625 = math.tanh %624 : vector<8x128xf32>
    %cst_263 = arith.constant 5.000000e-01 : f32
    %626 = vector.broadcast %cst_263 : f32 to vector<8x128xf32>
    %627 = arith.mulf %626, %625 : vector<8x128xf32>
    %cst_264 = arith.constant 5.000000e-01 : f32
    %628 = vector.broadcast %cst_264 : f32 to vector<8x128xf32>
    %629 = arith.addf %627, %628 : vector<8x128xf32>
    %630 = math.tanh %622 : vector<8x128xf32>
    %631 = arith.mulf %629, %630 : vector<8x128xf32>
    %c7_265 = arith.constant 7 : index
    %c0_266 = arith.constant 0 : index
    %c0_267 = arith.constant 0 : index
    %632 = vector.load %arg6[%c7_265, %c0_266, %c0_267] : memref<8x8x128xf32, #tpu.memory_space<vmem>>, vector<1x8x128xf32>
    %633 = vector.shape_cast %632 : vector<1x8x128xf32> to vector<8x128xf32>
    %634 = vector.shape_cast %631 : vector<8x128xf32> to vector<1x8x128xf32>
    tpu.vector_store %arg6[%c7_265, %c0_266, %c0_267], %634 {strides = array<i32>} : memref<8x8x128xf32, #tpu.memory_space<vmem>>, vector<1x8x128xf32>,
    %c0_268 = arith.constant 0 : index
    %c0_269 = arith.constant 0 : index
    %635 = vector.load %arg9[%c0_268, %c0_269] : memref<64x512xf32, #tpu.memory_space<vmem>>, vector<8x512xf32>
    %636 = vector.extract_strided_slice %635 {offsets = [0, 0], sizes = [8, 384], strides = [1, 1]} : vector<8x512xf32> to vector<8x384xf32>
    %cst_270 = arith.constant dense<0.000000e+00> : vector<8x384xf32>
    %637 = tpu.matmul %591, %28, %cst_270 {dimension_numbers = #tpu.dot_dimension_numbers<[1], [0], [0], [1], [0, 0, 1, 1], [], []>} : vector<8x128xf32>, vector<128x384xf32>, vector<8x384xf32> -> vector<8x384xf32>
    %638 = arith.addf %636, %637 : vector<8x384xf32>
    %639 = vector.extract_strided_slice %635 {offsets = [0, 384], sizes = [8, 128], strides = [1, 1]} : vector<8x512xf32> to vector<8x128xf32>
    %cst_271 = arith.constant dense<0.000000e+00> : vector<8x128xf32>
    %640 = tpu.matmul %591, %30, %cst_271 {dimension_numbers = #tpu.dot_dimension_numbers<[1], [0], [0], [1], [0, 0, 1, 1], [], []>} : vector<8x128xf32>, vector<128x128xf32>, vector<8x128xf32> -> vector<8x128xf32>
    %641 = arith.addf %639, %640 : vector<8x128xf32>
    %642 = vector.extract_strided_slice %638 {offsets = [0, 0], sizes = [8, 128], strides = [1, 1]} : vector<8x384xf32> to vector<8x128xf32>
    %cst_272 = arith.constant 5.000000e-01 : f32
    %643 = vector.broadcast %cst_272 : f32 to vector<8x128xf32>
    %644 = arith.mulf %643, %642 : vector<8x128xf32>
    %645 = math.tanh %644 : vector<8x128xf32>
    %cst_273 = arith.constant 5.000000e-01 : f32
    %646 = vector.broadcast %cst_273 : f32 to vector<8x128xf32>
    %647 = arith.mulf %646, %645 : vector<8x128xf32>
    %cst_274 = arith.constant 5.000000e-01 : f32
    %648 = vector.broadcast %cst_274 : f32 to vector<8x128xf32>
    %649 = arith.addf %647, %648 : vector<8x128xf32>
    %650 = vector.extract_strided_slice %638 {offsets = [0, 128], sizes = [8, 128], strides = [1, 1]} : vector<8x384xf32> to vector<8x128xf32>
    %cst_275 = arith.constant 5.000000e-01 : f32
    %651 = vector.broadcast %cst_275 : f32 to vector<8x128xf32>
    %652 = arith.mulf %651, %650 : vector<8x128xf32>
    %653 = math.tanh %652 : vector<8x128xf32>
    %cst_276 = arith.constant 5.000000e-01 : f32
    %654 = vector.broadcast %cst_276 : f32 to vector<8x128xf32>
    %655 = arith.mulf %654, %653 : vector<8x128xf32>
    %cst_277 = arith.constant 5.000000e-01 : f32
    %656 = vector.broadcast %cst_277 : f32 to vector<8x128xf32>
    %657 = arith.addf %655, %656 : vector<8x128xf32>
    %658 = vector.extract_strided_slice %638 {offsets = [0, 256], sizes = [8, 128], strides = [1, 1]} : vector<8x384xf32> to vector<8x128xf32>
    %659 = math.tanh %658 : vector<8x128xf32>
    %660 = arith.mulf %657, %582 : vector<8x128xf32>
    %661 = arith.mulf %649, %659 : vector<8x128xf32>
    %662 = arith.addf %660, %661 : vector<8x128xf32>
    %cst_278 = arith.constant 5.000000e-01 : f32
    %663 = vector.broadcast %cst_278 : f32 to vector<8x128xf32>
    %664 = arith.mulf %663, %641 : vector<8x128xf32>
    %665 = math.tanh %664 : vector<8x128xf32>
    %cst_279 = arith.constant 5.000000e-01 : f32
    %666 = vector.broadcast %cst_279 : f32 to vector<8x128xf32>
    %667 = arith.mulf %666, %665 : vector<8x128xf32>
    %cst_280 = arith.constant 5.000000e-01 : f32
    %668 = vector.broadcast %cst_280 : f32 to vector<8x128xf32>
    %669 = arith.addf %667, %668 : vector<8x128xf32>
    %670 = math.tanh %662 : vector<8x128xf32>
    %671 = arith.mulf %669, %670 : vector<8x128xf32>
    %c0_281 = arith.constant 0 : index
    %c0_282 = arith.constant 0 : index
    %c0_283 = arith.constant 0 : index
    %672 = vector.load %arg7[%c0_281, %c0_282, %c0_283] : memref<8x8x128xf32, #tpu.memory_space<vmem>>, vector<1x8x128xf32>
    %673 = vector.shape_cast %672 : vector<1x8x128xf32> to vector<8x128xf32>
    %674 = vector.shape_cast %671 : vector<8x128xf32> to vector<1x8x128xf32>
    tpu.vector_store %arg7[%c0_281, %c0_282, %c0_283], %674 {strides = array<i32>} : memref<8x8x128xf32, #tpu.memory_space<vmem>>, vector<1x8x128xf32>,
    %c0_284 = arith.constant 0 : index
    %c0_285 = arith.constant 0 : index
    %675 = vector.load %arg10[%c0_284, %c0_285] : memref<8x128xf32, #tpu.memory_space<vmem>>, vector<8x128xf32>
    tpu.vector_store %arg10[%c0_284, %c0_285], %631 {strides = array<i32>} : memref<8x128xf32, #tpu.memory_space<vmem>>, vector<8x128xf32>,
    %c0_286 = arith.constant 0 : index
    %c0_287 = arith.constant 0 : index
    %676 = vector.load %arg11[%c0_286, %c0_287] : memref<8x128xf32, #tpu.memory_space<vmem>>, vector<8x128xf32>
    tpu.vector_store %arg11[%c0_286, %c0_287], %622 {strides = array<i32>} : memref<8x128xf32, #tpu.memory_space<vmem>>, vector<8x128xf32>,
    %c0_288 = arith.constant 0 : index
    %c0_289 = arith.constant 0 : index
    %677 = vector.load %arg12[%c0_288, %c0_289] : memref<8x128xf32, #tpu.memory_space<vmem>>, vector<8x128xf32>
    tpu.vector_store %arg12[%c0_288, %c0_289], %671 {strides = array<i32>} : memref<8x128xf32, #tpu.memory_space<vmem>>, vector<8x128xf32>,
    %c0_290 = arith.constant 0 : index
    %c0_291 = arith.constant 0 : index
    %678 = vector.load %arg13[%c0_290, %c0_291] : memref<8x128xf32, #tpu.memory_space<vmem>>, vector<8x128xf32>
    tpu.vector_store %arg13[%c0_290, %c0_291], %662 {strides = array<i32>} : memref<8x128xf32, #tpu.memory_space<vmem>>, vector<8x128xf32>,
    return
  }
  func.func @transform_0(%arg0: i32) -> (i32, i32, i32) {
    %c0_i32 = arith.constant 0 : i32
    %c0_i32_0 = arith.constant 0 : i32
    %c0_i32_1 = arith.constant 0 : i32
    return %arg0, %c0_i32, %c0_i32_0 : i32, i32, i32
  }
  func.func @transform_1(%arg0: i32) -> (i32, i32, i32) {
    %c1_i32 = arith.constant 1 : i32
    %0 = arith.subi %c1_i32, %arg0 : i32
    %c0_i32 = arith.constant 0 : i32
    %c0_i32_0 = arith.constant 0 : i32
    %c0_i32_1 = arith.constant 0 : i32
    return %0, %c0_i32, %c0_i32_0 : i32, i32, i32
  }
  func.func @transform_2(%arg0: i32) -> (i32, i32, i32) {
    %c0_i32 = arith.constant 0 : i32
    %c0_i32_0 = arith.constant 0 : i32
    %c0_i32_1 = arith.constant 0 : i32
    %c0_i32_2 = arith.constant 0 : i32
    return %c0_i32, %c0_i32_0, %c0_i32_1 : i32, i32, i32
  }
  func.func @transform_3(%arg0: i32) -> (i32, i32, i32) {
    %c0_i32 = arith.constant 0 : i32
    %c0_i32_0 = arith.constant 0 : i32
    %c0_i32_1 = arith.constant 0 : i32
    %c0_i32_2 = arith.constant 0 : i32
    return %c0_i32, %c0_i32_0, %c0_i32_1 : i32, i32, i32
  }
  func.func @transform_4(%arg0: i32) -> (i32, i32, i32) {
    %c0_i32 = arith.constant 0 : i32
    %c0_i32_0 = arith.constant 0 : i32
    %c0_i32_1 = arith.constant 0 : i32
    %c0_i32_2 = arith.constant 0 : i32
    return %c0_i32, %c0_i32_0, %c0_i32_1 : i32, i32, i32
  }
  func.func @transform_5(%arg0: i32) -> (i32, i32, i32) {
    %c0_i32 = arith.constant 0 : i32
    %c0_i32_0 = arith.constant 0 : i32
    %c0_i32_1 = arith.constant 0 : i32
    return %arg0, %c0_i32, %c0_i32_0 : i32, i32, i32
  }
  func.func @transform_6(%arg0: i32) -> (i32, i32, i32) {
    %c1_i32 = arith.constant 1 : i32
    %0 = arith.subi %c1_i32, %arg0 : i32
    %c0_i32 = arith.constant 0 : i32
    %c0_i32_0 = arith.constant 0 : i32
    %c0_i32_1 = arith.constant 0 : i32
    return %0, %c0_i32, %c0_i32_0 : i32, i32, i32
  }
}

</mosaic_0001>

<bundles_post_ra>
// kernel: bilstm_pallas.1
= control target key start
LH: loop header
LB: loop body
LE: loop exit
PB: predicated region body
PF: predicated region fallthrough
CT: control target
= control target key end

     0   :  { %s10685_s0 = inlined_call_operand.hbm [shape: f32[2,64,32], index: 0, kind: input, shape index: {}, may-alias: {0,1}]   ;;  %s10686_s1 = inlined_call_operand.hbm [shape: f32[2,64,32], index: 1, kind: input, shape index: {}, may-alias: {0,1}]   ;;  %s10687_s2 = inlined_call_operand.hbm [shape: f32[2,32,512], index: 2, kind: input, shape index: {}]   ;;  %s10688_s3 = inlined_call_operand.hbm [shape: f32[2,128,512], index: 3, kind: input, shape index: {}]   ;;  %s10689_s4 = inlined_call_operand.hbm [shape: f32[2,1,512], index: 4, kind: input, shape index: {}]   ;;  %s10690_s5 = inlined_call_operand.hbm [shape: f32[16,8,128], index: 5, kind: output, shape index: {0}]   ;;  %s10691_s6 = inlined_call_operand.hbm [shape: f32[16,8,128], index: 6, kind: output, shape index: {1}]  }
   0x1   :  { %10784 = sst [smem:[#allocation95_spill]] %s10685_s0 }
   0x2   :  { %10785 = sst [smem:[#allocation96_spill]] %s10691_s6 }
   0x3   :  { %12 = vsyncpa [#allocation9], 0 }
   0x4   :  { %14 = vsyncpa [#allocation9 + $0x1], 0 }
   0x5   :  { %15 = vsyncpa [#allocation12], 0 }
   0x6   :  { %17 = vsyncpa [#allocation12 + $0x1], 0 }
   0x7   :  { %18 = vsyncpa [#allocation15], 0 }
   0x8   :  { %19 = vsyncpa [#allocation10], 0 }
   0x9   :  { %21 = vsyncpa [#allocation10 + $0x1], 0 }
   0xa   :  { %22 = vsyncpa [#allocation19], 0 }
   0xb   :  { %24 = vsyncpa [#allocation19 + $0x1], 0  ;;  %s8927_s21 = smov 0   ;;  %s8929_s22 = smov 0  }
   0xc   :  { %s8931_s23 = smov 0   ;;  %s8933_s24 = smov 0  }
   0xd   :  { %s8935_s25 = smov 0   ;;  %s8937_s26 = smov 0  }
   0xe   :  { %s8939_s27 = smov 0  }
   0xf LB: > { %10786 = sst [smem:[#allocation26_spill]] %s8847_s21  ;;  %s8963_s28 = sadd.s32 4294967295, %s8871_s27   ;;  %s8871_s27 = sphi %s8939_s27, %s11091_s27   ;;  %s8867_s26 = sphi %s8937_s26, %s11090_s26   ;;  %s8863_s25 = sphi %s8935_s25, %s11089_s25   ;;  %s8859_s24 = sphi %s8933_s24, %s11088_s24   ;;  %s8855_s23 = sphi %s8931_s23, %s11087_s23   ;;  %s8851_s22 = sphi %s8929_s22, %s11086_s22   ;;  %s8847_s21 = sphi %s8927_s21, %s11085_s21  }
  0x10   : > { %10787 = sst [smem:[#allocation27_spill]] %s8859_s24  ;;  %s5191_s29 = sadd.s32 4294967294, %s8871_s27  }
  0x11   : > { %p50_p0 = scmp.ne.s32.totalorder %s8863_s25, %s8859_s24  ;;  %p10693_p1 = scmp.eq.s32.totalorder %s8963_s28, 0 }
  0x12   : > { %p78_p2 = scmp.ne.s32.totalorder %s8851_s22, %s8847_s21  ;;  %p171_p5 = scmp.eq.s32.totalorder %s5191_s29, 1 }
  0x13   : > { %p8974_p4 = por %p10693_p1, %p50_p0  ;;  %p5192_p7 = scmp.ge.s32.totalorder %s8871_s27, 1 }
  0x14   : > { %p8980_p6 = por %p78_p2, %p10693_p1  ;;  %p8985_p8 = por %p171_p5, %p50_p0 }
  0x15   : > { %s10788_s30 = scalar_select %p8974_p4, 1, 0 }
  0x16   : > { %s10789_s7 = scalar_select %p8980_p6, 1, 0 }
  0x17   : > { %s10790_s8 = scalar_select %p8985_p8, 1, 0 }
  0x18   : > { %p8989_p9 = por %p171_p5, %p78_p2  ;;  %p206_p10 = scmp.lt.s32.totalorder %s8871_s27, 3 }
  0x19   : > { %10791 = sst [smem:[#allocation28_spill]] %s10790_s8  ;;  %s8873_s11 = smov [#allocation13]  }
  0x1a   : > { %s10792_s9 = scalar_select %p8989_p9, 1, 0 }
  0x1b   : > { %p8995_p12 = pnand %p5192_p7, %p206_p10  ;;  %s218_s12 = sshll.u32 %s8873_s11, 4  ;;  %s8999_s12 = int_to_ptr.vmem [resolvable:$true] %s218_s12 }
  0x1c   : > { %10793 = sst [smem:[#allocation29_spill]] %s10792_s9  ;;  %s8874_s14 = smov [#allocation14]  }
  0x1d   : > { %p8330_p13 = pneg %p8995_p12  ;;  %s231_s15 = sshll.u32 %s8874_s14, 4  ;;  %s9010_s15 = int_to_ptr.vmem [resolvable:$true] %s231_s15 }
  0x1e   : > { %s8875_s16 = smov [#allocation16]   ;;  %s8593_s20 = scalar_lea.hbm %s10687_s2, 4096 }
  0x1f   : > { %p9006_p3 = pnand %p8330_p13, %p10693_p1  ;;  %s244_s17 = sshll.u32 %s8875_s16, 4  ;;  %s9012_s17 = int_to_ptr.vmem [resolvable:$true] %s244_s17 }
  0x20   : > { %p8594_p2 = scmp.ne.s32.totalorder %s10687_s2, %s8593_s20  ;;  %p8600_p13 = scmp.lt.u32.totalorder %s8593_s20, %s10687_s2 }
  0x21   : > { %p9022_p5 = pneg %p9006_p3 }
  0x23   : > { %p8596_p7 = pnand %p9022_p5, %p8594_p2 }
  0x25   : > { %p8597_p10 = pneg %p8596_p7 }
  0x27   : > { %p8602_p0 = pnand %p8600_p13, %p8597_p10 }
  0x29   : > { %8605 = shalt.err (!%p8602_p0)
}
  0x2a   : > { %s8606_s18 = scalar_lea.vmem %s8999_s12, 4096  ;;  %p8614_p8 = scmp.lt.s32.totalorder %s8999_s12, %s8999_s12 }
  0x2b   : > { %p8607_p11 = scmp.ne.s32.totalorder %s8999_s12, %s8606_s18  ;;  %p8615_p6 = scmp.lt.s32.totalorder %s8606_s18, %s8606_s18 }
  0x2d   : > { %p8609_p1 = pnand %p8607_p11, %p9022_p5  ;;  %p8616_p2 = por %p8615_p6, %p8614_p8 }
  0x2f   : > { %p8610_p9 = pneg %p8609_p1 }
  0x31   : > { %p8617_p7 = pnand %p8616_p2, %p8610_p9 }
  0x33   : > { %8620 = shalt.err (!%p8617_p7)
}
  0x34   : > { %s8876_s19 = smov 512   ;;  %s8877_s20 = smov 32  }
  0x35   : > { %8333 = dma.hbm_to_vmem [thread:$0]  (!%p9006_p3), %s10687_s2, 4096, %s8999_s12, [#allocation12], %s8876_s19, %s8876_s19, %s8877_s20  }
  0x36   : > { %s8621_s21 = scalar_lea.hbm %s10688_s3, 16384 }
  0x37   : > { %p8622_p1 = scmp.ne.s32.totalorder %s10688_s3, %s8621_s21  ;;  %p8628_p9 = scmp.lt.u32.totalorder %s8621_s21, %s10688_s3 }
  0x39   : > { %p8624_p6 = pnand %p8622_p1, %p9022_p5 }
  0x3b   : > { %p8625_p8 = pneg %p8624_p6 }
  0x3d   : > { %p8630_p11 = pnand %p8628_p9, %p8625_p8 }
  0x3f   : > { %8633 = shalt.err (!%p8630_p11)
}
  0x40   : > { %s8634_s12 = scalar_lea.vmem %s9010_s15, 16384  ;;  %p8642_p2 = scmp.lt.s32.totalorder %s9010_s15, %s9010_s15 }
  0x41   : > { %p8635_p0 = scmp.ne.s32.totalorder %s9010_s15, %s8634_s12  ;;  %p8643_p7 = scmp.lt.s32.totalorder %s8634_s12, %s8634_s12 }
  0x43   : > { %p8637_p10 = pnand %p8635_p0, %p9022_p5  ;;  %p8644_p1 = por %p8643_p7, %p8642_p2 }
  0x45   : > { %p8638_p13 = pneg %p8637_p10 }
  0x47   : > { %p8645_p6 = pnand %p8644_p1, %p8638_p13 }
  0x49   : > { %8648 = shalt.err (!%p8645_p6)
}
  0x4a   : > { %8336 = dma.hbm_to_vmem [thread:$0]  (!%p9006_p3), %s10688_s3, 16384, %s9010_s15, [#allocation15], %s8876_s19, %s8876_s19, %s8877_s20  }
  0x4b   : > { %s8649_s29 = scalar_lea.hbm %s10689_s4, 128 }
  0x4c   : > { %p8650_p8 = scmp.ne.s32.totalorder %s10689_s4, %s8649_s29  ;;  %p8656_p0 = scmp.lt.u32.totalorder %s8649_s29, %s10689_s4 }
  0x4e   : > { %p8652_p9 = pnand %p8650_p8, %p9022_p5 }
  0x50   : > { %p8653_p11 = pneg %p8652_p9 }
  0x52   : > { %p8658_p10 = pnand %p8656_p0, %p8653_p11 }
  0x54   : > { %8661 = shalt.err (!%p8658_p10)
}
  0x55   : > { %s8662_s15 = scalar_lea.vmem %s9012_s17, 128  ;;  %p8670_p1 = scmp.lt.s32.totalorder %s9012_s17, %s9012_s17 }
  0x56   : > { %p8663_p13 = scmp.ne.s32.totalorder %s9012_s17, %s8662_s15  ;;  %p8671_p6 = scmp.lt.s32.totalorder %s8662_s15, %s8662_s15 }
  0x58   : > { %p8665_p2 = pnand %p8663_p13, %p9022_p5  ;;  %p8672_p8 = por %p8671_p6, %p8670_p1 }
  0x5a   : > { %p8666_p7 = pneg %p8665_p2 }
  0x5c   : > { %p8673_p9 = pnand %p8672_p8, %p8666_p7 }
  0x5e   : > { %8676 = shalt.err (!%p8673_p9)
}
  0x5f   : > { %s8878_s19 = smov 64   ;;  %s8879_s9 = smov 4  }
  0x60   : > { %8339 = dma.hbm_to_vmem [thread:$0]  (!%p9006_p3), %s10689_s4, 128, %s9012_s17, [#allocation15], %s8878_s19, %s8878_s19, %s8879_s9  }
  0x61   : > { %p10700_p5 = scmp.eq.s32.totalorder %s8871_s27, 0  ;;  %p10699_p11 = scmp.lt.s32.totalorder %s8871_s27, 2 }
  0x62   : > { %s37_s6 = sadd.s32 1, %s8867_s26  ;;  %p44_p0 = scmp.ne.s32.totalorder %s8867_s26, %s8863_s25 }
  0x63   : > { %s258_s21 = sand.u32 1, %s8867_s26   ;;  %s5266_s24 = sshll.u32 %s8871_s27, 10 }
  0x64   : > { %p46_p10 = por %p10700_p5, %p44_p0  ;;  %p10797_p13 = scmp.eq.s32.totalorder %s8963_s28, 1 }
  0x65   : > { %s5197_s29 = sshll.u32 %s258_s21, 6  ;;  %s10799_s0 = sld [smem:[#allocation95_spill]] }
  0x66   : > { %p9100_p2 = por %p10797_p13, %p44_p0  ;;  %s262_s17 = scalar_lea.vmem [#allocation8], %s5197_s29 }
  0x67   : > { %s269_s16 = sshll.u32 %s262_s17, 4  ;;  %p9111_p3 = pnand %p10699_p11, %p46_p10  ;;  %s9115_s16 = int_to_ptr.vmem [resolvable:$true] %s269_s16 }
  0x68   : > { %s10798_s8 = scalar_select %p9100_p2, 1, 0 }
  0x69   : > { %s9117_s15 = scalar_lea.sflag [#allocation9], %s258_s21  ;;  %p8679_p1 = pneg %p9111_p3 }
  0x6b   : > { %s9107_s14 = scalar_lea.hbm %s10799_s0, %s5266_s24  ;;  %s8682_s12 = scalar_lea.hbm %s10799_s0, 2048 }
  0x6c   : > { %s8677_s19 = scalar_lea.hbm %s9107_s14, 1024  ;;  %p8683_p9 = scmp.lt.u32.totalorder %s9107_s14, %s10799_s0 }
  0x6d   : > { %p8678_p7 = scmp.ne.s32.totalorder %s9107_s14, %s8677_s19  ;;  %p8684_p0 = scmp.lt.u32.totalorder %s8682_s12, %s8677_s19 }
  0x6e   : > { %p8686_p13 = scmp.lt.u32.totalorder %s8677_s19, %s9107_s14 }
  0x6f   : > { %p8680_p6 = pnand %p8679_p1, %p8678_p7  ;;  %p8685_p10 = por %p8684_p0, %p8683_p9 }
  0x71   : > { %p8681_p8 = pneg %p8680_p6  ;;  %p8687_p11 = por %p8686_p13, %p8685_p10 }
  0x73   : > { %p8688_p5 = pnand %p8687_p11, %p8681_p8 }
  0x75   : > { %8691 = shalt.err (!%p8688_p5)
}
  0x76   : > { %s8692_s21 = scalar_lea.vmem %s9115_s16, 1024  ;;  %s8880_s11 = smov [#allocation8]  }
  0x77   : > { %p8693_p7 = scmp.ne.s32.totalorder %s9115_s16, %s8692_s21  ;;  %s8697_s13 = sshll.u32 %s8880_s11, 4  ;;  %s8698_s13 = int_to_ptr.vmem [resolvable:$false] %s8697_s13 }
  0x78   : > { %s8699_s17 = scalar_lea.vmem %s8698_s13, 2048  ;;  %p8700_p4 = scmp.lt.s32.totalorder %s9115_s16, %s8698_s13 }
  0x79   : > { %p8695_p6 = pnand %p8693_p7, %p8679_p1  ;;  %p8701_p9 = scmp.lt.s32.totalorder %s8699_s17, %s8692_s21 }
  0x7b   : > { %p8696_p2 = pneg %p8695_p6  ;;  %p8702_p0 = por %p8701_p9, %p8700_p4 }
  0x7d   : > { %p8703_p10 = pnand %p8702_p0, %p8696_p2 }
  0x7f   : > { %8706 = shalt.err (!%p8703_p10)
}
  0x80   : > { %s10703_s19 = smov 128   ;;  %s10704_s9 = smov 8  }
  0x81   : > { %8343 = dma.hbm_to_vmem [thread:$0]  (!%p9111_p3), %s9107_s14, 1024, %s9115_s16, %s9117_s15, %s10703_s19, %s10703_s19, %s10704_s9  }
  0x82   : > { %s9149_s20 = sadd.s32 1, %s8871_s27   ;;  %s60_s24 = ssub.s32 1, %s8871_s27 }
  0x83   : > { %s34_s12 = ssub.s32 %s8871_s27, %s9149_s20  ;;  %s61_s29 = ssub.s32 1, %s9149_s20 }
  0x84   : > { %p35_p4 = scmp.eq.s32.totalorder %s34_s12, 0  ;;  %s65_s21 = sadd.s32 1, %s8855_s23 }
  0x85   : > { %s62_s13 = ssub.s32 %s60_s24, %s61_s29  ;;  %p72_p5 = scmp.ne.s32.totalorder %s8855_s23, %s8851_s22 }
  0x86   : > { %s9159_s11 = scalar_select %p35_p4, %s8867_s26, %s37_s6  }
  0x87   : > { %p63_p11 = scmp.eq.s32.totalorder %s62_s13, 0  ;;  %s279_s18 = sand.u32 1, %s8871_s27  }
  0x88   : > { %p10801_p2 = scmp.eq.s32.totalorder %s8871_s27, 0  ;;  %p10802_p3 = scmp.eq.s32.totalorder %s8963_s28, 1 }
  0x89   : > { %s9173_s16 = scalar_select %p63_p11, %s8855_s23, %s65_s21  }
  0x8a   : > { %p74_p1 = por %p72_p5, %p10801_p2  ;;  %p9168_p8 = por %p10802_p3, %p72_p5 }
  0x8b   : > { %s281_s15 = sand.u32 1, %s8855_s23   ;;  %s5267_s12 = sshll.u32 %s60_s24, 10 }
  0x8c   : > { %s10803_s14 = scalar_select %p9168_p8, 1, 0 }
  0x8d   : > { %s5200_s17 = sshll.u32 %s281_s15, 6  ;;  %s9179_s6 = scalar_lea.hbm %s10686_s1, %s5267_s12 }
  0x8e   : > { %s283_s29 = scalar_lea.vmem [#allocation11], %s5200_s17  ;;  %p10804_p13 = scmp.lt.s32.totalorder %s8871_s27, 2 }
  0x8f   : > { %s291_s13 = sshll.u32 %s283_s29, 4  ;;  %s9189_s24 = scalar_lea.sflag [#allocation12], %s279_s18  ;;  %s9187_s13 = int_to_ptr.vmem [resolvable:$true] %s291_s13 }
  0x90   : > { %p9183_p7 = pnand %p10804_p13, %p74_p1  ;;  %s8707_s19 = scalar_lea.hbm %s9179_s6, 1024 }
  0x91   : > { %p8708_p6 = scmp.ne.s32.totalorder %s9179_s6, %s8707_s19  ;;  %s8712_s15 = scalar_lea.hbm %s10686_s1, 2048 }
  0x92   : > { %p8709_p9 = pneg %p9183_p7  ;;  %p8713_p4 = scmp.lt.u32.totalorder %s9179_s6, %s10686_s1 }
  0x93   : > { %p8714_p5 = scmp.lt.u32.totalorder %s8712_s15, %s8707_s19  ;;  %p8716_p2 = scmp.lt.u32.totalorder %s8707_s19, %s9179_s6 }
  0x94   : > { %p8710_p0 = pnand %p8709_p9, %p8708_p6 }
  0x95   : > { %p8715_p11 = por %p8714_p5, %p8713_p4 }
  0x96   : > { %p8711_p10 = pneg %p8710_p0 }
  0x97   : > { %p8717_p1 = por %p8716_p2, %p8715_p11 }
  0x99   : > { %p8718_p3 = pnand %p8717_p1, %p8711_p10 }
  0x9b   : > { %8721 = shalt.err (!%p8718_p3)
}
  0x9c   : > { %s8722_s18 = scalar_lea.vmem %s9187_s13, 1024  ;;  %s8883_s29 = smov [#allocation11]  }
  0x9d   : > { %p8723_p13 = scmp.ne.s32.totalorder %s9187_s13, %s8722_s18  ;;  %s8727_s9 = sshll.u32 %s8883_s29, 4  ;;  %s8728_s9 = int_to_ptr.vmem [resolvable:$false] %s8727_s9 }
  0x9e   : > { %s8729_s21 = scalar_lea.vmem %s8728_s9, 2048  ;;  %p8730_p8 = scmp.lt.s32.totalorder %s9187_s13, %s8728_s9 }
  0x9f   : > { %p8725_p6 = pnand %p8723_p13, %p8709_p9  ;;  %p8731_p4 = scmp.lt.s32.totalorder %s8729_s21, %s8722_s18 }
  0xa1   : > { %p8726_p0 = pneg %p8725_p6  ;;  %p8732_p5 = por %p8731_p4, %p8730_p8 }
  0xa3   : > { %p8733_p11 = pnand %p8732_p5, %p8726_p0 }
  0xa5   : > { %8736 = shalt.err (!%p8733_p11)
}
  0xa6   : > { %s10806_s19 = smov 8   ;;  %s10807_s15 = smov 128  }
  0xa7   : > { %8346 = dma.hbm_to_vmem [thread:$0]  (!%p9183_p7), %s9179_s6, 1024, %s9187_s13, %s9189_s24, %s10807_s15, %s10807_s15, %s10806_s19  }
  0xa8   : > { %303 = sbr.rel (%p8995_p12) target bundleno = 2461 (0x99d), region = 40 }
  0xaf   : > { %s9223_s17 = sand.u32 1, %s8863_s25   ;;  %p10808_p8 = scmp.ne.s32.totalorder %s10788_s30, 0 }
  0xb0   : > { %s5204_s12 = sshll.u32 %s9223_s17, 6  ;;  %s306_s18 = scalar_lea.sflag [#allocation9], %s9223_s17 }
  0xb1   : > { %s9227_s29 = scalar_lea.vmem [#allocation8], %s5204_s12 }
  0xb2   : > { %8822 = dma.done.wait (%p10808_p8), %s306_s18, 1024  }
  0xb3   : > { %8824 = vsyncadd (%p10808_p8), %s306_s18, 4294966272  ;;  %s314_s0 = sand.u32 1, %s8963_s28   ;;  %s316_s10 = sand.u32 1, %s8851_s22  }
  0xb4   : > { %s5205_s6 = sshll.u32 %s316_s10, 6  ;;  %s315_s13 = scalar_lea.sflag [#allocation12], %s314_s0 }
  0xb5   : > { %s9237_s24 = scalar_lea.vmem [#allocation11], %s5205_s6  ;;  %p10809_p12 = scmp.ne.s32.totalorder %s10789_s7, 0 }
  0xb7   : > { %8826 = dma.done.wait (%p10809_p12), %s315_s13, 1024  }
  0xb8   : > { %8828 = vsyncadd (%p10809_p12), %s315_s13, 4294966272  ;;  %p10810_p7 = scmp.eq.s32.totalorder %s8963_s28, 0 }
  0xba   : > { %8830 = dma.done.wait (%p10810_p7), [#allocation12], 4096   ;;  %p10811_p9 = pmov %p10810_p7 }
  0xbb   : > { %p10812_p10 = pmov %p10810_p7 }
  0xbc   : > { %8832 = vsyncadd (%p10811_p9), [#allocation12], 4294963200 }
  0xbd   : > { %8834 = dma.done.wait (%p10812_p10), [#allocation15], 16512   ;;  %p10813_p2 = pmov %p10810_p7 }
  0xbe   : > { %s9251_s30 = scalar_lea.vmem [#allocation17], %s5204_s12  ;;  %s9253_s9 = scalar_lea.vmem [#allocation18], %s5205_s6 }
  0xbf   : > { %8836 = vsyncadd (%p10813_p2), [#allocation15], 4294950784  ;;  %p10814_p1 = scmp.ne.s32.totalorder %s8963_s28, 0 }
  0xc0   : > { %v8884_v0 = vmov (!%p10814_p1), 0.0  }
  0xc1   : > { %376 = sbr.rel (%p10814_p1) target bundleno = 200 (0xc8), region = 64  ;;  %377 = vst [vmem:[#allocation4] sm:$0xff] (!%p10814_p1), %v8884_v0  ;;  %378 = vst [vmem:[#allocation5] sm:$0xff] (!%p10814_p1), %v8884_v0 }
  0xc2   : > { %379 = vst [vmem:[#allocation6] sm:$0xff] (!%p10814_p1), %v8884_v0  ;;  %380 = vst [vmem:[#allocation7] sm:$0xff] (!%p10814_p1), %v8884_v0 }
  0xc8 PF: > { %v390_v1 = vld [vmem:[#allocation13 + $0x8] sm:$0xff]  ;;  %v392_v3 = vld [vmem:[#allocation13 + $0x18] sm:$0xff]  ;;  %v389_v6 = vld [vmem:[#allocation13] sm:$0xff]  ;;  %v10706_v8 = vmov 0.0   ;;  %vm427_vm0 = vcmask 261120   ;;  %v10730_v57 = vmov 0.0|0.0  }
  0xc9   : > { %v394_v2 = vld [vmem:[#allocation13 + $0x28] sm:$0xff]  ;;  %v396_v5 = vld [vmem:[#allocation13 + $0x38] sm:$0xff]  ;;  %v393_v7 = vld [vmem:[#allocation13 + $0x20] sm:$0xff]  ;;  %516 = vmatprep.mubr.f32.mxu0 %v10706_v8  ;;  %629 = vmatprep.mubr.f32.mxu1 %v10706_v8  ;;  %vm8887_vm1 = vmmov 0   ;;  %s5268_s7 = sshll.u32 %s8963_s28, 10  ;;  %s5018_s21 = sshll.u32 %s9251_s30, 4  ;;  %s10580_s21 = int_to_ptr.vmem [resolvable:$true] %s5018_s21 }
  0xca   : > { %v6934_v4 = vpack.c.bf16 %v394_v2, %v390_v1  ;;  %v6942_v9 = vpack.c.bf16 %v396_v5, %v392_v3  ;;  %v6936_v10 = vpack.c.bf16 %v393_v7, %v389_v6  ;;  %v391_v11 = vld [vmem:[#allocation13 + $0x10] sm:$0xff]  ;;  %v398_v13 = vld [vmem:[#allocation13 + $0x48] sm:$0xff]  ;;  %v400_v16 = vld [vmem:[#allocation13 + $0x58] sm:$0xff]  ;;  %s10578_s12 = scalar_lea.hbm %s10690_s5, %s5268_s7  ;;  %s5000_s18 = scalar_lea.sflag [#allocation10], %s9223_s17 }
  0xcb   : > { %v395_v12 = vld [vmem:[#allocation13 + $0x30] sm:$0xff]  ;;  %v402_v15 = vld [vmem:[#allocation13 + $0x68] sm:$0xff]  ;;  %v404_v17 = vld [vmem:[#allocation13 + $0x78] sm:$0xff]  ;;  %p11073_p13 = scmp.ne.s32.totalorder %s10798_s8, 0  ;;  %s8888_s0 = smov [#allocation17]  }
  0xcc   : > { %6935 = vmatprep.subr.bf16.mxu0 %v6934_v4  ;;  %v6944_v14 = vpack.c.bf16 %v395_v12, %v391_v11  ;;  %6943 = vmatprep.subr.bf16.mxu1 %v6942_v9  ;;  %v6938_v18 = vpack.c.bf16 %v402_v15, %v398_v13  ;;  %v6946_v19 = vpack.c.bf16 %v404_v17, %v400_v16  ;;  %v397_v20 = vld [vmem:[#allocation13 + $0x40] sm:$0xff]  ;;  %v399_v22 = vld [vmem:[#allocation13 + $0x50] sm:$0xff]  ;;  %v720_v25 = vld [vmem:[#allocation13 + $0x88] sm:$0xff]  ;;  %s8741_s6 = sshll.u32 %s8888_s0, 4  ;;  %s8742_s6 = int_to_ptr.vmem [resolvable:$false] %s8741_s6 }
  0xcd   : > { %6937 = vmatpush1.bf16.msra.mxu0 %v6936_v10  ;;  %v401_v21 = vld [vmem:[#allocation13 + $0x60] sm:$0xff]  ;;  %v403_v24 = vld [vmem:[#allocation13 + $0x70] sm:$0xff]  ;;  %v724_v27 = vld [vmem:[#allocation13 + $0xa8] sm:$0xff]  ;;  %s8743_s13 = scalar_lea.vmem %s8742_s6, 2048  ;;  %p8744_p4 = scmp.lt.s32.totalorder %s10580_s21, %s8742_s6 }
  0xce   : > { %6945 = vmatpush1.bf16.msra.mxu1 %v6944_v14  ;;  %v6940_v23 = vpack.c.bf16 %v401_v21, %v397_v20  ;;  %6939 = vmatprep.subr.bf16.mxu0 %v6938_v18  ;;  %v6948_v26 = vpack.c.bf16 %v403_v24, %v399_v22  ;;  %v719_v28 = vld [vmem:[#allocation13 + $0x80] sm:$0xff]  ;;  %v6950_v30 = vpack.c.bf16 %v724_v27, %v720_v25  ;;  %v728_v33 = vld [vmem:[#allocation13 + $0xc8] sm:$0xff]  ;;  %v722_v35 = vld [vmem:[#allocation13 + $0x98] sm:$0xff] }
  0xcf   : > { %6947 = vmatprep.subr.bf16.mxu1 %v6946_v19  ;;  %v723_v29 = vld [vmem:[#allocation13 + $0xa0] sm:$0xff]  ;;  %v732_v34 = vld [vmem:[#allocation13 + $0xe8] sm:$0xff]  ;;  %v726_v36 = vld [vmem:[#allocation13 + $0xb8] sm:$0xff] }
  0xd0   : > { %v381_v31 = vld [vmem:[%s9227_s29] sm:$0xff]  ;;  %v6952_v32 = vpack.c.bf16 %v723_v29, %v719_v28  ;;  %v6954_v38 = vpack.c.bf16 %v732_v34, %v728_v33  ;;  %v6958_v39 = vpack.c.bf16 %v726_v36, %v722_v35  ;;  %v721_v41 = vld [vmem:[#allocation13 + $0x90] sm:$0xff]  ;;  %v730_v44 = vld [vmem:[#allocation13 + $0xd8] sm:$0xff] }
  0xd1   : > { %6941 = vmatpush1.bf16.msra.mxu0 %v6940_v23  ;;  %v727_v37 = vld [vmem:[#allocation13 + $0xc0] sm:$0xff]  ;;  %v725_v42 = vld [vmem:[#allocation13 + $0xb0] sm:$0xff]  ;;  %v382_v45 = vld [vmem:[%s9227_s29 + $0x8] sm:$0xff] }
  0xd2   : > { %6949 = vmatpush1.bf16.msra.mxu1 %v6948_v26  ;;  %6951 = vmatprep.subr.bf16.mxu0 %v6950_v30  ;;  %v731_v40 = vld [vmem:[#allocation13 + $0xe0] sm:$0xff]  ;;  %v6960_v43 = vpack.c.bf16 %v725_v42, %v721_v41  ;;  %v734_v46 = vld [vmem:[#allocation13 + $0xf8] sm:$0xff]  ;;  %v729_v47 = vld [vmem:[#allocation13 + $0xd0] sm:$0xff] }
  0xd3   : > { %v6956_v48 = vpack.c.bf16 %v731_v40, %v727_v37  ;;  %v733_v49 = vld [vmem:[#allocation13 + $0xf0] sm:$0xff]  ;;  %v1041_v50 = vld [vmem:[#allocation14 + $0x8] sm:$0xff]  ;;  %6959 = vmatprep.subr.bf16.mxu1 %v6958_v39  ;;  %v6962_v52 = vpack.c.bf16 %v734_v46, %v730_v44  ;;  %v384_v56 = vld [vmem:[%s9227_s29 + $0x18] sm:$0xff] }
  0xd4   : > { %5212 = vmatmul.mubr.msk.f32.vlgmr.msra.gmra.mrb[0].mxu0 %vm427_vm0, %v381_v31  ;;  %v1044_v51 = vld [vmem:[#allocation14 + $0x28] sm:$0xff]  ;;  %v6964_v54 = vpack.c.bf16 %v733_v49, %v729_v47  ;;  %v383_v55 = vld [vmem:[%s9227_s29 + $0x10] sm:$0xff]  ;;  %v385_v58 = vld [vmem:[%s9227_s29 + $0x20] sm:$0xff] }
  0xd5   : > { %5220 = vmatmul.mubr.msk.f32.vlgmr.msra.gmra.mrb[0].mxu1 %vm427_vm0, %v381_v31  ;;  %6953 = vmatpush1.bf16.msra.mxu0 %v6952_v32  ;;  %v9265_v53 = vpack.c.bf16 %v1044_v51, %v1041_v50  ;;  %v386_v59 = vld [vmem:[%s9227_s29 + $0x28] sm:$0xff]  ;;  %v387_v60 = vld [vmem:[%s9227_s29 + $0x30] sm:$0xff]  ;;  %v388_v61 = vld [vmem:[%s9227_s29 + $0x38] sm:$0xff]  ;;  %s8737_s29 = scalar_lea.vmem %s10580_s21, 1024 }
  0xd6   : > { %522 = vmatprep.mubr.f32.mxu0 %v10706_v8  ;;  %635 = vmatprep.mubr.f32.mxu1 %v10706_v8  ;;  %v1040_v62 = vld [vmem:[#allocation14] sm:$0xff]  ;;  %v1042_v0 = vld [vmem:[#allocation14 + $0x10] sm:$0xff]  ;;  %v1047_v2 = vld [vmem:[#allocation14 + $0x48] sm:$0xff]  ;;  %p8738_p3 = scmp.ne.s32.totalorder %s10580_s21, %s8737_s29  ;;  %p8745_p5 = scmp.lt.s32.totalorder %s8743_s13, %s8737_s29 }
  0xd7   : > { %6955 = vmatprep.subr.bf16.mxu0 %v6954_v38  ;;  %6961 = vmatpush1.bf16.msra.mxu1 %v6960_v43  ;;  %v1043_v63 = vld [vmem:[#allocation14 + $0x20] sm:$0xff]  ;;  %v1045_v1 = vld [vmem:[#allocation14 + $0x30] sm:$0xff]  ;;  %v1050_v3 = vld [vmem:[#allocation14 + $0x68] sm:$0xff] }
  0xd8   : > { %5213 = vmatmul.mubr.msk.f32.gmra.mrb[2].mxu0 %vm427_vm0, %v382_v45  ;;  %6963 = vmatprep.subr.bf16.mxu1 %v6962_v52  ;;  %v710_v4 = vld [vmem:[%s9237_s24] sm:$0xff]  ;;  %v9303_v5 = vpack.c.bf16 %v1043_v63, %v1040_v62  ;;  %v9306_v6 = vpack.c.bf16 %v1045_v1, %v1042_v0  ;;  %v9308_v10 = vpack.c.bf16 %v1050_v3, %v1047_v2  ;;  %v1048_v11 = vld [vmem:[#allocation14 + $0x50] sm:$0xff]  ;;  %v1053_v13 = vld [vmem:[#allocation14 + $0x88] sm:$0xff]  ;;  %p8739_p6 = pnand %p8738_p3, %p11073_p13  ;;  %p8746_p11 = por %p8745_p5, %p8744_p4 }
  0xd9   : > { %5221 = vmatmul.mubr.msk.f32.gmra.mrb[2].mxu1 %vm427_vm0, %v382_v45  ;;  %528 = vmatprep.mubr.f32.mxu0 %v10706_v8  ;;  %v1046_v7 = vld [vmem:[#allocation14 + $0x40] sm:$0xff]  ;;  %v1051_v12 = vld [vmem:[#allocation14 + $0x70] sm:$0xff]  ;;  %v1056_v14 = vld [vmem:[#allocation14 + $0xa8] sm:$0xff] }
  0xda   : > { %641 = vmatprep.mubr.f32.mxu1 %v10706_v8  ;;  %6957 = vmatpush1.bf16.msra.mxu0 %v6956_v48  ;;  %10815 = vst [vmem:[#allocation30_spill] sm:$0xff] %v9306_v6  ;;  %v1049_v9 = vld [vmem:[#allocation14 + $0x60] sm:$0xff]  ;;  %10816 = vst [vmem:[#allocation31_spill] sm:$0xff] %v9308_v10  ;;  %v711_v15 = vld [vmem:[%s9237_s24 + $0x8] sm:$0xff]  ;;  %v9318_v17 = vpack.c.bf16 %v1051_v12, %v1048_v11  ;;  %v9322_v20 = vpack.c.bf16 %v1056_v14, %v1053_v13  ;;  %p8740_p0 = pneg %p8739_p6 }
  0xdb   : > { %6967 = vmatprep.subr.bf16.mxu0 %v9265_v53  ;;  %6965 = vmatpush1.bf16.msra.mxu1 %v6964_v54  ;;  %v9314_v16 = vpack.c.bf16 %v1049_v9, %v1046_v7  ;;  %v1052_v18 = vld [vmem:[#allocation14 + $0x80] sm:$0xff]  ;;  %v1054_v21 = vld [vmem:[#allocation14 + $0x90] sm:$0xff]  ;;  %v1059_v23 = vld [vmem:[#allocation14 + $0xc8] sm:$0xff] }
  0xdc   : > { %5214 = vmatmul.mubr.msk.f32.gmra.mrb[4].mxu0 %vm427_vm0, %v383_v55  ;;  %6998 = vmatprep.subr.bf16.mxu1 %v10730_v57  ;;  %10818 = vst [vmem:[#allocation33_spill] sm:$0xff] %v9318_v17  ;;  %v1055_v19 = vld [vmem:[#allocation14 + $0xa0] sm:$0xff]  ;;  %10819 = vst [vmem:[#allocation34_spill] sm:$0xff] %v9322_v20  ;;  %v1057_v22 = vld [vmem:[#allocation14 + $0xb0] sm:$0xff]  ;;  %p8747_p8 = pnand %p8746_p11, %p8740_p0 }
  0xdd   : > { %5222 = vmatmul.mubr.msk.f32.gmra.mrb[4].mxu1 %vm427_vm0, %v383_v55  ;;  %534 = vmatprep.mubr.f32.mxu0 %v10706_v8  ;;  %10817 = vst [vmem:[#allocation32_spill] sm:$0xff] %v9314_v16  ;;  %v1062_v24 = vld [vmem:[#allocation14 + $0xe8] sm:$0xff]  ;;  %v712_v25 = vld [vmem:[%s9237_s24 + $0x10] sm:$0xff]  ;;  %v9329_v26 = vpack.c.bf16 %v1055_v19, %v1052_v18  ;;  %v9333_v27 = vpack.c.bf16 %v1057_v22, %v1054_v21  ;;  %v1058_v28 = vld [vmem:[#allocation14 + $0xc0] sm:$0xff] }
  0xde   : > { %647 = vmatprep.mubr.f32.mxu1 %v10706_v8  ;;  %v1061_v29 = vld [vmem:[#allocation14 + $0xe0] sm:$0xff]  ;;  %v9337_v30 = vpack.c.bf16 %v1062_v24, %v1059_v23  ;;  %v1060_v31 = vld [vmem:[#allocation14 + $0xd0] sm:$0xff]  ;;  %v1065_v33 = vld [vmem:[#allocation14 + $0x108] sm:$0xff] }
  0xdf   : > { %10820 = vst [vmem:[#allocation35_spill] sm:$0xff] %v9329_v26  ;;  %10821 = vst [vmem:[#allocation36_spill] sm:$0xff] %v9333_v27  ;;  %v1063_v32 = vld [vmem:[#allocation14 + $0xf0] sm:$0xff]  ;;  %v1068_v34 = vld [vmem:[#allocation14 + $0x128] sm:$0xff]  ;;  %v9344_v36 = vpack.c.bf16 %v1061_v29, %v1058_v28 }
  0xe0   : > { %5215 = vmatmul.mubr.msk.f32.gmra.mrb[6].mxu0 %vm427_vm0, %v384_v56  ;;  %10822 = vst [vmem:[#allocation37_spill] sm:$0xff] %v9337_v30  ;;  %v713_v35 = vld [vmem:[%s9237_s24 + $0x18] sm:$0xff]  ;;  %v9348_v37 = vpack.c.bf16 %v1063_v32, %v1060_v31  ;;  %v1064_v38 = vld [vmem:[#allocation14 + $0x100] sm:$0xff]  ;;  %v9352_v40 = vpack.c.bf16 %v1068_v34, %v1065_v33  ;;  %v1066_v41 = vld [vmem:[#allocation14 + $0x110] sm:$0xff] }
  0xe1   : > { %5223 = vmatmul.mubr.msk.f32.gmra.mrb[6].mxu1 %vm427_vm0, %v384_v56  ;;  %540 = vmatprep.mubr.f32.mxu0 %v10706_v8  ;;  %10823 = vst [vmem:[#allocation38_spill] sm:$0xff] %v9344_v36  ;;  %v1067_v39 = vld [vmem:[#allocation14 + $0x120] sm:$0xff]  ;;  %v1069_v42 = vld [vmem:[#allocation14 + $0x130] sm:$0xff]  ;;  %v1071_v43 = vld [vmem:[#allocation14 + $0x148] sm:$0xff] }
  0xe2   : > { %653 = vmatprep.mubr.f32.mxu1 %v10706_v8  ;;  %10824 = vst [vmem:[#allocation39_spill] sm:$0xff] %v9348_v37  ;;  %10825 = vst [vmem:[#allocation40_spill] sm:$0xff] %v9352_v40  ;;  %v1074_v44 = vld [vmem:[#allocation14 + $0x168] sm:$0xff]  ;;  %v714_v45 = vld [vmem:[%s9237_s24 + $0x20] sm:$0xff]  ;;  %v9359_v46 = vpack.c.bf16 %v1067_v39, %v1064_v38  ;;  %v9363_v47 = vpack.c.bf16 %v1069_v42, %v1066_v41 }
  0xe3   : > { %v1070_v48 = vld [vmem:[#allocation14 + $0x140] sm:$0xff]  ;;  %v9367_v50 = vpack.c.bf16 %v1074_v44, %v1071_v43  ;;  %v1072_v51 = vld [vmem:[#allocation14 + $0x150] sm:$0xff]  ;;  %v1077_v54 = vld [vmem:[#allocation14 + $0x188] sm:$0xff] }
  0xe4   : > { %5216 = vmatmul.mubr.msk.f32.gmra.mrb[8].mxu0 %vm427_vm0, %v385_v58  ;;  %10826 = vst [vmem:[#allocation41_spill] sm:$0xff] %v9359_v46  ;;  %10827 = vst [vmem:[#allocation42_spill] sm:$0xff] %v9363_v47  ;;  %v1073_v49 = vld [vmem:[#allocation14 + $0x160] sm:$0xff]  ;;  %v1075_v52 = vld [vmem:[#allocation14 + $0x170] sm:$0xff] }
  0xe5   : > { %5224 = vmatmul.mubr.msk.f32.gmra.mrb[8].mxu1 %vm427_vm0, %v385_v58  ;;  %546 = vmatprep.mubr.f32.mxu0 %v10706_v8  ;;  %10828 = vst [vmem:[#allocation43_spill] sm:$0xff] %v9367_v50  ;;  %v1080_v55 = vld [vmem:[#allocation14 + $0x1a8] sm:$0xff]  ;;  %v9374_v58 = vpack.c.bf16 %v1073_v49, %v1070_v48  ;;  %v1078_v63 = vld [vmem:[#allocation14 + $0x190] sm:$0xff]  ;;  %v1082_v9 = vld [vmem:[#allocation14 + $0x1c0] sm:$0xff] }
  0xe6   : > { %659 = vmatprep.mubr.f32.mxu1 %v10706_v8  ;;  %v715_v56 = vld [vmem:[%s9237_s24 + $0x28] sm:$0xff]  ;;  %v9382_v62 = vpack.c.bf16 %v1080_v55, %v1077_v54  ;;  %v1081_v0 = vld [vmem:[#allocation14 + $0x1b0] sm:$0xff]  ;;  %v1085_v11 = vld [vmem:[#allocation14 + $0x1e0] sm:$0xff] }
  0xe7   : > { %10829 = vst [vmem:[#allocation44_spill] sm:$0xff] %v9374_v58  ;;  %v1083_v1 = vld [vmem:[#allocation14 + $0x1c8] sm:$0xff]  ;;  %v716_v3 = vld [vmem:[%s9237_s24 + $0x30] sm:$0xff]  ;;  %v9393_v7 = vpack.c.bf16 %v1081_v0, %v1078_v63  ;;  %v9404_v18 = vpack.c.bf16 %v1085_v11, %v1082_v9  ;;  %v1088_v21 = vld [vmem:[#allocation14 + $0x18] sm:$0xff] }
  0xe8   : > { %5217 = vmatmul.mubr.msk.f32.gmra.mrb[10].mxu0 %vm427_vm0, %v386_v59  ;;  %10831 = vst [vmem:[#allocation46_spill] sm:$0xff] %v9382_v62  ;;  %v1086_v2 = vld [vmem:[#allocation14 + $0x1e8] sm:$0xff]  ;;  %v1084_v13 = vld [vmem:[#allocation14 + $0x1d0] sm:$0xff]  ;;  %v1089_v22 = vld [vmem:[#allocation14 + $0x38] sm:$0xff] }
  0xe9   : > { %5225 = vmatmul.mubr.msk.f32.gmra.mrb[10].mxu1 %vm427_vm0, %v386_v59  ;;  %552 = vmatprep.mubr.f32.mxu0 %v10706_v8  ;;  %v9378_v59 = vpack.c.bf16 %v1075_v52, %v1072_v51  ;;  %10833 = vst [vmem:[#allocation48_spill] sm:$0xff] %v9393_v7  ;;  %v9397_v12 = vpack.c.bf16 %v1086_v2, %v1083_v1  ;;  %v1087_v14 = vld [vmem:[#allocation14 + $0x1f0] sm:$0xff]  ;;  %10835 = vst [vmem:[#allocation50_spill] sm:$0xff] %v9404_v18  ;;  %v1090_v31 = vld [vmem:[#allocation14 + $0x58] sm:$0xff] }
  0xea   : > { %665 = vmatprep.mubr.f32.mxu1 %v10706_v8  ;;  %v9408_v19 = vpack.c.bf16 %v1087_v14, %v1084_v13  ;;  %v1107_v23 = vld [vmem:[#allocation14 + $0x210] sm:$0xff]  ;;  %v9418_v28 = vpack.c.bf16 %v1089_v22, %v1088_v21  ;;  %v1091_v32 = vld [vmem:[#allocation14 + $0x78] sm:$0xff] }
  0xeb   : > { %10830 = vst [vmem:[#allocation45_spill] sm:$0xff] %v9378_v59  ;;  %10834 = vst [vmem:[#allocation49_spill] sm:$0xff] %v9397_v12  ;;  %v1110_v24 = vld [vmem:[#allocation14 + $0x230] sm:$0xff]  ;;  %v1092_v39 = vld [vmem:[#allocation14 + $0x98] sm:$0xff] }
  0xec   : > { %5218 = vmatmul.mubr.msk.f32.gmra.mrb[12].mxu0 %vm427_vm0, %v387_v60  ;;  %10836 = vst [vmem:[#allocation51_spill] sm:$0xff] %v9408_v19  ;;  %v9422_v29 = vpack.c.bf16 %v1110_v24, %v1107_v23  ;;  %v1113_v33 = vld [vmem:[#allocation14 + $0x250] sm:$0xff]  ;;  %v1093_v41 = vld [vmem:[#allocation14 + $0xb8] sm:$0xff] }
  0xed   : > { %5226 = vmatmul.mubr.msk.f32.gmra.mrb[12].mxu1 %vm427_vm0, %v387_v60  ;;  %558 = vmatprep.mubr.f32.mxu0 %v10706_v8  ;;  %v1076_v60 = vld [vmem:[#allocation14 + $0x180] sm:$0xff]  ;;  %v1116_v34 = vld [vmem:[#allocation14 + $0x270] sm:$0xff]  ;;  %v9443_v44 = vpack.c.bf16 %v1093_v41, %v1092_v39  ;;  %v1094_v48 = vld [vmem:[#allocation14 + $0xd8] sm:$0xff] }
  0xee   : > { %671 = vmatprep.mubr.f32.mxu1 %v10706_v8  ;;  %v9435_v38 = vpack.c.bf16 %v1116_v34, %v1113_v33  ;;  %v1119_v42 = vld [vmem:[#allocation14 + $0x290] sm:$0xff]  ;;  %v1095_v49 = vld [vmem:[#allocation14 + $0xf8] sm:$0xff]  ;;  %v1106_v41 = vld [vmem:[#allocation14 + $0x208] sm:$0xff] }
  0xef   : > { %v1122_v43 = vld [vmem:[#allocation14 + $0x2b0] sm:$0xff]  ;;  %v9451_v54 = vpack.c.bf16 %v1095_v49, %v1094_v48  ;;  %v1098_v2 = vld [vmem:[#allocation14 + $0x158] sm:$0xff] }
  0xf0   : > { %5219 = vmatmul.mubr.msk.f32.gmra.mrb[14].mxu0 %vm427_vm0, %v388_v61  ;;  %v1125_v51 = vld [vmem:[#allocation14 + $0x2d0] sm:$0xff]  ;;  %v1101_v21 = vld [vmem:[#allocation14 + $0x1b8] sm:$0xff] }
  0xf1   : > { %5227 = vmatmul.mubr.msk.f32.gmra.mrb[14].mxu1 %vm427_vm0, %v388_v61  ;;  %846 = vmatprep.mubr.f32.mxu0 %v10706_v8  ;;  %v1079_v61 = vld [vmem:[#allocation14 + $0x1a0] sm:$0xff]  ;;  %v1128_v52 = vld [vmem:[#allocation14 + $0x2f0] sm:$0xff]  ;;  %v1103_v33 = vld [vmem:[#allocation14 + $0x1f8] sm:$0xff] }
  0xf2   : > { %959 = vmatprep.mubr.f32.mxu1 %v10706_v8  ;;  %v9455_v55 = vpack.c.bf16 %v1128_v52, %v1125_v51  ;;  %v1134_v63 = vld [vmem:[#allocation14 + $0x330] sm:$0xff]  ;;  %v1105_v51 = vld [vmem:[#allocation14 + $0x200] sm:$0xff] }
  0xf3   : > { %v1137_v9 = vld [vmem:[#allocation14 + $0x350] sm:$0xff]  ;;  %v1108_v52 = vld [vmem:[#allocation14 + $0x220] sm:$0xff] }
  0xf4   : > { %5228 = vmatmul.mubr.msk.f32.vlgmr.msra.gmra.mrb[16].mxu0 %vm427_vm0, %v710_v4  ;;  %v1140_v11 = vld [vmem:[#allocation14 + $0x370] sm:$0xff] }
  0xf5   : > { %5236 = vmatmul.mubr.msk.f32.vlgmr.msra.gmra.mrb[16].mxu1 %vm427_vm0, %v710_v4  ;;  %6969 = vmatpush1.bf16.msra.mxu0 %v9303_v5  ;;  %v9389_v4 = vpack.c.bf16 %v1079_v61, %v1076_v60  ;;  %v1097_v60 = vld [vmem:[#allocation14 + $0x138] sm:$0xff]  ;;  %v1131_v61 = vld [vmem:[#allocation14 + $0x310] sm:$0xff]  ;;  %v9471_v14 = vpack.c.bf16 %v1140_v11, %v1137_v9 }
  0xf6   : > { %7000 = vmatpush3.bf16.msra.mxu1 %v9306_v6  ;;  %852 = vmatprep.mubr.f32.mxu0 %v10706_v8  ;;  %v9463_v1 = vpack.c.bf16 %v1134_v63, %v1131_v61  ;;  %v1143_v22 = vld [vmem:[#allocation14 + $0x390] sm:$0xff]  ;;  %v1112_v61 = vld [vmem:[#allocation14 + $0x248] sm:$0xff] }
  0xf7   : > { %965 = vmatprep.mubr.f32.mxu1 %v10706_v8  ;;  %6971 = vmatprep.subr.bf16.mxu0 %v9308_v10  ;;  %10832 = vst [vmem:[#allocation47_spill] sm:$0xff] %v9389_v4  ;;  %v1146_v23 = vld [vmem:[#allocation14 + $0x3b0] sm:$0xff]  ;;  %v1115_v63 = vld [vmem:[#allocation14 + $0x268] sm:$0xff] }
  0xf8   : > { %7001 = vmatprep.subr.bf16.mxu1 %v10730_v57  ;;  %5229 = vmatmul.mubr.msk.f32.gmra.mrb[18].mxu0 %vm427_vm0, %v711_v15  ;;  %v1149_v34 = vld [vmem:[#allocation14 + $0x3d0] sm:$0xff]  ;;  %v9501_v11 = vpack.c.bf16 %v1115_v63, %v1112_v61 }
  0xf9   : > { %5237 = vmatmul.mubr.msk.f32.gmra.mrb[18].mxu1 %vm427_vm0, %v711_v15  ;;  %6973 = vmatpush1.bf16.msra.mxu0 %v9314_v16  ;;  %v717_v15 = vld [vmem:[%s9237_s24 + $0x38] sm:$0xff]  ;;  %v1152_v39 = vld [vmem:[#allocation14 + $0x3f0] sm:$0xff] }
  0xfa   : > { %7003 = vmatpush3.bf16.msra.mxu1 %v9318_v17  ;;  %858 = vmatprep.mubr.f32.mxu0 %v10706_v8  ;;  %v9487_v48 = vpack.c.bf16 %v1152_v39, %v1149_v34 }
  0xfb   : > { %971 = vmatprep.mubr.f32.mxu1 %v10706_v8  ;;  %6975 = vmatprep.subr.bf16.mxu0 %v9322_v20 }
  0xfc   : > { %7004 = vmatprep.subr.bf16.mxu1 %v10730_v57  ;;  %5230 = vmatmul.mubr.msk.f32.gmra.mrb[20].mxu0 %vm427_vm0, %v712_v25 }
  0xfd   : > { %5238 = vmatmul.mubr.msk.f32.gmra.mrb[20].mxu1 %vm427_vm0, %v712_v25  ;;  %6977 = vmatpush1.bf16.msra.mxu0 %v9329_v26  ;;  %v9416_v25 = vld [vmem:[#allocation4] sm:$0xff] }
  0xfe   : > { %7006 = vmatpush3.bf16.msra.mxu1 %v9333_v27  ;;  %864 = vmatprep.mubr.f32.mxu0 %v10706_v8 }
  0xff   : > { %977 = vmatprep.mubr.f32.mxu1 %v10706_v8  ;;  %6979 = vmatprep.subr.bf16.mxu0 %v9337_v30 }
 0x100   : > { %7007 = vmatprep.subr.bf16.mxu1 %v10730_v57  ;;  %5231 = vmatmul.mubr.msk.f32.gmra.mrb[22].mxu0 %vm427_vm0, %v713_v35 }
 0x101   : > { %5239 = vmatmul.mubr.msk.f32.gmra.mrb[22].mxu1 %vm427_vm0, %v713_v35  ;;  %6981 = vmatpush1.bf16.msra.mxu0 %v9344_v36  ;;  %v9431_v35 = vpack.c.bf16 %v1091_v32, %v1090_v31  ;;  %v9479_v31 = vpack.c.bf16 %v1146_v23, %v1143_v22  ;;  %v1102_v32 = vld [vmem:[#allocation14 + $0x1d8] sm:$0xff] }
 0x102   : > { %7009 = vmatpush3.bf16.msra.mxu1 %v9348_v37  ;;  %870 = vmatprep.mubr.f32.mxu0 %v10706_v8  ;;  %v1155_v22 = vld [vmem:[#allocation14 + $0x258] sm:$0xff] }
 0x103   : > { %983 = vmatprep.mubr.f32.mxu1 %v10706_v8  ;;  %6983 = vmatprep.subr.bf16.mxu0 %v9352_v40  ;;  %v1156_v23 = vld [vmem:[#allocation14 + $0x278] sm:$0xff] }
 0x104   : > { %7010 = vmatprep.subr.bf16.mxu1 %v10730_v57  ;;  %5232 = vmatmul.mubr.msk.f32.gmra.mrb[24].mxu0 %vm427_vm0, %v714_v45  ;;  %v9511_v39 = vpack.c.bf16 %v1156_v23, %v1155_v22  ;;  %v1126_v22 = vld [vmem:[#allocation14 + $0x2e0] sm:$0xff]  ;;  %v1159_v23 = vld [vmem:[#allocation14 + $0x2d8] sm:$0xff] }
 0x105   : > { %5240 = vmatmul.mubr.msk.f32.gmra.mrb[24].mxu1 %vm427_vm0, %v714_v45  ;;  %6985 = vmatpush1.bf16.msra.mxu0 %v9359_v46  ;;  %v9447_v45 = vpack.c.bf16 %v1122_v43, %v1119_v42  ;;  %v1109_v42 = vld [vmem:[#allocation14 + $0x228] sm:$0xff]  ;;  %v9483_v43 = vpack.c.bf16 %v1103_v33, %v1102_v32 }
 0x106   : > { %7012 = vmatpush3.bf16.msra.mxu1 %v9363_v47  ;;  %876 = vmatprep.mubr.f32.mxu0 %v10706_v8  ;;  %v9489_v49 = vpack.c.bf16 %v1109_v42, %v1106_v41  ;;  %v1118_v32 = vld [vmem:[#allocation14 + $0x288] sm:$0xff]  ;;  %10838 = vst [vmem:[#allocation53_spill] sm:$0xff] %v9511_v39  ;;  %v1117_v42 = vld [vmem:[#allocation14 + $0x280] sm:$0xff] }
 0x107   : > { %989 = vmatprep.mubr.f32.mxu1 %v10706_v8  ;;  %6987 = vmatprep.subr.bf16.mxu0 %v9367_v50  ;;  %v1121_v33 = vld [vmem:[#allocation14 + $0x2a8] sm:$0xff] }
 0x108   : > { %7013 = vmatprep.subr.bf16.mxu1 %v10730_v57  ;;  %5233 = vmatmul.mubr.msk.f32.gmra.mrb[26].mxu0 %vm427_vm0, %v715_v56  ;;  %v9513_v41 = vpack.c.bf16 %v1121_v33, %v1118_v32  ;;  %v1160_v32 = vld [vmem:[#allocation14 + $0x2f8] sm:$0xff]  ;;  %v1130_v33 = vld [vmem:[#allocation14 + $0x308] sm:$0xff] }
 0x109   : > { %5241 = vmatmul.mubr.msk.f32.gmra.mrb[26].mxu1 %vm427_vm0, %v715_v56  ;;  %6989 = vmatpush1.bf16.msra.mxu0 %v9374_v58  ;;  %v1096_v56 = vld [vmem:[#allocation14 + $0x118] sm:$0xff] }
 0x10a   : > { %7015 = vmatpush3.bf16.msra.mxu1 %v9378_v59  ;;  %882 = vmatprep.mubr.f32.mxu0 %v10706_v8  ;;  %v9459_v0 = vpack.c.bf16 %v1097_v60, %v1096_v56  ;;  %v1153_v56 = vld [vmem:[#allocation14 + $0x218] sm:$0xff]  ;;  %10839 = vst [vmem:[#allocation54_spill] sm:$0xff] %v9513_v41 }
 0x10b   : > { %995 = vmatprep.mubr.f32.mxu1 %v10706_v8  ;;  %6991 = vmatprep.subr.bf16.mxu0 %v9382_v62  ;;  %v1154_v60 = vld [vmem:[#allocation14 + $0x238] sm:$0xff] }
 0x10c   : > { %7016 = vmatprep.subr.bf16.mxu1 %v10730_v57  ;;  %5234 = vmatmul.mubr.msk.f32.gmra.mrb[28].mxu0 %vm427_vm0, %v716_v3  ;;  %v9499_v9 = vpack.c.bf16 %v1154_v60, %v1153_v56  ;;  %v1124_v56 = vld [vmem:[#allocation14 + $0x2c8] sm:$0xff] }
 0x10d   : > { %5242 = vmatmul.mubr.msk.f32.gmra.mrb[28].mxu1 %vm427_vm0, %v716_v3  ;;  %6993 = vmatpush1.bf16.msra.mxu0 %v9389_v4  ;;  %v1099_v3 = vld [vmem:[#allocation14 + $0x178] sm:$0xff]  ;;  %v1127_v60 = vld [vmem:[#allocation14 + $0x2e8] sm:$0xff] }
 0x10e   : > { %7018 = vmatpush3.bf16.msra.mxu1 %v9393_v7  ;;  %888 = vmatprep.mubr.f32.mxu0 %v10706_v8  ;;  %v9467_v13 = vpack.c.bf16 %v1099_v3, %v1098_v2  ;;  %v9493_v2 = vld [vmem:[#allocation6] sm:$0xff]  ;;  %v9495_v3 = vpack.c.bf16 %v1108_v52, %v1105_v51  ;;  %10837 = vst [vmem:[#allocation52_spill] sm:$0xff] %v9499_v9  ;;  %v1120_v51 = vld [vmem:[#allocation14 + $0x2a0] sm:$0xff]  ;;  %v1157_v52 = vld [vmem:[#allocation14 + $0x298] sm:$0xff] }
 0x10f   : > { %1001 = vmatprep.mubr.f32.mxu1 %v10706_v8  ;;  %6995 = vmatprep.subr.bf16.mxu0 %v9397_v12  ;;  %v9520_v61 = vpack.c.bf16 %v1120_v51, %v1117_v42  ;;  %v9534_v51 = vpack.c.bf16 %v1160_v32, %v1159_v23  ;;  %v1135_v23 = vld [vmem:[#allocation14 + $0x340] sm:$0xff] }
 0x110   : > { %7019 = vmatprep.subr.bf16.mxu1 %v10730_v57  ;;  %5235 = vmatmul.mubr.msk.f32.gmra.mrb[30].mxu0 %vm427_vm0, %v717_v15  ;;  %v1138_v32 = vld [vmem:[#allocation14 + $0x360] sm:$0xff] }
 0x111   : > { %5243 = vmatmul.mubr.msk.f32.gmra.mrb[30].mxu1 %vm427_vm0, %v717_v15  ;;  %6997 = vmatpush1.bf16.msra.mxu0 %v9404_v18  ;;  %v1100_v15 = vld [vmem:[#allocation14 + $0x198] sm:$0xff]  ;;  %10840 = vst [vmem:[#allocation55_spill] sm:$0xff] %v9520_v61  ;;  %10844 = vst [vmem:[#allocation59_spill] sm:$0xff] %v9534_v51 }
 0x112   : > { %7021 = vmatpush3.bf16.msra.mxu1 %v9408_v19  ;;  %1241 = vmatprep.mubr.f32.mxu0 %v10706_v8  ;;  %v9475_v24 = vpack.c.bf16 %v1101_v21, %v1100_v15  ;;  %v1111_v15 = vld [vmem:[#allocation14 + $0x240] sm:$0xff] }
 0x113   : > { %5846 = vmatprep.mubr.msk.f32.mxu1 %vm8887_vm1, %v10706_v8  ;;  %7022 = vmatprep.subr.bf16.mxu0 %v10730_v57  ;;  %v1114_v21 = vld [vmem:[#allocation14 + $0x260] sm:$0xff] }
 0x114   : > { %7078 = vmatprep.subr.bf16.mxu1 %v10730_v57  ;;  %1242 = vmatmul.mubr.f32.vlgmr.msra.gmra.mrb[0].mxu0 %v9416_v25  ;;  %v9507_v34 = vpack.c.bf16 %v1114_v21, %v1111_v15  ;;  %v9526_v15 = vpack.c.bf16 %v1127_v60, %v1124_v56  ;;  %v1123_v21 = vld [vmem:[#allocation14 + $0x2c0] sm:$0xff]  ;;  %v1161_v60 = vld [vmem:[#allocation14 + $0x318] sm:$0xff] }
 0x115   : > { %5847 = vmatmul.mubr.f32.vlgmr.msra.gmra.mrb[32].mxu1 %v9416_v25  ;;  %7024 = vmatpush3.bf16.msra.mxu0 %v9418_v28  ;;  %v9530_v42 = vpack.c.bf16 %v1126_v22, %v1123_v21  ;;  %v1132_v56 = vld [vmem:[#allocation14 + $0x320] sm:$0xff] }
 0x116   : > { %7080 = vmatpush3.bf16.msra.mxu1 %v9422_v29  ;;  %7025 = vmatprep.subr.bf16.mxu0 %v10730_v57  ;;  %10842 = vst [vmem:[#allocation57_spill] sm:$0xff] %v9526_v15 }
 0x117   : > { %7081 = vmatprep.subr.bf16.mxu1 %v10730_v57  ;;  %5881 = vmatprep.mubr.msk.f32.mxu0 %vm8887_vm1, %v10706_v8  ;;  %10843 = vst [vmem:[#allocation58_spill] sm:$0xff] %v9530_v42 }
 0x118   : > { %5916 = vmatprep.mubr.msk.f32.mxu1 %vm8887_vm1, %v10706_v8 }
 0x119   : > { %7027 = vmatpush3.bf16.msra.mxu0 %v9431_v35 }
 0x11a   : > { %7083 = vmatpush3.bf16.msra.mxu1 %v9435_v38  ;;  %7028 = vmatprep.subr.bf16.mxu0 %v10730_v57 }
 0x11b   : > { %7084 = vmatprep.subr.bf16.mxu1 %v10730_v57 }
 0x11d   : > { %7030 = vmatpush3.bf16.msra.mxu0 %v9443_v44 }
 0x11e   : > { %7086 = vmatpush3.bf16.msra.mxu1 %v9447_v45  ;;  %7031 = vmatprep.subr.bf16.mxu0 %v10730_v57 }
 0x11f   : > { %7087 = vmatprep.subr.bf16.mxu1 %v10730_v57 }
 0x121   : > { %7033 = vmatpush3.bf16.msra.mxu0 %v9451_v54 }
 0x122   : > { %7089 = vmatpush3.bf16.msra.mxu1 %v9455_v55  ;;  %7034 = vmatprep.subr.bf16.mxu0 %v10730_v57 }
 0x123   : > { %7090 = vmatprep.subr.bf16.mxu1 %v10730_v57 }
 0x125   : > { %7036 = vmatpush3.bf16.msra.mxu0 %v9459_v0 }
 0x126   : > { %7092 = vmatpush3.bf16.msra.mxu1 %v9463_v1  ;;  %7037 = vmatprep.subr.bf16.mxu0 %v10730_v57 }
 0x127   : > { %7093 = vmatprep.subr.bf16.mxu1 %v10730_v57 }
 0x129   : > { %7039 = vmatpush3.bf16.msra.mxu0 %v9467_v13 }
 0x12a   : > { %7095 = vmatpush3.bf16.msra.mxu1 %v9471_v14  ;;  %7040 = vmatprep.subr.bf16.mxu0 %v10730_v57 }
 0x12b   : > { %7096 = vmatprep.subr.bf16.mxu1 %v10730_v57 }
 0x12d   : > { %7042 = vmatpush3.bf16.msra.mxu0 %v9475_v24 }
 0x12e   : > { %7098 = vmatpush3.bf16.msra.mxu1 %v9479_v31  ;;  %7043 = vmatprep.subr.bf16.mxu0 %v10730_v57 }
 0x12f   : > { %7099 = vmatprep.subr.bf16.mxu1 %v10730_v57 }
 0x131   : > { %7045 = vmatpush3.bf16.msra.mxu0 %v9483_v43 }
 0x132   : > { %7101 = vmatpush3.bf16.msra.mxu1 %v9487_v48  ;;  %7047 = vmatprep.subr.bf16.mxu0 %v9489_v49 }
 0x133   : > { %7102 = vmatprep.subr.bf16.mxu1 %v10730_v57 }
 0x134   : > { %5882 = vmatmul.mubr.f32.vlgmr.msra.gmra.mrb[32].mxu0 %v9416_v25  ;;  %v1158_v25 = vld [vmem:[#allocation14 + $0x2b8] sm:$0xff] }
 0x135   : > { %5917 = vmatmul.mubr.f32.vlgmr.msra.gmra.mrb[34].mxu1 %v9493_v2  ;;  %7049 = vmatpush1.bf16.msra.mxu0 %v9495_v3  ;;  %v9524_v63 = vpack.c.bf16 %v1158_v25, %v1157_v52  ;;  %v1129_v25 = vld [vmem:[#allocation14 + $0x300] sm:$0xff] }
 0x136   : > { %7104 = vmatpush3.bf16.msra.mxu1 %v9499_v9  ;;  %7051 = vmatprep.subr.bf16.mxu0 %v9501_v11  ;;  %v1136_v9 = vld [vmem:[#allocation14 + $0x348] sm:$0xff]  ;;  %v9540_v21 = vpack.c.bf16 %v1132_v56, %v1129_v25  ;;  %v9550_v25 = vpack.c.bf16 %v1138_v32, %v1135_v23  ;;  %v1144_v56 = vld [vmem:[#allocation14 + $0x3a0] sm:$0xff] }
 0x137   : > { %7105 = vmatprep.subr.bf16.mxu1 %v10730_v57  ;;  %1479 = vmatprep.mubr.f32.mxu0 %v10706_v8  ;;  %10841 = vst [vmem:[#allocation56_spill] sm:$0xff] %v9524_v63  ;;  %v1150_v32 = vld [vmem:[#allocation14 + $0x3e0] sm:$0xff] }
 0x138   : > { %5951 = vmatprep.mubr.msk.f32.mxu1 %vm8887_vm1, %v10706_v8  ;;  %v1133_v8 = vld [vmem:[#allocation14 + $0x328] sm:$0xff] }
 0x139   : > { %7053 = vmatpush1.bf16.msra.mxu0 %v9507_v34  ;;  %v9536_v52 = vpack.c.bf16 %v1133_v8, %v1130_v33  ;;  %v1163_v33 = vld [vmem:[#allocation14 + $0x358] sm:$0xff] }
 0x13a   : > { %7107 = vmatpush3.bf16.msra.mxu1 %v9511_v39  ;;  %7055 = vmatprep.subr.bf16.mxu0 %v9513_v41  ;;  %v1162_v39 = vld [vmem:[#allocation14 + $0x338] sm:$0xff]  ;;  %v1139_v41 = vld [vmem:[#allocation14 + $0x368] sm:$0xff] }
 0x13b   : > { %7108 = vmatprep.subr.bf16.mxu1 %v10730_v57  ;;  %10845 = vst [vmem:[#allocation60_spill] sm:$0xff] %v9536_v52  ;;  %v9544_v22 = vpack.c.bf16 %v1162_v39, %v1161_v60  ;;  %v9546_v8 = vpack.c.bf16 %v1139_v41, %v1136_v9  ;;  %v1141_v41 = vld [vmem:[#allocation14 + $0x380] sm:$0xff]  ;;  %v1165_v60 = vld [vmem:[#allocation14 + $0x398] sm:$0xff] }
 0x13c   : > { %v9560_v23 = vpack.c.bf16 %v1144_v56, %v1141_v41 }
 0x13d   : > { %7057 = vmatpush1.bf16.msra.mxu0 %v9520_v61  ;;  %10846 = vst [vmem:[#allocation61_spill] sm:$0xff] %v9544_v22  ;;  %10847 = vst [vmem:[#allocation62_spill] sm:$0xff] %v9546_v8  ;;  %v1145_v61 = vld [vmem:[#allocation14 + $0x3a8] sm:$0xff] }
 0x13e   : > { %7110 = vmatpush3.bf16.msra.mxu1 %v9524_v63  ;;  %7059 = vmatprep.subr.bf16.mxu0 %v9526_v15  ;;  %v1164_v63 = vld [vmem:[#allocation14 + $0x378] sm:$0xff]  ;;  %v1142_v15 = vld [vmem:[#allocation14 + $0x388] sm:$0xff] }
 0x13f   : > { %7111 = vmatprep.subr.bf16.mxu1 %v10730_v57  ;;  %v9554_v39 = vpack.c.bf16 %v1164_v63, %v1163_v33  ;;  %v9556_v9 = vpack.c.bf16 %v1145_v61, %v1142_v15  ;;  %v1147_v15 = vld [vmem:[#allocation14 + $0x3c0] sm:$0xff]  ;;  %v1167_v33 = vld [vmem:[#allocation14 + $0x3d8] sm:$0xff] }
 0x141   : > { %7061 = vmatpush1.bf16.msra.mxu0 %v9530_v42  ;;  %10848 = vst [vmem:[#allocation63_spill] sm:$0xff] %v9554_v39  ;;  %v1151_v42 = vld [vmem:[#allocation14 + $0x3e8] sm:$0xff] }
 0x142   : > { %7113 = vmatpush3.bf16.msra.mxu1 %v9534_v51  ;;  %7063 = vmatprep.subr.bf16.mxu0 %v9536_v52  ;;  %v1166_v51 = vld [vmem:[#allocation14 + $0x3b8] sm:$0xff]  ;;  %v1148_v52 = vld [vmem:[#allocation14 + $0x3c8] sm:$0xff] }
 0x143   : > { %7114 = vmatprep.subr.bf16.mxu1 %v10730_v57  ;;  %v9564_v63 = vpack.c.bf16 %v1166_v51, %v1165_v60  ;;  %v9566_v61 = vpack.c.bf16 %v1151_v42, %v1148_v52  ;;  %v10851_v42 = vmov 0.0  }
 0x145   : > { %7065 = vmatpush1.bf16.msra.mxu0 %v9540_v21  ;;  %10849 = vst [vmem:[#allocation64_spill] sm:$0xff] %v9564_v63 }
 0x146   : > { %7116 = vmatpush3.bf16.msra.mxu1 %v9544_v22  ;;  %7067 = vmatprep.subr.bf16.mxu0 %v9546_v8  ;;  %v1168_v22 = vld [vmem:[#allocation14 + $0x3f8] sm:$0xff]  ;;  %v9570_v8 = vpack.c.bf16 %v1150_v32, %v1147_v15 }
 0x147   : > { %7117 = vmatprep.subr.bf16.mxu1 %v10730_v57  ;;  %v9574_v41 = vpack.c.bf16 %v1168_v22, %v1167_v33  ;;  %v9621_v22 = vld [vmem:[#allocation16] sm:$0xf] }
 0x149   : > { %7069 = vmatpush1.bf16.msra.mxu0 %v9550_v25  ;;  %10850 = vst [vmem:[#allocation65_spill] sm:$0xff] %v9574_v41 }
 0x14a   : > { %7119 = vmatpush3.bf16.msra.mxu1 %v9554_v39  ;;  %7071 = vmatprep.subr.bf16.mxu0 %v9556_v9 }
 0x14b   : > { %7120 = vmatprep.subr.bf16.mxu1 %v10730_v57 }
 0x14d   : > { %7073 = vmatpush1.bf16.msra.mxu0 %v9560_v23 }
 0x14e   : > { %7122 = vmatpush3.bf16.msra.mxu1 %v9564_v63  ;;  %7075 = vmatprep.subr.bf16.mxu0 %v9566_v61 }
 0x14f   : > { %7123 = vmatprep.subr.bf16.mxu1 %v10730_v57 }
 0x151   : > { %7077 = vmatpush1.bf16.msra.mxu0 %v9570_v8 }
 0x152   : > { %7125 = vmatpush3.bf16.msra.mxu1 %v9574_v41  ;;  %7127 = vmatprep.subr.bf16.mxu0 %v9265_v53 }
 0x153   : > { %7158 = vmatprep.subr.bf16.mxu1 %v10730_v57 }
 0x154   : > { %1480 = vmatmul.mubr.f32.vlgmr.msra.gmra.mrb[30].mxu0 %v9493_v2 }
 0x155   : > { %5952 = vmatmul.mubr.f32.vlgmr.msra.gmra.mrb[36].mxu1 %v9493_v2  ;;  %7129 = vmatpush1.bf16.msra.mxu0 %v9303_v5  ;;  %v407_v2 = vlaneseq }
 0x156   : > { %7160 = vmatpush3.bf16.msra.mxu1 %v9306_v6  ;;  %7131 = vmatprep.subr.bf16.mxu0 %v9308_v10 }
 0x157   : > { %7161 = vmatprep.subr.bf16.mxu1 %v10730_v57  ;;  %1718 = vmatprep.mubr.f32.mxu0 %v10851_v42  ;;  %v9618_v51 = vshrl.u32 %v407_v2, 7 }
 0x158   : > { %5986 = vmatprep.mubr.msk.f32.mxu1 %vm8887_vm1, %v10851_v42 }
 0x159   : > { %7133 = vmatpush1.bf16.msra.mxu0 %v9314_v16  ;;  %v417_v52 = vsub.s32 2, %v9618_v51  ;;  %v421_v60 = vsub.s32 3, %v9618_v51 }
 0x15a   : > { %7163 = vmatpush3.bf16.msra.mxu1 %v9318_v17  ;;  %7135 = vmatprep.subr.bf16.mxu0 %v9322_v20 }
 0x15b   : > { %7164 = vmatprep.subr.bf16.mxu1 %v10730_v57  ;;  %v9629_v32 = vrot.slane %v9621_v22, %v417_v52  ;;  %v9632_v33 = vrot.slane %v9621_v22, %v421_v60 }
 0x15d   : > { %7137 = vmatpush1.bf16.msra.mxu0 %v9329_v26 }
 0x15e   : > { %7166 = vmatpush3.bf16.msra.mxu1 %v9333_v27  ;;  %7139 = vmatprep.subr.bf16.mxu0 %v9337_v30 }
 0x15f   : > { %7167 = vmatprep.subr.bf16.mxu1 %v10730_v57 }
 0x161   : > { %7141 = vmatpush1.bf16.msra.mxu0 %v9344_v36 }
 0x162   : > { %7169 = vmatpush3.bf16.msra.mxu1 %v9348_v37  ;;  %7143 = vmatprep.subr.bf16.mxu0 %v9352_v40 }
 0x163   : > { %7170 = vmatprep.subr.bf16.mxu1 %v10730_v57 }
 0x165   : > { %7145 = vmatpush1.bf16.msra.mxu0 %v9359_v46 }
 0x166   : > { %7172 = vmatpush3.bf16.msra.mxu1 %v9363_v47  ;;  %7147 = vmatprep.subr.bf16.mxu0 %v9367_v50 }
 0x167   : > { %7173 = vmatprep.subr.bf16.mxu1 %v10730_v57 }
 0x169   : > { %7149 = vmatpush1.bf16.msra.mxu0 %v9374_v58 }
 0x16a   : > { %7175 = vmatpush3.bf16.msra.mxu1 %v9378_v59  ;;  %7151 = vmatprep.subr.bf16.mxu0 %v9382_v62 }
 0x16b   : > { %7176 = vmatprep.subr.bf16.mxu1 %v10730_v57 }
 0x16d   : > { %7153 = vmatpush1.bf16.msra.mxu0 %v9389_v4 }
 0x16e   : > { %7178 = vmatpush3.bf16.msra.mxu1 %v9393_v7  ;;  %7155 = vmatprep.subr.bf16.mxu0 %v9397_v12 }
 0x16f   : > { %7179 = vmatprep.subr.bf16.mxu1 %v10730_v57 }
 0x171   : > { %7157 = vmatpush1.bf16.msra.mxu0 %v9404_v18 }
 0x172   : > { %7181 = vmatpush3.bf16.msra.mxu1 %v9408_v19  ;;  %7182 = vmatprep.subr.bf16.mxu0 %v10730_v57 }
 0x173   : > { %7238 = vmatprep.subr.bf16.mxu1 %v10730_v57 }
 0x1a8   : > { %v9623_v56 = vpop.f32.mrb[0].mxu1 }
 0x1a9   : > { %v9626_v15 = vpop.f32.mrb[1].mxu1 }
 0x1ac   : > { %v637_v57 = vpop.f32.mrb[2].mxu1 }
 0x1ad   : > { %v9635_v2 = vadd.f32 %v637_v57, %v9629_v32  ;;  %v639_v19 = vpop.f32.mrb[3].mxu1 }
 0x1ae   : > { %v9638_v7 = vadd.f32 %v639_v19, %v9632_v33 }
 0x1af   : > { %10852 = vst [vmem:[#allocation66_spill] sm:$0xff] %v9635_v2 }
 0x1b0   : > { %10853 = vst [vmem:[#allocation67_spill] sm:$0xff] %v9638_v7  ;;  %v643_v59 = vpop.f32.mrb[4].mxu1 }
 0x1b1   : > { %v9641_v47 = vadd.f32 %v643_v59, %v9629_v32  ;;  %v645_v37 = vpop.f32.mrb[5].mxu1 }
 0x1b2   : > { %v9644_v18 = vadd.f32 %v645_v37, %v9632_v33 }
 0x1b3   : > { %10854 = vst [vmem:[#allocation68_spill] sm:$0xff] %v9641_v47 }
 0x1b4   : > { %10855 = vst [vmem:[#allocation69_spill] sm:$0xff] %v9644_v18  ;;  %v649_v12 = vpop.f32.mrb[6].mxu1 }
 0x1b5   : > { %v9647_v27 = vadd.f32 %v649_v12, %v9629_v32  ;;  %v651_v4 = vpop.f32.mrb[7].mxu1 }
 0x1b6   : > { %v9650_v57 = vadd.f32 %v651_v4, %v9632_v33 }
 0x1b7   : > { %10856 = vst [vmem:[#allocation70_spill] sm:$0xff] %v9647_v27 }
 0x1b8   : > { %10857 = vst [vmem:[#allocation71_spill] sm:$0xff] %v9650_v57  ;;  %v655_v2 = vpop.f32.mrb[8].mxu1 }
 0x1b9   : > { %v9653_v19 = vadd.f32 %v655_v2, %v9629_v32  ;;  %v657_v7 = vpop.f32.mrb[9].mxu1 }
 0x1ba   : > { %v9656_v59 = vadd.f32 %v657_v7, %v9632_v33 }
 0x1bb   : > { %10858 = vst [vmem:[#allocation72_spill] sm:$0xff] %v9653_v19  ;;  %v9670_v19 = vld [vmem:[#allocation16 + $0x4] sm:$0xf] }
 0x1bc   : > { %10859 = vst [vmem:[#allocation73_spill] sm:$0xff] %v9656_v59  ;;  %v661_v47 = vpop.f32.mrb[10].mxu1 }
 0x1bd   : > { %v9659_v37 = vadd.f32 %v661_v47, %v9629_v32  ;;  %v663_v18 = vpop.f32.mrb[11].mxu1 }
 0x1be   : > { %v9662_v12 = vadd.f32 %v663_v18, %v9632_v33 }
 0x1bf   : > { %10860 = vst [vmem:[#allocation74_spill] sm:$0xff] %v9659_v37  ;;  %v749_v37 = vrot.slane %v9670_v19, %v417_v52 }
 0x1c0   : > { %10861 = vst [vmem:[#allocation75_spill] sm:$0xff] %v9662_v12  ;;  %v667_v27 = vpop.f32.mrb[12].mxu1  ;;  %v9680_v12 = vrot.slane %v9670_v19, %v421_v60 }
 0x1c1   : > { %v9665_v4 = vadd.f32 %v667_v27, %v9629_v32  ;;  %v669_v57 = vpop.f32.mrb[13].mxu1 }
 0x1c2   : > { %v9668_v2 = vadd.f32 %v669_v57, %v9632_v33 }
 0x1c3   : > { %10862 = vst [vmem:[#allocation76_spill] sm:$0xff] %v9665_v4 }
 0x1c4   : > { %10863 = vst [vmem:[#allocation77_spill] sm:$0xff] %v9668_v2  ;;  %v673_v7 = vpop.f32.mrb[14].mxu1 }
 0x1c5   : > { %v9673_v59 = vadd.f32 %v673_v7, %v9629_v32  ;;  %v675_v47 = vpop.f32.mrb[15].mxu1 }
 0x1c6   : > { %v9677_v18 = vadd.f32 %v675_v47, %v9632_v33 }
 0x1c7   : > { %10864 = vst [vmem:[#allocation78_spill] sm:$0xff] %v9673_v59 }
 0x1c8   : > { %10865 = vst [vmem:[#allocation79_spill] sm:$0xff] %v9677_v18  ;;  %v961_v27 = vpop.f32.mrb[16].mxu1 }
 0x1c9   : > { %v9682_v4 = vadd.f32 %v961_v27, %v749_v37  ;;  %v963_v57 = vpop.f32.mrb[17].mxu1 }
 0x1ca   : > { %v9685_v2 = vadd.f32 %v963_v57, %v9680_v12 }
 0x1cb   : > { %10866 = vst [vmem:[#allocation80_spill] sm:$0xff] %v9682_v4 }
 0x1cc   : > { %10867 = vst [vmem:[#allocation81_spill] sm:$0xff] %v9685_v2  ;;  %v967_v62 = vpop.f32.mrb[18].mxu1 }
 0x1cd   : > { %v9687_v17 = vadd.f32 %v967_v62, %v749_v37  ;;  %v969_v7 = vpop.f32.mrb[19].mxu1 }
 0x1ce   : > { %v9690_v59 = vadd.f32 %v969_v7, %v9680_v12 }
 0x1cf   : > { %10868 = vst [vmem:[#allocation82_spill] sm:$0xff] %v9687_v17 }
 0x1d0   : > { %10869 = vst [vmem:[#allocation83_spill] sm:$0xff] %v9690_v59  ;;  %v973_v52 = vpop.f32.mrb[20].mxu1 }
 0x1d1   : > { %v9692_v47 = vadd.f32 %v973_v52, %v749_v37  ;;  %v975_v18 = vpop.f32.mrb[21].mxu1 }
 0x1d2   : > { %v9695_v60 = vadd.f32 %v975_v18, %v9680_v12 }
 0x1d3   : > { %10870 = vst [vmem:[#allocation84_spill] sm:$0xff] %v9692_v47 }
 0x1d4   : > { %10871 = vst [vmem:[#allocation85_spill] sm:$0xff] %v9695_v60  ;;  %v979_v27 = vpop.f32.mrb[22].mxu1  ;;  %v409_v60 = vsub.s32 0, %v9618_v51 }
 0x1d5   : > { %v9697_v4 = vadd.f32 %v979_v27, %v749_v37  ;;  %v981_v58 = vpop.f32.mrb[23].mxu1 }
 0x1d6   : > { %v9700_v57 = vadd.f32 %v981_v58, %v9680_v12 }
 0x1d7   : > { %10872 = vst [vmem:[#allocation86_spill] sm:$0xff] %v9697_v4 }
 0x1d8   : > { %10873 = vst [vmem:[#allocation87_spill] sm:$0xff] %v9700_v57  ;;  %v985_v62 = vpop.f32.mrb[24].mxu1 }
 0x1d9   : > { %v9702_v2 = vadd.f32 %v985_v62, %v749_v37  ;;  %v987_v17 = vpop.f32.mrb[25].mxu1  ;;  %v413_v62 = vsub.s32 1, %v9618_v51 }
 0x1da   : > { %v9705_v7 = vadd.f32 %v987_v17, %v9680_v12 }
 0x1db   : > { %10874 = vst [vmem:[#allocation88_spill] sm:$0xff] %v9702_v2  ;;  %v9723_v2 = vrot.slane %v9621_v22, %v413_v62 }
 0x1dc   : > { %10875 = vst [vmem:[#allocation89_spill] sm:$0xff] %v9705_v7  ;;  %v991_v52 = vpop.f32.mrb[26].mxu1  ;;  %v9720_v7 = vrot.slane %v9621_v22, %v409_v60 }
 0x1dd   : > { %v9707_v59 = vadd.f32 %v991_v52, %v749_v37  ;;  %v993_v47 = vpop.f32.mrb[27].mxu1 }
 0x1de   : > { %v9710_v18 = vadd.f32 %v993_v47, %v9680_v12  ;;  %10880 = vst [vmem:[#allocation94_spill] sm:$0xff] %v9720_v7  ;;  %v632_v47 = vadd.f32 %v9623_v56, %v9629_v32  ;;  %v1170_v56 = vld [vmem:[#allocation5] sm:$0xff] }
 0x1df   : > { %10876 = vst [vmem:[#allocation90_spill] sm:$0xff] %v9707_v59 }
 0x1e0   : > { %10877 = vst [vmem:[#allocation91_spill] sm:$0xff] %v9710_v18  ;;  %v997_v27 = vpop.f32.mrb[28].mxu1 }
 0x1e1   : > { %v9713_v4 = vadd.f32 %v997_v27, %v749_v37  ;;  %v999_v58 = vpop.f32.mrb[29].mxu1 }
 0x1e2   : > { %v9717_v57 = vadd.f32 %v999_v58, %v9680_v12 }
 0x1e3   : > { %10878 = vst [vmem:[#allocation92_spill] sm:$0xff] %v9713_v4 }
 0x1e4   : > { %10879 = vst [vmem:[#allocation93_spill] sm:$0xff] %v9717_v57  ;;  %v1003_v17 = vpop.f32.mrb[30].mxu1 }
 0x1e5   : > { %v1005_v52 = vpop.f32.mrb[31].mxu1 }
 0x1e7   : > { %v1243_v18 = vpop.f32.mrb[0].mxu0 }
 0x1e8   : > { %v8246_v27 = vadd.f32 %v1243_v18, %v9720_v7  ;;  %v1314_v59 = vpop.f32.mrb[32].mxu1  ;;  %v1245_v4 = vpop.f32.mrb[1].mxu0 }
 0x1e9   : > { %v1320_v51 = vadd.f32 %v1314_v59, %v632_v47  ;;  %v8247_v58 = vadd.f32 %v1245_v4, %v9723_v2  ;;  %v5848_v57 = vpop.f32.mrb[33].mxu1  ;;  %v634_v59 = vadd.f32 %v9626_v15, %v9632_v33  ;;  %v1004_v4 = vadd.f32 %v1003_v17, %v749_v37 }
 0x1ea   : > { %v1392_v50 = vmul.f32 0.5, %v8246_v27  ;;  %v10881_v15 = vmov 0.0|0.0   ;;  %v9753_v33 = vrot.slane %v9670_v19, %v409_v60  ;;  %v9756_v37 = vrot.slane %v9670_v19, %v413_v62 }
 0x1eb   : > { %v1396_v6 = vmul.f32 0.5, %v8247_v58  ;;  %v1006_v17 = vadd.f32 %v1005_v52, %v9680_v12 }
 0x1ec   : > { %8433 = vtanh.f32 %v1392_v50 }
 0x1ed   : > { %8435 = vtanh.f32 %v1396_v6 }
 0x1ee   : > { %8437 = vtanh.f32 %v1320_v51 }
 0x1f6   : > { %v8434_v46 = vpop.eup %8433 }
 0x1f7   : > { %v8436_v22 = vpop.eup %8435  ;;  %v1394_v40 = vmul.f32 0.5, %v8434_v46 }
 0x1f8   : > { %v1398_v41 = vmul.f32 0.5, %v8436_v22  ;;  %v8438_v32 = vpop.eup %8437 }
 0x1f9   : > { %v1395_v36 = vadd.f32 0.5, %v1394_v40 }
 0x1fa   : > { %v1399_v30 = vadd.f32 0.5, %v1398_v41 }
 0x1fb   : > { %v1402_v18 = vmul.f32 %v8438_v32, %v1395_v36 }
 0x1fc   : > { %v1401_v7 = vmul.f32 %v1399_v30, %v1170_v56 }
 0x1fe   : > { %v9729_v63 = vadd.f32 %v1402_v18, %v1401_v7 }
 0x207   : > { %v1387_v50 = vpop.f32.mrb[32].mxu0 }
 0x208   : > { %v1391_v6 = vadd.f32 %v1387_v50, %v634_v59  ;;  %v1552_v57 = vpop.f32.mrb[34].mxu1  ;;  %v5883_v47 = vpop.f32.mrb[33].mxu0 }
 0x209   : > { %v1558_v27 = vadd.f32 %v1552_v57, %v1004_v4  ;;  %v5918_v46 = vpop.f32.mrb[35].mxu1 }
 0x20a   : > { %v1404_v51 = vmul.f32 0.5, %v1391_v6 }
 0x20c   : > { %8439 = vtanh.f32 %v1404_v51 }
 0x20d   : > { %8441 = vtanh.f32 %v9729_v63 }
 0x216   : > { %v8440_v40 = vpop.eup %8439 }
 0x217   : > { %v1406_v36 = vmul.f32 0.5, %v8440_v40  ;;  %v8442_v41 = vpop.eup %8441 }
 0x219   : > { %v1407_v30 = vadd.f32 0.5, %v1406_v36 }
 0x21b   : > { %v9734_v7 = vmul.f32 %v8442_v41, %v1407_v30  ;;  %v10882_v41 = vld [vmem:[#allocation54_spill] sm:$0xff] }
 0x21d   : > { %1410 = vst [vmem:[%s9251_s30] sm:$0xff] %v9734_v7  ;;  %1719 = vmatmul.mubr.f32.vlgmr.msra.gmra.mrb[2].mxu0 %v9734_v7  ;;  %5987 = vmatmul.mubr.f32.vlgmr.msra.gmra.mrb[38].mxu1 %v9734_v7 }
 0x21e   : > { %7184 = vmatpush3.bf16.msra.mxu0 %v9418_v28  ;;  %7240 = vmatpush3.bf16.msra.mxu1 %v9422_v29 }
 0x21f   : > { %7185 = vmatprep.subr.bf16.mxu0 %v10881_v15  ;;  %7241 = vmatprep.subr.bf16.mxu1 %v10881_v15 }
 0x220   : > { %6021 = vmatprep.mubr.msk.f32.mxu0 %vm8887_vm1, %v10851_v42  ;;  %6056 = vmatprep.mubr.msk.f32.mxu1 %vm8887_vm1, %v10851_v42 }
 0x222   : > { %7187 = vmatpush3.bf16.msra.mxu0 %v9431_v35  ;;  %7243 = vmatpush3.bf16.msra.mxu1 %v9435_v38 }
 0x223   : > { %7188 = vmatprep.subr.bf16.mxu0 %v10881_v15  ;;  %7244 = vmatprep.subr.bf16.mxu1 %v10881_v15 }
 0x226   : > { %7190 = vmatpush3.bf16.msra.mxu0 %v9443_v44  ;;  %7246 = vmatpush3.bf16.msra.mxu1 %v9447_v45 }
 0x227   : > { %v1481_v58 = vpop.f32.mrb[30].mxu0  ;;  %7191 = vmatprep.subr.bf16.mxu0 %v10881_v15  ;;  %7247 = vmatprep.subr.bf16.mxu1 %v10881_v15 }
 0x228   : > { %v8276_v22 = vadd.f32 %v1481_v58, %v9753_v33  ;;  %v1625_v56 = vpop.f32.mrb[36].mxu1  ;;  %v1483_v32 = vpop.f32.mrb[31].mxu0  ;;  %v10883_v58 = vld [vmem:[#allocation55_spill] sm:$0xff] }
 0x229   : > { %v1629_v60 = vadd.f32 %v1625_v56, %v1006_v17  ;;  %v8277_v18 = vadd.f32 %v1483_v32, %v9756_v37  ;;  %v5953_v19 = vpop.f32.mrb[37].mxu1  ;;  %v10885_v56 = vld [vmem:[#allocation58_spill] sm:$0xff] }
 0x22a   : > { %v1630_v62 = vmul.f32 0.5, %v8276_v22  ;;  %7193 = vmatpush3.bf16.msra.mxu0 %v9451_v54  ;;  %7249 = vmatpush3.bf16.msra.mxu1 %v9455_v55  ;;  %v10887_v19 = vld [vmem:[#allocation52_spill] sm:$0xff] }
 0x22b   : > { %v1634_v59 = vmul.f32 0.5, %v8277_v18  ;;  %7194 = vmatprep.subr.bf16.mxu0 %v10881_v15  ;;  %7250 = vmatprep.subr.bf16.mxu1 %v10881_v15  ;;  %v1642_v12 = vmul.f32 0.5, %v1629_v60  ;;  %v10886_v60 = vld [vmem:[#allocation60_spill] sm:$0xff] }
 0x22c   : > { %8443 = vtanh.f32 %v1630_v62  ;;  %v10888_v62 = vld [vmem:[#allocation62_spill] sm:$0xff] }
 0x22d   : > { %8445 = vtanh.f32 %v1634_v59  ;;  %v10889_v59 = vld [vmem:[#allocation53_spill] sm:$0xff] }
 0x22e   : > { %7196 = vmatpush3.bf16.msra.mxu0 %v9459_v0  ;;  %7252 = vmatpush3.bf16.msra.mxu1 %v9463_v1  ;;  %8447 = vtanh.f32 %v1558_v27  ;;  %v1172_v27 = vld [vmem:[#allocation7] sm:$0xff] }
 0x22f   : > { %7197 = vmatprep.subr.bf16.mxu0 %v10881_v15  ;;  %7253 = vmatprep.subr.bf16.mxu1 %v10881_v15  ;;  %8449 = vtanh.f32 %v1642_v12  ;;  %v10890_v12 = vld [vmem:[#allocation56_spill] sm:$0xff] }
 0x232   : > { %7199 = vmatpush3.bf16.msra.mxu0 %v9467_v13  ;;  %7255 = vmatpush3.bf16.msra.mxu1 %v9471_v14 }
 0x233   : > { %7200 = vmatprep.subr.bf16.mxu0 %v10881_v15  ;;  %7256 = vmatprep.subr.bf16.mxu1 %v10881_v15 }
 0x236   : > { %v8444_v52 = vpop.eup %8443  ;;  %7202 = vmatpush3.bf16.msra.mxu0 %v9475_v24  ;;  %7258 = vmatpush3.bf16.msra.mxu1 %v9479_v31 }
 0x237   : > { %v1632_v4 = vmul.f32 0.5, %v8444_v52  ;;  %7203 = vmatprep.subr.bf16.mxu0 %v10881_v15  ;;  %7259 = vmatprep.subr.bf16.mxu1 %v10881_v15  ;;  %v8446_v50 = vpop.eup %8445  ;;  %v10891_v52 = vld [vmem:[#allocation59_spill] sm:$0xff] }
 0x238   : > { %v1636_v57 = vmul.f32 0.5, %v8446_v50  ;;  %v8448_v47 = vpop.eup %8447  ;;  %v10893_v50 = vld [vmem:[#allocation64_spill] sm:$0xff] }
 0x239   : > { %v1633_v6 = vadd.f32 0.5, %v1632_v4  ;;  %v8450_v30 = vpop.eup %8449  ;;  %v10892_v4 = vld [vmem:[#allocation61_spill] sm:$0xff] }
 0x23a   : > { %7205 = vmatpush3.bf16.msra.mxu0 %v9483_v43  ;;  %7261 = vmatpush3.bf16.msra.mxu1 %v9487_v48  ;;  %v1637_v51 = vadd.f32 0.5, %v1636_v57  ;;  %v1644_v17 = vmul.f32 0.5, %v8450_v30  ;;  %v10895_v57 = vld [vmem:[#allocation38_spill] sm:$0xff]  ;;  %v10901_v30 = vld [vmem:[#allocation44_spill] sm:$0xff] }
 0x23b   : > { %v1640_v46 = vmul.f32 %v8448_v47, %v1633_v6  ;;  %7207 = vmatprep.subr.bf16.mxu0 %v9489_v49  ;;  %7262 = vmatprep.subr.bf16.mxu1 %v10881_v15  ;;  %v10894_v6 = vld [vmem:[#allocation37_spill] sm:$0xff] }
 0x23c   : > { %v1639_v40 = vmul.f32 %v1637_v51, %v1172_v27  ;;  %v1645_v22 = vadd.f32 0.5, %v1644_v17  ;;  %v10896_v47 = vld [vmem:[#allocation65_spill] sm:$0xff]  ;;  %v10897_v27 = vld [vmem:[#allocation40_spill] sm:$0xff]  ;;  %v10899_v51 = vld [vmem:[#allocation30_spill] sm:$0xff] }
 0x23d   : > { %6022 = vmatmul.mubr.f32.vlgmr.msra.gmra.mrb[34].mxu0 %v9734_v7  ;;  %v10884_v7 = vld [vmem:[#allocation57_spill] sm:$0xff] }
 0x23e   : > { %7209 = vmatpush1.bf16.msra.mxu0 %v9495_v3  ;;  %1957 = vmatprep.mubr.f32.mxu0 %v10851_v42  ;;  %v9788_v36 = vadd.f32 %v1640_v46, %v1639_v40  ;;  %v10898_v46 = vld [vmem:[#allocation41_spill] sm:$0xff]  ;;  %v10900_v40 = vld [vmem:[#allocation43_spill] sm:$0xff] }
 0x23f   : > { %7211 = vmatprep.subr.bf16.mxu0 %v9501_v11  ;;  %v10902_v17 = vld [vmem:[#allocation33_spill] sm:$0xff] }
 0x240   : > { %8451 = vtanh.f32 %v9788_v36 }
 0x242   : > { %7213 = vmatpush1.bf16.msra.mxu0 %v9507_v34 }
 0x243   : > { %7215 = vmatprep.subr.bf16.mxu0 %v10882_v41 }
 0x246   : > { %7217 = vmatpush1.bf16.msra.mxu0 %v10883_v58 }
 0x247   : > { %7219 = vmatprep.subr.bf16.mxu0 %v10884_v7 }
 0x24a   : > { %7221 = vmatpush1.bf16.msra.mxu0 %v10885_v56  ;;  %v8452_v32 = vpop.eup %8451 }
 0x24b   : > { %7223 = vmatprep.subr.bf16.mxu0 %v10886_v60  ;;  %v1647_v18 = vmul.f32 %v8452_v32, %v1645_v22  ;;  %v10903_v22 = vld [vmem:[#allocation46_spill] sm:$0xff]  ;;  %v10904_v32 = vld [vmem:[#allocation47_spill] sm:$0xff] }
 0x24d   : > { %5244 = vst [vmem:[%s9253_s9 + $0x38] sm:$0xff] %v1647_v18  ;;  %6057 = vmatmul.mubr.f32.vlgmr.msra.gmra.mrb[40].mxu1 %v1647_v18 }
 0x24e   : > { %7225 = vmatpush1.bf16.msra.mxu0 %v9540_v21  ;;  %7264 = vmatpush3.bf16.msra.mxu1 %v10887_v19 }
 0x24f   : > { %7227 = vmatprep.subr.bf16.mxu0 %v10888_v62  ;;  %7265 = vmatprep.subr.bf16.mxu1 %v10881_v15 }
 0x250   : > { %6091 = vmatprep.mubr.msk.f32.mxu1 %vm8887_vm1, %v10851_v42 }
 0x252   : > { %7229 = vmatpush1.bf16.msra.mxu0 %v9550_v25  ;;  %7267 = vmatpush3.bf16.msra.mxu1 %v10889_v59 }
 0x253   : > { %7231 = vmatprep.subr.bf16.mxu0 %v9556_v9  ;;  %7268 = vmatprep.subr.bf16.mxu1 %v10881_v15 }
 0x256   : > { %7233 = vmatpush1.bf16.msra.mxu0 %v9560_v23  ;;  %7270 = vmatpush3.bf16.msra.mxu1 %v10890_v12 }
 0x257   : > { %7235 = vmatprep.subr.bf16.mxu0 %v9566_v61  ;;  %7271 = vmatprep.subr.bf16.mxu1 %v10881_v15 }
 0x25a   : > { %7237 = vmatpush1.bf16.msra.mxu0 %v9570_v8  ;;  %7273 = vmatpush3.bf16.msra.mxu1 %v10891_v52 }
 0x25b   : > { %7287 = vmatprep.subr.bf16.mxu0 %v9265_v53  ;;  %7274 = vmatprep.subr.bf16.mxu1 %v10881_v15 }
 0x25d   : > { %1958 = vmatmul.mubr.f32.vlgmr.msra.gmra.mrb[28].mxu0 %v1647_v18 }
 0x25e   : > { %7289 = vmatpush1.bf16.msra.mxu0 %v9303_v5  ;;  %2196 = vmatprep.mubr.f32.mxu0 %v10851_v42 }
 0x25f   : > { %7276 = vmatpush3.bf16.msra.mxu1 %v10892_v4  ;;  %7291 = vmatprep.subr.bf16.mxu0 %v9308_v10 }
 0x260   : > { %7277 = vmatprep.subr.bf16.mxu1 %v10881_v15 }
 0x262   : > { %7293 = vmatpush1.bf16.msra.mxu0 %v9314_v16 }
 0x263   : > { %7279 = vmatpush3.bf16.msra.mxu1 %v9554_v39  ;;  %7295 = vmatprep.subr.bf16.mxu0 %v9322_v20 }
 0x264   : > { %7280 = vmatprep.subr.bf16.mxu1 %v10881_v15 }
 0x266   : > { %7297 = vmatpush1.bf16.msra.mxu0 %v9329_v26 }
 0x267   : > { %7282 = vmatpush3.bf16.msra.mxu1 %v10893_v50  ;;  %7299 = vmatprep.subr.bf16.mxu0 %v10894_v6 }
 0x268   : > { %7283 = vmatprep.subr.bf16.mxu1 %v10881_v15 }
 0x26a   : > { %7301 = vmatpush1.bf16.msra.mxu0 %v10895_v57 }
 0x26b   : > { %7285 = vmatpush3.bf16.msra.mxu1 %v10896_v47  ;;  %7303 = vmatprep.subr.bf16.mxu0 %v10897_v27  ;;  %v10914_v27 = vld [vmem:[#allocation66_spill] sm:$0xff] }
 0x26c   : > { %7318 = vmatprep.subr.bf16.mxu1 %v10881_v15 }
 0x26e   : > { %6092 = vmatmul.mubr.f32.vlgmr.msra.gmra.mrb[42].mxu1 %v1647_v18  ;;  %7305 = vmatpush1.bf16.msra.mxu0 %v10898_v46  ;;  %v10905_v18 = vld [vmem:[#allocation36_spill] sm:$0xff]  ;;  %v10908_v46 = vld [vmem:[#allocation39_spill] sm:$0xff] }
 0x26f   : > { %7320 = vmatpush3.bf16.msra.mxu1 %v10899_v51  ;;  %7307 = vmatprep.subr.bf16.mxu0 %v10900_v40  ;;  %v10906_v51 = vld [vmem:[#allocation49_spill] sm:$0xff]  ;;  %v10907_v40 = vld [vmem:[#allocation50_spill] sm:$0xff] }
 0x270   : > { %7321 = vmatprep.subr.bf16.mxu1 %v10881_v15  ;;  %6126 = vmatprep.mubr.msk.f32.mxu1 %vm8887_vm1, %v10851_v42 }
 0x272   : > { %7309 = vmatpush1.bf16.msra.mxu0 %v10901_v30 }
 0x273   : > { %7323 = vmatpush3.bf16.msra.mxu1 %v10902_v17  ;;  %7311 = vmatprep.subr.bf16.mxu0 %v10903_v22  ;;  %v10909_v17 = vld [vmem:[#allocation42_spill] sm:$0xff]  ;;  %v10910_v22 = vld [vmem:[#allocation45_spill] sm:$0xff] }
 0x274   : > { %7324 = vmatprep.subr.bf16.mxu1 %v10881_v15 }
 0x276   : > { %7313 = vmatpush1.bf16.msra.mxu0 %v10904_v32  ;;  %v10913_v32 = vld [vmem:[#allocation94_spill] sm:$0xff] }
 0x277   : > { %7326 = vmatpush3.bf16.msra.mxu1 %v10905_v18  ;;  %7315 = vmatprep.subr.bf16.mxu0 %v10906_v51  ;;  %v10911_v18 = vld [vmem:[#allocation48_spill] sm:$0xff]  ;;  %v10912_v51 = vld [vmem:[#allocation51_spill] sm:$0xff] }
 0x278   : > { %7327 = vmatprep.subr.bf16.mxu1 %v10881_v15 }
 0x27a   : > { %7317 = vmatpush1.bf16.msra.mxu0 %v10907_v40 }
 0x27b   : > { %7329 = vmatpush3.bf16.msra.mxu1 %v10908_v46  ;;  %7342 = vmatprep.subr.bf16.mxu0 %v10881_v15 }
 0x27c   : > { %7330 = vmatprep.subr.bf16.mxu1 %v10881_v15 }
 0x27f   : > { %7332 = vmatpush3.bf16.msra.mxu1 %v10909_v17 }
 0x280   : > { %7333 = vmatprep.subr.bf16.mxu1 %v10881_v15 }
 0x283   : > { %7335 = vmatpush3.bf16.msra.mxu1 %v10910_v22 }
 0x284   : > { %7336 = vmatprep.subr.bf16.mxu1 %v10881_v15 }
 0x287   : > { %7338 = vmatpush3.bf16.msra.mxu1 %v10911_v18 }
 0x288   : > { %7339 = vmatprep.subr.bf16.mxu1 %v10881_v15 }
 0x28b   : > { %7341 = vmatpush3.bf16.msra.mxu1 %v10912_v51 }
 0x28c   : > { %7398 = vmatprep.subr.bf16.mxu1 %v10881_v15 }
 0x2f0   : > { %v1720_v46 = vpop.f32.mrb[2].mxu0  ;;  %v1791_v40 = vpop.f32.mrb[38].mxu1 }
 0x2f1   : > { %v8248_v30 = vadd.f32 %v1720_v46, %v10913_v32  ;;  %v1797_v17 = vadd.f32 %v1791_v40, %v10914_v27  ;;  %v1722_v47 = vpop.f32.mrb[3].mxu0  ;;  %v5988_v57 = vpop.f32.mrb[39].mxu1 }
 0x2f2   : > { %v8249_v22 = vadd.f32 %v1722_v47, %v9723_v2  ;;  %v10915_v47 = vld [vmem:[#allocation67_spill] sm:$0xff] }
 0x2f3   : > { %v1869_v6 = vmul.f32 0.5, %v8248_v30 }
 0x2f4   : > { %v1873_v50 = vmul.f32 0.5, %v8249_v22  ;;  %v10916_v22 = vld [vmem:[#allocation92_spill] sm:$0xff] }
 0x2f5   : > { %8453 = vtanh.f32 %v1869_v6 }
 0x2f6   : > { %8455 = vtanh.f32 %v1873_v50 }
 0x2f7   : > { %8457 = vtanh.f32 %v1797_v17 }
 0x2ff   : > { %v8454_v18 = vpop.eup %8453 }
 0x300   : > { %v8456_v26 = vpop.eup %8455  ;;  %v1871_v51 = vmul.f32 0.5, %v8454_v18 }
 0x301   : > { %v1875_v20 = vmul.f32 0.5, %v8456_v26  ;;  %v8458_v16 = vpop.eup %8457 }
 0x302   : > { %v1872_v39 = vadd.f32 0.5, %v1871_v51 }
 0x303   : > { %v1876_v10 = vadd.f32 0.5, %v1875_v20 }
 0x304   : > { %v1879_v4 = vmul.f32 %v8458_v16, %v1872_v39 }
 0x305   : > { %v1878_v46 = vmul.f32 %v1876_v10, %v9729_v63 }
 0x307   : > { %v9864_v27 = vadd.f32 %v1879_v4, %v1878_v46 }
 0x310   : > { %v1864_v57 = vpop.f32.mrb[34].mxu0 }
 0x311   : > { %v1868_v40 = vadd.f32 %v1864_v57, %v10915_v47  ;;  %v6023_v30 = vpop.f32.mrb[35].mxu0 }
 0x313   : > { %v1881_v6 = vmul.f32 0.5, %v1868_v40 }
 0x315   : > { %8459 = vtanh.f32 %v1881_v6 }
 0x316   : > { %8461 = vtanh.f32 %v9864_v27 }
 0x31f   : > { %v8460_v50 = vpop.eup %8459 }
 0x320   : > { %v1883_v17 = vmul.f32 0.5, %v8460_v50  ;;  %v2030_v26 = vpop.f32.mrb[40].mxu1  ;;  %v8462_v39 = vpop.eup %8461 }
 0x321   : > { %v2036_v20 = vadd.f32 %v2030_v26, %v10916_v22  ;;  %v6058_v16 = vpop.f32.mrb[41].mxu1 }
 0x322   : > { %v1884_v51 = vadd.f32 0.5, %v1883_v17 }
 0x324   : > { %v1886_v10 = vmul.f32 %v8462_v39, %v1884_v51  ;;  %v10917_v51 = vld [vmem:[#allocation93_spill] sm:$0xff] }
 0x326   : > { %5245 = vst [vmem:[%s9251_s30 + $0x8] sm:$0xff] %v1886_v10  ;;  %2197 = vmatmul.mubr.f32.vlgmr.msra.gmra.mrb[4].mxu0 %v1886_v10  ;;  %6127 = vmatmul.mubr.f32.vlgmr.msra.gmra.mrb[44].mxu1 %v1886_v10 }
 0x327   : > { %7344 = vmatpush3.bf16.msra.mxu0 %v9418_v28  ;;  %7400 = vmatpush3.bf16.msra.mxu1 %v9422_v29 }
 0x328   : > { %7345 = vmatprep.subr.bf16.mxu0 %v10881_v15  ;;  %7401 = vmatprep.subr.bf16.mxu1 %v10881_v15 }
 0x329   : > { %6161 = vmatprep.mubr.msk.f32.mxu0 %vm8887_vm1, %v10851_v42  ;;  %6196 = vmatprep.mubr.msk.f32.mxu1 %vm8887_vm1, %v10851_v42 }
 0x32b   : > { %7347 = vmatpush3.bf16.msra.mxu0 %v9431_v35  ;;  %7403 = vmatpush3.bf16.msra.mxu1 %v9435_v38 }
 0x32c   : > { %7348 = vmatprep.subr.bf16.mxu0 %v10881_v15  ;;  %7404 = vmatprep.subr.bf16.mxu1 %v10881_v15 }
 0x32f   : > { %7350 = vmatpush3.bf16.msra.mxu0 %v9443_v44  ;;  %7406 = vmatpush3.bf16.msra.mxu1 %v9447_v45 }
 0x330   : > { %v1959_v63 = vpop.f32.mrb[28].mxu0  ;;  %7351 = vmatprep.subr.bf16.mxu0 %v10881_v15  ;;  %7407 = vmatprep.subr.bf16.mxu1 %v10881_v15 }
 0x331   : > { %v8274_v4 = vadd.f32 %v1959_v63, %v9753_v33  ;;  %v1961_v18 = vpop.f32.mrb[29].mxu0 }
 0x332   : > { %v8275_v46 = vadd.f32 %v1961_v18, %v9756_v37 }
 0x333   : > { %v2108_v57 = vmul.f32 0.5, %v8274_v4  ;;  %7353 = vmatpush3.bf16.msra.mxu0 %v9451_v54  ;;  %7409 = vmatpush3.bf16.msra.mxu1 %v9455_v55 }
 0x334   : > { %v2112_v47 = vmul.f32 0.5, %v8275_v46  ;;  %7354 = vmatprep.subr.bf16.mxu0 %v10881_v15  ;;  %7410 = vmatprep.subr.bf16.mxu1 %v10881_v15 }
 0x335   : > { %8463 = vtanh.f32 %v2108_v57 }
 0x336   : > { %8465 = vtanh.f32 %v2112_v47 }
 0x337   : > { %7356 = vmatpush3.bf16.msra.mxu0 %v9459_v0  ;;  %7412 = vmatpush3.bf16.msra.mxu1 %v9463_v1  ;;  %8467 = vtanh.f32 %v2036_v20 }
 0x338   : > { %7357 = vmatprep.subr.bf16.mxu0 %v10881_v15  ;;  %7413 = vmatprep.subr.bf16.mxu1 %v10881_v15 }
 0x33b   : > { %7359 = vmatpush3.bf16.msra.mxu0 %v9467_v13  ;;  %7415 = vmatpush3.bf16.msra.mxu1 %v9471_v14 }
 0x33c   : > { %7360 = vmatprep.subr.bf16.mxu0 %v10881_v15  ;;  %7416 = vmatprep.subr.bf16.mxu1 %v10881_v15 }
 0x33f   : > { %v8464_v40 = vpop.eup %8463  ;;  %7362 = vmatpush3.bf16.msra.mxu0 %v9475_v24  ;;  %7418 = vmatpush3.bf16.msra.mxu1 %v9479_v31 }
 0x340   : > { %v8466_v30 = vpop.eup %8465  ;;  %v2110_v6 = vmul.f32 0.5, %v8464_v40  ;;  %7363 = vmatprep.subr.bf16.mxu0 %v10881_v15  ;;  %7419 = vmatprep.subr.bf16.mxu1 %v10881_v15 }
 0x341   : > { %v2114_v50 = vmul.f32 0.5, %v8466_v30  ;;  %v2103_v17 = vpop.f32.mrb[42].mxu1  ;;  %v8468_v16 = vpop.eup %8467  ;;  %v10918_v30 = vld [vmem:[#allocation61_spill] sm:$0xff] }
 0x342   : > { %v2111_v26 = vadd.f32 0.5, %v2110_v6  ;;  %v2107_v22 = vadd.f32 %v2103_v17, %v10917_v51  ;;  %v6093_v20 = vpop.f32.mrb[43].mxu1  ;;  %v10919_v6 = vld [vmem:[#allocation31_spill] sm:$0xff] }
 0x343   : > { %v2115_v39 = vadd.f32 0.5, %v2114_v50  ;;  %7365 = vmatpush3.bf16.msra.mxu0 %v9483_v43  ;;  %7421 = vmatpush3.bf16.msra.mxu1 %v9487_v48  ;;  %v10920_v50 = vld [vmem:[#allocation32_spill] sm:$0xff]  ;;  %v10921_v17 = vld [vmem:[#allocation63_spill] sm:$0xff]  ;;  %v10925_v20 = vld [vmem:[#allocation37_spill] sm:$0xff] }
 0x344   : > { %v2118_v63 = vmul.f32 %v8468_v16, %v2111_v26  ;;  %v2120_v4 = vmul.f32 0.5, %v2107_v22  ;;  %7367 = vmatprep.subr.bf16.mxu0 %v9489_v49  ;;  %7422 = vmatprep.subr.bf16.mxu1 %v10881_v15  ;;  %v10922_v26 = vld [vmem:[#allocation34_spill] sm:$0xff]  ;;  %v10923_v51 = vld [vmem:[#allocation35_spill] sm:$0xff]  ;;  %v10924_v22 = vld [vmem:[#allocation64_spill] sm:$0xff] }
 0x345   : > { %v2117_v18 = vmul.f32 %v2115_v39, %v9788_v36  ;;  %v10926_v16 = vld [vmem:[#allocation38_spill] sm:$0xff]  ;;  %v10927_v39 = vld [vmem:[#allocation65_spill] sm:$0xff] }
 0x346   : > { %8469 = vtanh.f32 %v2120_v4  ;;  %6162 = vmatmul.mubr.f32.vlgmr.msra.gmra.mrb[36].mxu0 %v1886_v10  ;;  %v10929_v4 = vld [vmem:[#allocation41_spill] sm:$0xff] }
 0x347   : > { %v9910_v46 = vadd.f32 %v2118_v63, %v2117_v18  ;;  %7369 = vmatpush1.bf16.msra.mxu0 %v9495_v3  ;;  %2435 = vmatprep.mubr.f32.mxu0 %v10851_v42  ;;  %v10928_v63 = vld [vmem:[#allocation40_spill] sm:$0xff]  ;;  %v10930_v18 = vld [vmem:[#allocation30_spill] sm:$0xff] }
 0x348   : > { %7371 = vmatprep.subr.bf16.mxu0 %v9501_v11 }
 0x349   : > { %8471 = vtanh.f32 %v9910_v46 }
 0x34b   : > { %7373 = vmatpush1.bf16.msra.mxu0 %v9507_v34 }
 0x34c   : > { %7375 = vmatprep.subr.bf16.mxu0 %v10882_v41 }
 0x34f   : > { %7377 = vmatpush1.bf16.msra.mxu0 %v10883_v58 }
 0x350   : > { %v8470_v36 = vpop.eup %8469  ;;  %7379 = vmatprep.subr.bf16.mxu0 %v10884_v7 }
 0x351   : > { %v2122_v10 = vmul.f32 0.5, %v8470_v36  ;;  %v10931_v36 = vld [vmem:[#allocation43_spill] sm:$0xff] }
 0x353   : > { %v8472_v57 = vpop.eup %8471  ;;  %v2123_v47 = vadd.f32 0.5, %v2122_v10  ;;  %7381 = vmatpush1.bf16.msra.mxu0 %v10885_v56  ;;  %v10932_v10 = vld [vmem:[#allocation44_spill] sm:$0xff] }
 0x354   : > { %7383 = vmatprep.subr.bf16.mxu0 %v10886_v60 }
 0x355   : > { %v2125_v40 = vmul.f32 %v8472_v57, %v2123_v47  ;;  %v10933_v57 = vld [vmem:[#allocation33_spill] sm:$0xff]  ;;  %v10934_v47 = vld [vmem:[#allocation46_spill] sm:$0xff] }
 0x357   : > { %5246 = vst [vmem:[%s9253_s9 + $0x30] sm:$0xff] %v2125_v40  ;;  %7385 = vmatpush1.bf16.msra.mxu0 %v9540_v21  ;;  %6197 = vmatmul.mubr.f32.vlgmr.msra.gmra.mrb[46].mxu1 %v2125_v40 }
 0x358   : > { %7424 = vmatpush3.bf16.msra.mxu1 %v10887_v19  ;;  %7387 = vmatprep.subr.bf16.mxu0 %v10888_v62 }
 0x359   : > { %7425 = vmatprep.subr.bf16.mxu1 %v10881_v15  ;;  %6231 = vmatprep.mubr.msk.f32.mxu1 %vm8887_vm1, %v10851_v42 }
 0x35b   : > { %7389 = vmatpush1.bf16.msra.mxu0 %v9550_v25 }
 0x35c   : > { %7427 = vmatpush3.bf16.msra.mxu1 %v10889_v59  ;;  %7391 = vmatprep.subr.bf16.mxu0 %v9556_v9 }
 0x35d   : > { %7428 = vmatprep.subr.bf16.mxu1 %v10881_v15 }
 0x35f   : > { %7393 = vmatpush1.bf16.msra.mxu0 %v9560_v23 }
 0x360   : > { %7430 = vmatpush3.bf16.msra.mxu1 %v10890_v12  ;;  %7395 = vmatprep.subr.bf16.mxu0 %v9566_v61 }
 0x361   : > { %7431 = vmatprep.subr.bf16.mxu1 %v10881_v15 }
 0x363   : > { %7397 = vmatpush1.bf16.msra.mxu0 %v9570_v8 }
 0x364   : > { %7433 = vmatpush3.bf16.msra.mxu1 %v10891_v52  ;;  %7447 = vmatprep.subr.bf16.mxu0 %v9265_v53 }
 0x365   : > { %7434 = vmatprep.subr.bf16.mxu1 %v10881_v15 }
 0x366   : > { %2436 = vmatmul.mubr.f32.vlgmr.msra.gmra.mrb[26].mxu0 %v2125_v40 }
 0x367   : > { %7449 = vmatpush1.bf16.msra.mxu0 %v9303_v5  ;;  %2674 = vmatprep.mubr.f32.mxu0 %v10851_v42 }
 0x368   : > { %7436 = vmatpush3.bf16.msra.mxu1 %v10918_v30  ;;  %7451 = vmatprep.subr.bf16.mxu0 %v10919_v6 }
 0x369   : > { %7437 = vmatprep.subr.bf16.mxu1 %v10881_v15 }
 0x36b   : > { %7453 = vmatpush1.bf16.msra.mxu0 %v10920_v50 }
 0x36c   : > { %7439 = vmatpush3.bf16.msra.mxu1 %v10921_v17  ;;  %7455 = vmatprep.subr.bf16.mxu0 %v10922_v26 }
 0x36d   : > { %7440 = vmatprep.subr.bf16.mxu1 %v10881_v15 }
 0x36f   : > { %7457 = vmatpush1.bf16.msra.mxu0 %v10923_v51 }
 0x370   : > { %7442 = vmatpush3.bf16.msra.mxu1 %v10924_v22  ;;  %7459 = vmatprep.subr.bf16.mxu0 %v10925_v20 }
 0x371   : > { %7443 = vmatprep.subr.bf16.mxu1 %v10881_v15 }
 0x373   : > { %7461 = vmatpush1.bf16.msra.mxu0 %v10926_v16 }
 0x374   : > { %7445 = vmatpush3.bf16.msra.mxu1 %v10927_v39  ;;  %7463 = vmatprep.subr.bf16.mxu0 %v10928_v63  ;;  %v10939_v63 = vld [vmem:[#allocation39_spill] sm:$0xff] }
 0x375   : > { %7478 = vmatprep.subr.bf16.mxu1 %v10881_v15 }
 0x377   : > { %6232 = vmatmul.mubr.f32.vlgmr.msra.gmra.mrb[48].mxu1 %v2125_v40  ;;  %7465 = vmatpush1.bf16.msra.mxu0 %v10929_v4  ;;  %v10935_v40 = vld [vmem:[#allocation47_spill] sm:$0xff]  ;;  %v10936_v4 = vld [vmem:[#allocation36_spill] sm:$0xff] }
 0x378   : > { %7480 = vmatpush3.bf16.msra.mxu1 %v10930_v18  ;;  %7467 = vmatprep.subr.bf16.mxu0 %v10931_v36  ;;  %v10937_v18 = vld [vmem:[#allocation49_spill] sm:$0xff]  ;;  %v10938_v36 = vld [vmem:[#allocation50_spill] sm:$0xff] }
 0x379   : > { %7481 = vmatprep.subr.bf16.mxu1 %v10881_v15  ;;  %6266 = vmatprep.mubr.msk.f32.mxu1 %vm8887_vm1, %v10851_v42 }
 0x37b   : > { %7469 = vmatpush1.bf16.msra.mxu0 %v10932_v10  ;;  %v10944_v10 = vld [vmem:[#allocation68_spill] sm:$0xff] }
 0x37c   : > { %7483 = vmatpush3.bf16.msra.mxu1 %v10933_v57  ;;  %7471 = vmatprep.subr.bf16.mxu0 %v10934_v47  ;;  %v10940_v57 = vld [vmem:[#allocation42_spill] sm:$0xff]  ;;  %v10941_v47 = vld [vmem:[#allocation45_spill] sm:$0xff] }
 0x37d   : > { %7484 = vmatprep.subr.bf16.mxu1 %v10881_v15 }
 0x37f   : > { %7473 = vmatpush1.bf16.msra.mxu0 %v10935_v40 }
 0x380   : > { %7486 = vmatpush3.bf16.msra.mxu1 %v10936_v4  ;;  %7475 = vmatprep.subr.bf16.mxu0 %v10937_v18  ;;  %v10942_v4 = vld [vmem:[#allocation48_spill] sm:$0xff]  ;;  %v10943_v18 = vld [vmem:[#allocation51_spill] sm:$0xff] }
 0x381   : > { %7487 = vmatprep.subr.bf16.mxu1 %v10881_v15 }
 0x383   : > { %7477 = vmatpush1.bf16.msra.mxu0 %v10938_v36 }
 0x384   : > { %7489 = vmatpush3.bf16.msra.mxu1 %v10939_v63  ;;  %7502 = vmatprep.subr.bf16.mxu0 %v10881_v15 }
 0x385   : > { %7490 = vmatprep.subr.bf16.mxu1 %v10881_v15 }
 0x388   : > { %7492 = vmatpush3.bf16.msra.mxu1 %v10940_v57 }
 0x389   : > { %7493 = vmatprep.subr.bf16.mxu1 %v10881_v15 }
 0x38c   : > { %7495 = vmatpush3.bf16.msra.mxu1 %v10941_v47 }
 0x38d   : > { %7496 = vmatprep.subr.bf16.mxu1 %v10881_v15 }
 0x390   : > { %7498 = vmatpush3.bf16.msra.mxu1 %v10942_v4 }
 0x391   : > { %7499 = vmatprep.subr.bf16.mxu1 %v10881_v15 }
 0x394   : > { %7501 = vmatpush3.bf16.msra.mxu1 %v10943_v18 }
 0x395   : > { %7558 = vmatprep.subr.bf16.mxu1 %v10881_v15 }
 0x3f9   : > { %v2198_v63 = vpop.f32.mrb[4].mxu0  ;;  %v2269_v36 = vpop.f32.mrb[44].mxu1 }
 0x3fa   : > { %v8250_v40 = vadd.f32 %v2198_v63, %v10913_v32  ;;  %v2275_v57 = vadd.f32 %v2269_v36, %v10944_v10  ;;  %v2200_v39 = vpop.f32.mrb[5].mxu0  ;;  %v6128_v16 = vpop.f32.mrb[45].mxu1 }
 0x3fb   : > { %v8251_v47 = vadd.f32 %v2200_v39, %v9723_v2  ;;  %v10945_v39 = vld [vmem:[#allocation69_spill] sm:$0xff] }
 0x3fc   : > { %v2347_v20 = vmul.f32 0.5, %v8250_v40 }
 0x3fd   : > { %v2351_v22 = vmul.f32 0.5, %v8251_v47 }
 0x3fe   : > { %8473 = vtanh.f32 %v2347_v20 }
 0x3ff   : > { %8475 = vtanh.f32 %v2351_v22 }
 0x400   : > { %8477 = vtanh.f32 %v2275_v57  ;;  %v10946_v57 = vld [vmem:[#allocation90_spill] sm:$0xff] }
 0x408   : > { %v8474_v4 = vpop.eup %8473 }
 0x409   : > { %v8476_v51 = vpop.eup %8475  ;;  %v2349_v18 = vmul.f32 0.5, %v8474_v4 }
 0x40a   : > { %v2353_v26 = vmul.f32 0.5, %v8476_v51  ;;  %v8478_v50 = vpop.eup %8477 }
 0x40b   : > { %v2350_v17 = vadd.f32 0.5, %v2349_v18 }
 0x40c   : > { %v2354_v6 = vadd.f32 0.5, %v2353_v26 }
 0x40d   : > { %v2357_v30 = vmul.f32 %v8478_v50, %v2350_v17 }
 0x40e   : > { %v2356_v63 = vmul.f32 %v2354_v6, %v9864_v27 }
 0x410   : > { %v9988_v36 = vadd.f32 %v2357_v30, %v2356_v63 }
 0x419   : > { %v2342_v16 = vpop.f32.mrb[36].mxu0 }
 0x41a   : > { %v2346_v10 = vadd.f32 %v2342_v16, %v10945_v39  ;;  %v6163_v47 = vpop.f32.mrb[37].mxu0 }
 0x41c   : > { %v2359_v20 = vmul.f32 0.5, %v2346_v10 }
 0x41e   : > { %8479 = vtanh.f32 %v2359_v20 }
 0x41f   : > { %8481 = vtanh.f32 %v9988_v36 }
 0x428   : > { %v8480_v22 = vpop.eup %8479 }
 0x429   : > { %v2361_v4 = vmul.f32 0.5, %v8480_v22  ;;  %v8482_v17 = vpop.eup %8481 }
 0x42a   : > { %v2508_v51 = vpop.f32.mrb[46].mxu1 }
 0x42b   : > { %v2362_v18 = vadd.f32 0.5, %v2361_v4  ;;  %v2514_v26 = vadd.f32 %v2508_v51, %v10946_v57  ;;  %v6198_v50 = vpop.f32.mrb[47].mxu1 }
 0x42d   : > { %v2364_v27 = vmul.f32 %v8482_v17, %v2362_v18  ;;  %v10947_v18 = vld [vmem:[#allocation91_spill] sm:$0xff] }
 0x42f   : > { %5247 = vst [vmem:[%s9251_s30 + $0x10] sm:$0xff] %v2364_v27  ;;  %2675 = vmatmul.mubr.f32.vlgmr.msra.gmra.mrb[6].mxu0 %v2364_v27  ;;  %6267 = vmatmul.mubr.f32.vlgmr.msra.gmra.mrb[50].mxu1 %v2364_v27 }
 0x430   : > { %7504 = vmatpush3.bf16.msra.mxu0 %v9418_v28  ;;  %7560 = vmatpush3.bf16.msra.mxu1 %v9422_v29 }
 0x431   : > { %7505 = vmatprep.subr.bf16.mxu0 %v10881_v15  ;;  %7561 = vmatprep.subr.bf16.mxu1 %v10881_v15 }
 0x432   : > { %6301 = vmatprep.mubr.msk.f32.mxu0 %vm8887_vm1, %v10851_v42  ;;  %6336 = vmatprep.mubr.msk.f32.mxu1 %vm8887_vm1, %v10851_v42 }
 0x434   : > { %7507 = vmatpush3.bf16.msra.mxu0 %v9431_v35  ;;  %7563 = vmatpush3.bf16.msra.mxu1 %v9435_v38 }
 0x435   : > { %7508 = vmatprep.subr.bf16.mxu0 %v10881_v15  ;;  %7564 = vmatprep.subr.bf16.mxu1 %v10881_v15 }
 0x438   : > { %7510 = vmatpush3.bf16.msra.mxu0 %v9443_v44  ;;  %7566 = vmatpush3.bf16.msra.mxu1 %v9447_v45 }
 0x439   : > { %v2437_v30 = vpop.f32.mrb[26].mxu0  ;;  %7511 = vmatprep.subr.bf16.mxu0 %v10881_v15  ;;  %7567 = vmatprep.subr.bf16.mxu1 %v10881_v15 }
 0x43a   : > { %v8272_v6 = vadd.f32 %v2437_v30, %v9753_v33  ;;  %v2439_v40 = vpop.f32.mrb[27].mxu0 }
 0x43b   : > { %v8273_v63 = vadd.f32 %v2439_v40, %v9756_v37 }
 0x43c   : > { %v2586_v16 = vmul.f32 0.5, %v8272_v6  ;;  %7513 = vmatpush3.bf16.msra.mxu0 %v9451_v54  ;;  %7569 = vmatpush3.bf16.msra.mxu1 %v9455_v55 }
 0x43d   : > { %v2590_v39 = vmul.f32 0.5, %v8273_v63  ;;  %7514 = vmatprep.subr.bf16.mxu0 %v10881_v15  ;;  %7570 = vmatprep.subr.bf16.mxu1 %v10881_v15 }
 0x43e   : > { %8483 = vtanh.f32 %v2586_v16 }
 0x43f   : > { %8485 = vtanh.f32 %v2590_v39 }
 0x440   : > { %7516 = vmatpush3.bf16.msra.mxu0 %v9459_v0  ;;  %7572 = vmatpush3.bf16.msra.mxu1 %v9463_v1  ;;  %8487 = vtanh.f32 %v2514_v26 }
 0x441   : > { %7517 = vmatprep.subr.bf16.mxu0 %v10881_v15  ;;  %7573 = vmatprep.subr.bf16.mxu1 %v10881_v15 }
 0x444   : > { %7519 = vmatpush3.bf16.msra.mxu0 %v9467_v13  ;;  %7575 = vmatpush3.bf16.msra.mxu1 %v9471_v14 }
 0x445   : > { %7520 = vmatprep.subr.bf16.mxu0 %v10881_v15  ;;  %7576 = vmatprep.subr.bf16.mxu1 %v10881_v15 }
 0x448   : > { %v8484_v10 = vpop.eup %8483  ;;  %7522 = vmatpush3.bf16.msra.mxu0 %v9475_v24  ;;  %7578 = vmatpush3.bf16.msra.mxu1 %v9479_v31 }
 0x449   : > { %v8486_v47 = vpop.eup %8485  ;;  %v2588_v20 = vmul.f32 0.5, %v8484_v10  ;;  %7523 = vmatprep.subr.bf16.mxu0 %v10881_v15  ;;  %7579 = vmatprep.subr.bf16.mxu1 %v10881_v15 }
 0x44a   : > { %v2592_v22 = vmul.f32 0.5, %v8486_v47  ;;  %v2581_v4 = vpop.f32.mrb[48].mxu1  ;;  %v8488_v50 = vpop.eup %8487  ;;  %v10948_v47 = vld [vmem:[#allocation61_spill] sm:$0xff] }
 0x44b   : > { %v2589_v51 = vadd.f32 0.5, %v2588_v20  ;;  %v2585_v57 = vadd.f32 %v2581_v4, %v10947_v18  ;;  %v6233_v26 = vpop.f32.mrb[49].mxu1  ;;  %v10949_v20 = vld [vmem:[#allocation31_spill] sm:$0xff] }
 0x44c   : > { %v2593_v17 = vadd.f32 0.5, %v2592_v22  ;;  %7525 = vmatpush3.bf16.msra.mxu0 %v9483_v43  ;;  %7581 = vmatpush3.bf16.msra.mxu1 %v9487_v48  ;;  %v10950_v22 = vld [vmem:[#allocation32_spill] sm:$0xff]  ;;  %v10951_v4 = vld [vmem:[#allocation63_spill] sm:$0xff]  ;;  %v10955_v26 = vld [vmem:[#allocation37_spill] sm:$0xff] }
 0x44d   : > { %v2596_v30 = vmul.f32 %v8488_v50, %v2589_v51  ;;  %v2598_v6 = vmul.f32 0.5, %v2585_v57  ;;  %7527 = vmatprep.subr.bf16.mxu0 %v9489_v49  ;;  %7582 = vmatprep.subr.bf16.mxu1 %v10881_v15  ;;  %v10952_v51 = vld [vmem:[#allocation34_spill] sm:$0xff]  ;;  %v10953_v18 = vld [vmem:[#allocation35_spill] sm:$0xff]  ;;  %v10954_v57 = vld [vmem:[#allocation64_spill] sm:$0xff] }
 0x44e   : > { %v2595_v40 = vmul.f32 %v2593_v17, %v9910_v46  ;;  %v10956_v50 = vld [vmem:[#allocation38_spill] sm:$0xff]  ;;  %v10957_v17 = vld [vmem:[#allocation65_spill] sm:$0xff] }
 0x44f   : > { %8489 = vtanh.f32 %v2598_v6  ;;  %6302 = vmatmul.mubr.f32.vlgmr.msra.gmra.mrb[38].mxu0 %v2364_v27  ;;  %v10959_v6 = vld [vmem:[#allocation41_spill] sm:$0xff] }
 0x450   : > { %v10034_v63 = vadd.f32 %v2596_v30, %v2595_v40  ;;  %7529 = vmatpush1.bf16.msra.mxu0 %v9495_v3  ;;  %2913 = vmatprep.mubr.f32.mxu0 %v10851_v42  ;;  %v10958_v30 = vld [vmem:[#allocation40_spill] sm:$0xff]  ;;  %v10960_v40 = vld [vmem:[#allocation30_spill] sm:$0xff] }
 0x451   : > { %7531 = vmatprep.subr.bf16.mxu0 %v9501_v11 }
 0x452   : > { %8491 = vtanh.f32 %v10034_v63 }
 0x454   : > { %7533 = vmatpush1.bf16.msra.mxu0 %v9507_v34 }
 0x455   : > { %7535 = vmatprep.subr.bf16.mxu0 %v10882_v41 }
 0x458   : > { %7537 = vmatpush1.bf16.msra.mxu0 %v10883_v58 }
 0x459   : > { %v8490_v46 = vpop.eup %8489  ;;  %7539 = vmatprep.subr.bf16.mxu0 %v10884_v7 }
 0x45a   : > { %v2600_v27 = vmul.f32 0.5, %v8490_v46  ;;  %v10961_v46 = vld [vmem:[#allocation43_spill] sm:$0xff] }
 0x45c   : > { %v8492_v16 = vpop.eup %8491  ;;  %v2601_v39 = vadd.f32 0.5, %v2600_v27  ;;  %7541 = vmatpush1.bf16.msra.mxu0 %v10885_v56  ;;  %v10962_v27 = vld [vmem:[#allocation44_spill] sm:$0xff] }
 0x45d   : > { %7543 = vmatprep.subr.bf16.mxu0 %v10886_v60 }
 0x45e   : > { %v2603_v10 = vmul.f32 %v8492_v16, %v2601_v39  ;;  %v10963_v16 = vld [vmem:[#allocation33_spill] sm:$0xff]  ;;  %v10964_v39 = vld [vmem:[#allocation46_spill] sm:$0xff] }
 0x460   : > { %5248 = vst [vmem:[%s9253_s9 + $0x28] sm:$0xff] %v2603_v10  ;;  %7545 = vmatpush1.bf16.msra.mxu0 %v9540_v21  ;;  %6337 = vmatmul.mubr.f32.vlgmr.msra.gmra.mrb[52].mxu1 %v2603_v10 }
 0x461   : > { %7584 = vmatpush3.bf16.msra.mxu1 %v10887_v19  ;;  %7547 = vmatprep.subr.bf16.mxu0 %v10888_v62 }
 0x462   : > { %7585 = vmatprep.subr.bf16.mxu1 %v10881_v15  ;;  %6371 = vmatprep.mubr.msk.f32.mxu1 %vm8887_vm1, %v10851_v42 }
 0x464   : > { %7549 = vmatpush1.bf16.msra.mxu0 %v9550_v25 }
 0x465   : > { %7587 = vmatpush3.bf16.msra.mxu1 %v10889_v59  ;;  %7551 = vmatprep.subr.bf16.mxu0 %v9556_v9 }
 0x466   : > { %7588 = vmatprep.subr.bf16.mxu1 %v10881_v15 }
 0x468   : > { %7553 = vmatpush1.bf16.msra.mxu0 %v9560_v23 }
 0x469   : > { %7590 = vmatpush3.bf16.msra.mxu1 %v10890_v12  ;;  %7555 = vmatprep.subr.bf16.mxu0 %v9566_v61 }
 0x46a   : > { %7591 = vmatprep.subr.bf16.mxu1 %v10881_v15 }
 0x46c   : > { %7557 = vmatpush1.bf16.msra.mxu0 %v9570_v8 }
 0x46d   : > { %7593 = vmatpush3.bf16.msra.mxu1 %v10891_v52  ;;  %7607 = vmatprep.subr.bf16.mxu0 %v9265_v53 }
 0x46e   : > { %7594 = vmatprep.subr.bf16.mxu1 %v10881_v15 }
 0x46f   : > { %2914 = vmatmul.mubr.f32.vlgmr.msra.gmra.mrb[24].mxu0 %v2603_v10 }
 0x470   : > { %7609 = vmatpush1.bf16.msra.mxu0 %v9303_v5  ;;  %3152 = vmatprep.mubr.f32.mxu0 %v10851_v42 }
 0x471   : > { %7596 = vmatpush3.bf16.msra.mxu1 %v10948_v47  ;;  %7611 = vmatprep.subr.bf16.mxu0 %v10949_v20 }
 0x472   : > { %7597 = vmatprep.subr.bf16.mxu1 %v10881_v15 }
 0x474   : > { %7613 = vmatpush1.bf16.msra.mxu0 %v10950_v22 }
 0x475   : > { %7599 = vmatpush3.bf16.msra.mxu1 %v10951_v4  ;;  %7615 = vmatprep.subr.bf16.mxu0 %v10952_v51 }
 0x476   : > { %7600 = vmatprep.subr.bf16.mxu1 %v10881_v15 }
 0x478   : > { %7617 = vmatpush1.bf16.msra.mxu0 %v10953_v18 }
 0x479   : > { %7602 = vmatpush3.bf16.msra.mxu1 %v10954_v57  ;;  %7619 = vmatprep.subr.bf16.mxu0 %v10955_v26 }
 0x47a   : > { %7603 = vmatprep.subr.bf16.mxu1 %v10881_v15 }
 0x47c   : > { %7621 = vmatpush1.bf16.msra.mxu0 %v10956_v50 }
 0x47d   : > { %7605 = vmatpush3.bf16.msra.mxu1 %v10957_v17  ;;  %7623 = vmatprep.subr.bf16.mxu0 %v10958_v30  ;;  %v10969_v30 = vld [vmem:[#allocation39_spill] sm:$0xff] }
 0x47e   : > { %7638 = vmatprep.subr.bf16.mxu1 %v10881_v15 }
 0x480   : > { %6372 = vmatmul.mubr.f32.vlgmr.msra.gmra.mrb[54].mxu1 %v2603_v10  ;;  %7625 = vmatpush1.bf16.msra.mxu0 %v10959_v6  ;;  %v10965_v10 = vld [vmem:[#allocation47_spill] sm:$0xff]  ;;  %v10966_v6 = vld [vmem:[#allocation36_spill] sm:$0xff] }
 0x481   : > { %7640 = vmatpush3.bf16.msra.mxu1 %v10960_v40  ;;  %7627 = vmatprep.subr.bf16.mxu0 %v10961_v46  ;;  %v10967_v40 = vld [vmem:[#allocation49_spill] sm:$0xff]  ;;  %v10968_v46 = vld [vmem:[#allocation50_spill] sm:$0xff] }
 0x482   : > { %7641 = vmatprep.subr.bf16.mxu1 %v10881_v15  ;;  %6406 = vmatprep.mubr.msk.f32.mxu1 %vm8887_vm1, %v10851_v42 }
 0x484   : > { %7629 = vmatpush1.bf16.msra.mxu0 %v10962_v27  ;;  %v10974_v27 = vld [vmem:[#allocation70_spill] sm:$0xff] }
 0x485   : > { %7643 = vmatpush3.bf16.msra.mxu1 %v10963_v16  ;;  %7631 = vmatprep.subr.bf16.mxu0 %v10964_v39  ;;  %v10970_v16 = vld [vmem:[#allocation42_spill] sm:$0xff]  ;;  %v10971_v39 = vld [vmem:[#allocation45_spill] sm:$0xff] }
 0x486   : > { %7644 = vmatprep.subr.bf16.mxu1 %v10881_v15 }
 0x488   : > { %7633 = vmatpush1.bf16.msra.mxu0 %v10965_v10 }
 0x489   : > { %7646 = vmatpush3.bf16.msra.mxu1 %v10966_v6  ;;  %7635 = vmatprep.subr.bf16.mxu0 %v10967_v40  ;;  %v10972_v6 = vld [vmem:[#allocation48_spill] sm:$0xff]  ;;  %v10973_v40 = vld [vmem:[#allocation51_spill] sm:$0xff] }
 0x48a   : > { %7647 = vmatprep.subr.bf16.mxu1 %v10881_v15 }
 0x48c   : > { %7637 = vmatpush1.bf16.msra.mxu0 %v10968_v46 }
 0x48d   : > { %7649 = vmatpush3.bf16.msra.mxu1 %v10969_v30  ;;  %7662 = vmatprep.subr.bf16.mxu0 %v10881_v15 }
 0x48e   : > { %7650 = vmatprep.subr.bf16.mxu1 %v10881_v15 }
 0x491   : > { %7652 = vmatpush3.bf16.msra.mxu1 %v10970_v16 }
 0x492   : > { %7653 = vmatprep.subr.bf16.mxu1 %v10881_v15 }
 0x495   : > { %7655 = vmatpush3.bf16.msra.mxu1 %v10971_v39 }
 0x496   : > { %7656 = vmatprep.subr.bf16.mxu1 %v10881_v15 }
 0x499   : > { %7658 = vmatpush3.bf16.msra.mxu1 %v10972_v6 }
 0x49a   : > { %7659 = vmatprep.subr.bf16.mxu1 %v10881_v15 }
 0x49d   : > { %7661 = vmatpush3.bf16.msra.mxu1 %v10973_v40 }
 0x49e   : > { %7718 = vmatprep.subr.bf16.mxu1 %v10881_v15 }
 0x502   : > { %v2676_v30 = vpop.f32.mrb[6].mxu0  ;;  %v2747_v46 = vpop.f32.mrb[50].mxu1 }
 0x503   : > { %v8252_v10 = vadd.f32 %v2676_v30, %v10913_v32  ;;  %v2753_v16 = vadd.f32 %v2747_v46, %v10974_v27  ;;  %v2678_v17 = vpop.f32.mrb[7].mxu0  ;;  %v6268_v50 = vpop.f32.mrb[51].mxu1 }
 0x504   : > { %v8253_v39 = vadd.f32 %v2678_v17, %v9723_v2  ;;  %v10975_v17 = vld [vmem:[#allocation71_spill] sm:$0xff] }
 0x505   : > { %v2825_v26 = vmul.f32 0.5, %v8252_v10 }
 0x506   : > { %v2829_v57 = vmul.f32 0.5, %v8253_v39 }
 0x507   : > { %8493 = vtanh.f32 %v2825_v26 }
 0x508   : > { %8495 = vtanh.f32 %v2829_v57 }
 0x509   : > { %8497 = vtanh.f32 %v2753_v16  ;;  %v10976_v16 = vld [vmem:[#allocation88_spill] sm:$0xff] }
 0x511   : > { %v8494_v6 = vpop.eup %8493 }
 0x512   : > { %v8496_v18 = vpop.eup %8495  ;;  %v2827_v40 = vmul.f32 0.5, %v8494_v6 }
 0x513   : > { %v2831_v51 = vmul.f32 0.5, %v8496_v18  ;;  %v8498_v22 = vpop.eup %8497 }
 0x514   : > { %v2828_v4 = vadd.f32 0.5, %v2827_v40 }
 0x515   : > { %v2832_v20 = vadd.f32 0.5, %v2831_v51 }
 0x516   : > { %v2835_v47 = vmul.f32 %v8498_v22, %v2828_v4 }
 0x517   : > { %v2834_v30 = vmul.f32 %v2832_v20, %v9988_v36 }
 0x519   : > { %v10112_v46 = vadd.f32 %v2835_v47, %v2834_v30 }
 0x522   : > { %v2820_v50 = vpop.f32.mrb[38].mxu0 }
 0x523   : > { %v2824_v27 = vadd.f32 %v2820_v50, %v10975_v17  ;;  %v6303_v39 = vpop.f32.mrb[39].mxu0 }
 0x525   : > { %v2837_v26 = vmul.f32 0.5, %v2824_v27 }
 0x527   : > { %8499 = vtanh.f32 %v2837_v26 }
 0x528   : > { %8501 = vtanh.f32 %v10112_v46 }
 0x531   : > { %v8500_v57 = vpop.eup %8499 }
 0x532   : > { %v2839_v6 = vmul.f32 0.5, %v8500_v57  ;;  %v8502_v4 = vpop.eup %8501 }
 0x533   : > { %v2986_v18 = vpop.f32.mrb[52].mxu1 }
 0x534   : > { %v2840_v40 = vadd.f32 0.5, %v2839_v6  ;;  %v2992_v51 = vadd.f32 %v2986_v18, %v10976_v16  ;;  %v6338_v22 = vpop.f32.mrb[53].mxu1 }
 0x536   : > { %v2842_v36 = vmul.f32 %v8502_v4, %v2840_v40  ;;  %v10977_v40 = vld [vmem:[#allocation89_spill] sm:$0xff] }
 0x538   : > { %5249 = vst [vmem:[%s9251_s30 + $0x18] sm:$0xff] %v2842_v36  ;;  %3153 = vmatmul.mubr.f32.vlgmr.msra.gmra.mrb[8].mxu0 %v2842_v36  ;;  %6407 = vmatmul.mubr.f32.vlgmr.msra.gmra.mrb[56].mxu1 %v2842_v36 }
 0x539   : > { %7664 = vmatpush3.bf16.msra.mxu0 %v9418_v28  ;;  %7720 = vmatpush3.bf16.msra.mxu1 %v9422_v29 }
 0x53a   : > { %7665 = vmatprep.subr.bf16.mxu0 %v10881_v15  ;;  %7721 = vmatprep.subr.bf16.mxu1 %v10881_v15 }
 0x53b   : > { %6441 = vmatprep.mubr.msk.f32.mxu0 %vm8887_vm1, %v10851_v42  ;;  %6476 = vmatprep.mubr.msk.f32.mxu1 %vm8887_vm1, %v10851_v42 }
 0x53d   : > { %7667 = vmatpush3.bf16.msra.mxu0 %v9431_v35  ;;  %7723 = vmatpush3.bf16.msra.mxu1 %v9435_v38 }
 0x53e   : > { %7668 = vmatprep.subr.bf16.mxu0 %v10881_v15  ;;  %7724 = vmatprep.subr.bf16.mxu1 %v10881_v15 }
 0x541   : > { %7670 = vmatpush3.bf16.msra.mxu0 %v9443_v44  ;;  %7726 = vmatpush3.bf16.msra.mxu1 %v9447_v45 }
 0x542   : > { %v2915_v47 = vpop.f32.mrb[24].mxu0  ;;  %7671 = vmatprep.subr.bf16.mxu0 %v10881_v15  ;;  %7727 = vmatprep.subr.bf16.mxu1 %v10881_v15 }
 0x543   : > { %v8270_v20 = vadd.f32 %v2915_v47, %v9753_v33  ;;  %v2917_v10 = vpop.f32.mrb[25].mxu0 }
 0x544   : > { %v8271_v30 = vadd.f32 %v2917_v10, %v9756_v37 }
 0x545   : > { %v3064_v50 = vmul.f32 0.5, %v8270_v20  ;;  %7673 = vmatpush3.bf16.msra.mxu0 %v9451_v54  ;;  %7729 = vmatpush3.bf16.msra.mxu1 %v9455_v55 }
 0x546   : > { %v3068_v17 = vmul.f32 0.5, %v8271_v30  ;;  %7674 = vmatprep.subr.bf16.mxu0 %v10881_v15  ;;  %7730 = vmatprep.subr.bf16.mxu1 %v10881_v15 }
 0x547   : > { %8503 = vtanh.f32 %v3064_v50 }
 0x548   : > { %8505 = vtanh.f32 %v3068_v17 }
 0x549   : > { %7676 = vmatpush3.bf16.msra.mxu0 %v9459_v0  ;;  %7732 = vmatpush3.bf16.msra.mxu1 %v9463_v1  ;;  %8507 = vtanh.f32 %v2992_v51 }
 0x54a   : > { %7677 = vmatprep.subr.bf16.mxu0 %v10881_v15  ;;  %7733 = vmatprep.subr.bf16.mxu1 %v10881_v15 }
 0x54d   : > { %7679 = vmatpush3.bf16.msra.mxu0 %v9467_v13  ;;  %7735 = vmatpush3.bf16.msra.mxu1 %v9471_v14 }
 0x54e   : > { %7680 = vmatprep.subr.bf16.mxu0 %v10881_v15  ;;  %7736 = vmatprep.subr.bf16.mxu1 %v10881_v15 }
 0x551   : > { %v8504_v27 = vpop.eup %8503  ;;  %7682 = vmatpush3.bf16.msra.mxu0 %v9475_v24  ;;  %7738 = vmatpush3.bf16.msra.mxu1 %v9479_v31 }
 0x552   : > { %v8506_v39 = vpop.eup %8505  ;;  %v3066_v26 = vmul.f32 0.5, %v8504_v27  ;;  %7683 = vmatprep.subr.bf16.mxu0 %v10881_v15  ;;  %7739 = vmatprep.subr.bf16.mxu1 %v10881_v15 }
 0x553   : > { %v3070_v57 = vmul.f32 0.5, %v8506_v39  ;;  %v3059_v6 = vpop.f32.mrb[54].mxu1  ;;  %v8508_v22 = vpop.eup %8507  ;;  %v10978_v39 = vld [vmem:[#allocation61_spill] sm:$0xff] }
 0x554   : > { %v3067_v18 = vadd.f32 0.5, %v3066_v26  ;;  %v3063_v16 = vadd.f32 %v3059_v6, %v10977_v40  ;;  %v6373_v51 = vpop.f32.mrb[55].mxu1  ;;  %v10979_v26 = vld [vmem:[#allocation31_spill] sm:$0xff] }
 0x555   : > { %v3071_v4 = vadd.f32 0.5, %v3070_v57  ;;  %7685 = vmatpush3.bf16.msra.mxu0 %v9483_v43  ;;  %7741 = vmatpush3.bf16.msra.mxu1 %v9487_v48  ;;  %v10980_v57 = vld [vmem:[#allocation32_spill] sm:$0xff]  ;;  %v10981_v6 = vld [vmem:[#allocation63_spill] sm:$0xff]  ;;  %v10985_v51 = vld [vmem:[#allocation37_spill] sm:$0xff] }
 0x556   : > { %v3074_v47 = vmul.f32 %v8508_v22, %v3067_v18  ;;  %v3076_v20 = vmul.f32 0.5, %v3063_v16  ;;  %7687 = vmatprep.subr.bf16.mxu0 %v9489_v49  ;;  %7742 = vmatprep.subr.bf16.mxu1 %v10881_v15  ;;  %v10982_v18 = vld [vmem:[#allocation34_spill] sm:$0xff]  ;;  %v10983_v40 = vld [vmem:[#allocation35_spill] sm:$0xff]  ;;  %v10984_v16 = vld [vmem:[#allocation64_spill] sm:$0xff] }
 0x557   : > { %v3073_v10 = vmul.f32 %v3071_v4, %v10034_v63  ;;  %v10986_v22 = vld [vmem:[#allocation38_spill] sm:$0xff]  ;;  %v10987_v4 = vld [vmem:[#allocation65_spill] sm:$0xff] }
 0x558   : > { %8509 = vtanh.f32 %v3076_v20  ;;  %6442 = vmatmul.mubr.f32.vlgmr.msra.gmra.mrb[40].mxu0 %v2842_v36  ;;  %v10989_v20 = vld [vmem:[#allocation41_spill] sm:$0xff] }
 0x559   : > { %v10158_v30 = vadd.f32 %v3074_v47, %v3073_v10  ;;  %7689 = vmatpush1.bf16.msra.mxu0 %v9495_v3  ;;  %3391 = vmatprep.mubr.f32.mxu0 %v10851_v42  ;;  %v10988_v47 = vld [vmem:[#allocation40_spill] sm:$0xff]  ;;  %v10990_v10 = vld [vmem:[#allocation30_spill] sm:$0xff] }
 0x55a   : > { %7691 = vmatprep.subr.bf16.mxu0 %v9501_v11 }
 0x55b   : > { %8511 = vtanh.f32 %v10158_v30 }
 0x55d   : > { %7693 = vmatpush1.bf16.msra.mxu0 %v9507_v34 }
 0x55e   : > { %7695 = vmatprep.subr.bf16.mxu0 %v10882_v41 }
 0x561   : > { %7697 = vmatpush1.bf16.msra.mxu0 %v10883_v58 }
 0x562   : > { %v8510_v63 = vpop.eup %8509  ;;  %7699 = vmatprep.subr.bf16.mxu0 %v10884_v7 }
 0x563   : > { %v3078_v36 = vmul.f32 0.5, %v8510_v63  ;;  %v10991_v63 = vld [vmem:[#allocation43_spill] sm:$0xff] }
 0x565   : > { %v8512_v50 = vpop.eup %8511  ;;  %v3079_v17 = vadd.f32 0.5, %v3078_v36  ;;  %7701 = vmatpush1.bf16.msra.mxu0 %v10885_v56  ;;  %v10992_v36 = vld [vmem:[#allocation44_spill] sm:$0xff] }
 0x566   : > { %7703 = vmatprep.subr.bf16.mxu0 %v10886_v60 }
 0x567   : > { %v3081_v27 = vmul.f32 %v8512_v50, %v3079_v17  ;;  %v10993_v50 = vld [vmem:[#allocation33_spill] sm:$0xff]  ;;  %v10994_v17 = vld [vmem:[#allocation46_spill] sm:$0xff] }
 0x569   : > { %5250 = vst [vmem:[%s9253_s9 + $0x20] sm:$0xff] %v3081_v27  ;;  %7705 = vmatpush1.bf16.msra.mxu0 %v9540_v21  ;;  %6477 = vmatmul.mubr.f32.vlgmr.msra.gmra.mrb[58].mxu1 %v3081_v27 }
 0x56a   : > { %7744 = vmatpush3.bf16.msra.mxu1 %v10887_v19  ;;  %7707 = vmatprep.subr.bf16.mxu0 %v10888_v62 }
 0x56b   : > { %7745 = vmatprep.subr.bf16.mxu1 %v10881_v15  ;;  %6511 = vmatprep.mubr.msk.f32.mxu1 %vm8887_vm1, %v10851_v42 }
 0x56d   : > { %7709 = vmatpush1.bf16.msra.mxu0 %v9550_v25 }
 0x56e   : > { %7747 = vmatpush3.bf16.msra.mxu1 %v10889_v59  ;;  %7711 = vmatprep.subr.bf16.mxu0 %v9556_v9 }
 0x56f   : > { %7748 = vmatprep.subr.bf16.mxu1 %v10881_v15 }
 0x571   : > { %7713 = vmatpush1.bf16.msra.mxu0 %v9560_v23 }
 0x572   : > { %7750 = vmatpush3.bf16.msra.mxu1 %v10890_v12  ;;  %7715 = vmatprep.subr.bf16.mxu0 %v9566_v61 }
 0x573   : > { %7751 = vmatprep.subr.bf16.mxu1 %v10881_v15 }
 0x575   : > { %7717 = vmatpush1.bf16.msra.mxu0 %v9570_v8 }
 0x576   : > { %7753 = vmatpush3.bf16.msra.mxu1 %v10891_v52  ;;  %7767 = vmatprep.subr.bf16.mxu0 %v9265_v53 }
 0x577   : > { %7754 = vmatprep.subr.bf16.mxu1 %v10881_v15 }
 0x578   : > { %3392 = vmatmul.mubr.f32.vlgmr.msra.gmra.mrb[22].mxu0 %v3081_v27 }
 0x579   : > { %7769 = vmatpush1.bf16.msra.mxu0 %v9303_v5  ;;  %3630 = vmatprep.mubr.f32.mxu0 %v10851_v42 }
 0x57a   : > { %7756 = vmatpush3.bf16.msra.mxu1 %v10978_v39  ;;  %7771 = vmatprep.subr.bf16.mxu0 %v10979_v26 }
 0x57b   : > { %7757 = vmatprep.subr.bf16.mxu1 %v10881_v15 }
 0x57d   : > { %7773 = vmatpush1.bf16.msra.mxu0 %v10980_v57 }
 0x57e   : > { %7759 = vmatpush3.bf16.msra.mxu1 %v10981_v6  ;;  %7775 = vmatprep.subr.bf16.mxu0 %v10982_v18 }
 0x57f   : > { %7760 = vmatprep.subr.bf16.mxu1 %v10881_v15 }
 0x581   : > { %7777 = vmatpush1.bf16.msra.mxu0 %v10983_v40 }
 0x582   : > { %7762 = vmatpush3.bf16.msra.mxu1 %v10984_v16  ;;  %7779 = vmatprep.subr.bf16.mxu0 %v10985_v51 }
 0x583   : > { %7763 = vmatprep.subr.bf16.mxu1 %v10881_v15 }
 0x585   : > { %7781 = vmatpush1.bf16.msra.mxu0 %v10986_v22 }
 0x586   : > { %7765 = vmatpush3.bf16.msra.mxu1 %v10987_v4  ;;  %7783 = vmatprep.subr.bf16.mxu0 %v10988_v47  ;;  %v10999_v47 = vld [vmem:[#allocation39_spill] sm:$0xff] }
 0x587   : > { %7798 = vmatprep.subr.bf16.mxu1 %v10881_v15 }
 0x589   : > { %6512 = vmatmul.mubr.f32.vlgmr.msra.gmra.mrb[60].mxu1 %v3081_v27  ;;  %7785 = vmatpush1.bf16.msra.mxu0 %v10989_v20  ;;  %v10995_v27 = vld [vmem:[#allocation47_spill] sm:$0xff]  ;;  %v10996_v20 = vld [vmem:[#allocation36_spill] sm:$0xff] }
 0x58a   : > { %7800 = vmatpush3.bf16.msra.mxu1 %v10990_v10  ;;  %7787 = vmatprep.subr.bf16.mxu0 %v10991_v63  ;;  %v10997_v10 = vld [vmem:[#allocation49_spill] sm:$0xff]  ;;  %v10998_v63 = vld [vmem:[#allocation50_spill] sm:$0xff] }
 0x58b   : > { %7801 = vmatprep.subr.bf16.mxu1 %v10881_v15  ;;  %6546 = vmatprep.mubr.msk.f32.mxu1 %vm8887_vm1, %v10851_v42 }
 0x58d   : > { %7789 = vmatpush1.bf16.msra.mxu0 %v10992_v36  ;;  %v11004_v36 = vld [vmem:[#allocation72_spill] sm:$0xff] }
 0x58e   : > { %7803 = vmatpush3.bf16.msra.mxu1 %v10993_v50  ;;  %7791 = vmatprep.subr.bf16.mxu0 %v10994_v17  ;;  %v11000_v50 = vld [vmem:[#allocation42_spill] sm:$0xff]  ;;  %v11001_v17 = vld [vmem:[#allocation45_spill] sm:$0xff] }
 0x58f   : > { %7804 = vmatprep.subr.bf16.mxu1 %v10881_v15 }
 0x591   : > { %7793 = vmatpush1.bf16.msra.mxu0 %v10995_v27 }
 0x592   : > { %7806 = vmatpush3.bf16.msra.mxu1 %v10996_v20  ;;  %7795 = vmatprep.subr.bf16.mxu0 %v10997_v10  ;;  %v11002_v20 = vld [vmem:[#allocation48_spill] sm:$0xff]  ;;  %v11003_v10 = vld [vmem:[#allocation51_spill] sm:$0xff] }
 0x593   : > { %7807 = vmatprep.subr.bf16.mxu1 %v10881_v15 }
 0x595   : > { %7797 = vmatpush1.bf16.msra.mxu0 %v10998_v63 }
 0x596   : > { %7809 = vmatpush3.bf16.msra.mxu1 %v10999_v47  ;;  %7822 = vmatprep.subr.bf16.mxu0 %v10881_v15 }
 0x597   : > { %7810 = vmatprep.subr.bf16.mxu1 %v10881_v15 }
 0x59a   : > { %7812 = vmatpush3.bf16.msra.mxu1 %v11000_v50 }
 0x59b   : > { %7813 = vmatprep.subr.bf16.mxu1 %v10881_v15 }
 0x59e   : > { %7815 = vmatpush3.bf16.msra.mxu1 %v11001_v17 }
 0x59f   : > { %7816 = vmatprep.subr.bf16.mxu1 %v10881_v15 }
 0x5a2   : > { %7818 = vmatpush3.bf16.msra.mxu1 %v11002_v20 }
 0x5a3   : > { %7819 = vmatprep.subr.bf16.mxu1 %v10881_v15 }
 0x5a6   : > { %7821 = vmatpush3.bf16.msra.mxu1 %v11003_v10 }
 0x5a7   : > { %7878 = vmatprep.subr.bf16.mxu1 %v10881_v15 }
 0x60b   : > { %v3154_v47 = vpop.f32.mrb[8].mxu0  ;;  %v3225_v63 = vpop.f32.mrb[56].mxu1 }
 0x60c   : > { %v8254_v27 = vadd.f32 %v3154_v47, %v10913_v32  ;;  %v3231_v50 = vadd.f32 %v3225_v63, %v11004_v36  ;;  %v3156_v4 = vpop.f32.mrb[9].mxu0  ;;  %v6408_v22 = vpop.f32.mrb[57].mxu1 }
 0x60d   : > { %v8255_v17 = vadd.f32 %v3156_v4, %v9723_v2  ;;  %v11005_v4 = vld [vmem:[#allocation73_spill] sm:$0xff] }
 0x60e   : > { %v3303_v51 = vmul.f32 0.5, %v8254_v27 }
 0x60f   : > { %v3307_v16 = vmul.f32 0.5, %v8255_v17 }
 0x610   : > { %8513 = vtanh.f32 %v3303_v51 }
 0x611   : > { %8515 = vtanh.f32 %v3307_v16 }
 0x612   : > { %8517 = vtanh.f32 %v3231_v50  ;;  %v11006_v50 = vld [vmem:[#allocation86_spill] sm:$0xff] }
 0x61a   : > { %v8514_v20 = vpop.eup %8513 }
 0x61b   : > { %v8516_v40 = vpop.eup %8515  ;;  %v3305_v10 = vmul.f32 0.5, %v8514_v20 }
 0x61c   : > { %v3309_v18 = vmul.f32 0.5, %v8516_v40  ;;  %v8518_v57 = vpop.eup %8517 }
 0x61d   : > { %v3306_v6 = vadd.f32 0.5, %v3305_v10 }
 0x61e   : > { %v3310_v26 = vadd.f32 0.5, %v3309_v18 }
 0x61f   : > { %v3313_v39 = vmul.f32 %v8518_v57, %v3306_v6 }
 0x620   : > { %v3312_v47 = vmul.f32 %v3310_v26, %v10112_v46 }
 0x622   : > { %v10236_v63 = vadd.f32 %v3313_v39, %v3312_v47 }
 0x62b   : > { %v3298_v22 = vpop.f32.mrb[40].mxu0 }
 0x62c   : > { %v3302_v36 = vadd.f32 %v3298_v22, %v11005_v4  ;;  %v6443_v17 = vpop.f32.mrb[41].mxu0 }
 0x62e   : > { %v3315_v51 = vmul.f32 0.5, %v3302_v36 }
 0x630   : > { %8519 = vtanh.f32 %v3315_v51 }
 0x631   : > { %8521 = vtanh.f32 %v10236_v63 }
 0x63a   : > { %v8520_v16 = vpop.eup %8519 }
 0x63b   : > { %v3317_v20 = vmul.f32 0.5, %v8520_v16  ;;  %v8522_v6 = vpop.eup %8521 }
 0x63c   : > { %v3464_v40 = vpop.f32.mrb[58].mxu1 }
 0x63d   : > { %v3318_v10 = vadd.f32 0.5, %v3317_v20  ;;  %v3470_v18 = vadd.f32 %v3464_v40, %v11006_v50  ;;  %v6478_v57 = vpop.f32.mrb[59].mxu1 }
 0x63f   : > { %v3320_v46 = vmul.f32 %v8522_v6, %v3318_v10  ;;  %v11007_v10 = vld [vmem:[#allocation87_spill] sm:$0xff] }
 0x641   : > { %5251 = vst [vmem:[%s9251_s30 + $0x20] sm:$0xff] %v3320_v46  ;;  %3631 = vmatmul.mubr.f32.vlgmr.msra.gmra.mrb[10].mxu0 %v3320_v46  ;;  %6547 = vmatmul.mubr.f32.vlgmr.msra.gmra.mrb[62].mxu1 %v3320_v46 }
 0x642   : > { %7824 = vmatpush3.bf16.msra.mxu0 %v9418_v28  ;;  %7880 = vmatpush3.bf16.msra.mxu1 %v9422_v29 }
 0x643   : > { %7825 = vmatprep.subr.bf16.mxu0 %v10881_v15  ;;  %7881 = vmatprep.subr.bf16.mxu1 %v10881_v15 }
 0x644   : > { %6581 = vmatprep.mubr.msk.f32.mxu0 %vm8887_vm1, %v10851_v42  ;;  %6616 = vmatprep.mubr.msk.f32.mxu1 %vm8887_vm1, %v10851_v42 }
 0x646   : > { %7827 = vmatpush3.bf16.msra.mxu0 %v9431_v35  ;;  %7883 = vmatpush3.bf16.msra.mxu1 %v9435_v38 }
 0x647   : > { %7828 = vmatprep.subr.bf16.mxu0 %v10881_v15  ;;  %7884 = vmatprep.subr.bf16.mxu1 %v10881_v15 }
 0x64a   : > { %7830 = vmatpush3.bf16.msra.mxu0 %v9443_v44  ;;  %7886 = vmatpush3.bf16.msra.mxu1 %v9447_v45 }
 0x64b   : > { %v3393_v39 = vpop.f32.mrb[22].mxu0  ;;  %7831 = vmatprep.subr.bf16.mxu0 %v10881_v15  ;;  %7887 = vmatprep.subr.bf16.mxu1 %v10881_v15 }
 0x64c   : > { %v8268_v26 = vadd.f32 %v3393_v39, %v9753_v33  ;;  %v3395_v27 = vpop.f32.mrb[23].mxu0 }
 0x64d   : > { %v8269_v47 = vadd.f32 %v3395_v27, %v9756_v37 }
 0x64e   : > { %v3542_v22 = vmul.f32 0.5, %v8268_v26  ;;  %7833 = vmatpush3.bf16.msra.mxu0 %v9451_v54  ;;  %7889 = vmatpush3.bf16.msra.mxu1 %v9455_v55 }
 0x64f   : > { %v3546_v4 = vmul.f32 0.5, %v8269_v47  ;;  %7834 = vmatprep.subr.bf16.mxu0 %v10881_v15  ;;  %7890 = vmatprep.subr.bf16.mxu1 %v10881_v15 }
 0x650   : > { %8523 = vtanh.f32 %v3542_v22 }
 0x651   : > { %8525 = vtanh.f32 %v3546_v4 }
 0x652   : > { %7836 = vmatpush3.bf16.msra.mxu0 %v9459_v0  ;;  %7892 = vmatpush3.bf16.msra.mxu1 %v9463_v1  ;;  %8527 = vtanh.f32 %v3470_v18 }
 0x653   : > { %7837 = vmatprep.subr.bf16.mxu0 %v10881_v15  ;;  %7893 = vmatprep.subr.bf16.mxu1 %v10881_v15 }
 0x656   : > { %7839 = vmatpush3.bf16.msra.mxu0 %v9467_v13  ;;  %7895 = vmatpush3.bf16.msra.mxu1 %v9471_v14 }
 0x657   : > { %7840 = vmatprep.subr.bf16.mxu0 %v10881_v15  ;;  %7896 = vmatprep.subr.bf16.mxu1 %v10881_v15 }
 0x65a   : > { %v8524_v36 = vpop.eup %8523  ;;  %7842 = vmatpush3.bf16.msra.mxu0 %v9475_v24  ;;  %7898 = vmatpush3.bf16.msra.mxu1 %v9479_v31 }
 0x65b   : > { %v8526_v17 = vpop.eup %8525  ;;  %v3544_v51 = vmul.f32 0.5, %v8524_v36  ;;  %7843 = vmatprep.subr.bf16.mxu0 %v10881_v15  ;;  %7899 = vmatprep.subr.bf16.mxu1 %v10881_v15 }
 0x65c   : > { %v3548_v16 = vmul.f32 0.5, %v8526_v17  ;;  %v3537_v20 = vpop.f32.mrb[60].mxu1  ;;  %v8528_v57 = vpop.eup %8527  ;;  %v11008_v17 = vld [vmem:[#allocation61_spill] sm:$0xff] }
 0x65d   : > { %v3545_v40 = vadd.f32 0.5, %v3544_v51  ;;  %v3541_v50 = vadd.f32 %v3537_v20, %v11007_v10  ;;  %v6513_v18 = vpop.f32.mrb[61].mxu1  ;;  %v11009_v51 = vld [vmem:[#allocation31_spill] sm:$0xff] }
 0x65e   : > { %v3549_v6 = vadd.f32 0.5, %v3548_v16  ;;  %7845 = vmatpush3.bf16.msra.mxu0 %v9483_v43  ;;  %7901 = vmatpush3.bf16.msra.mxu1 %v9487_v48  ;;  %v11010_v16 = vld [vmem:[#allocation32_spill] sm:$0xff]  ;;  %v11011_v20 = vld [vmem:[#allocation63_spill] sm:$0xff]  ;;  %v11015_v18 = vld [vmem:[#allocation37_spill] sm:$0xff] }
 0x65f   : > { %v3552_v39 = vmul.f32 %v8528_v57, %v3545_v40  ;;  %v3554_v26 = vmul.f32 0.5, %v3541_v50  ;;  %7847 = vmatprep.subr.bf16.mxu0 %v9489_v49  ;;  %7902 = vmatprep.subr.bf16.mxu1 %v10881_v15  ;;  %v11012_v40 = vld [vmem:[#allocation34_spill] sm:$0xff]  ;;  %v11013_v10 = vld [vmem:[#allocation35_spill] sm:$0xff]  ;;  %v11014_v50 = vld [vmem:[#allocation64_spill] sm:$0xff] }
 0x660   : > { %v3551_v27 = vmul.f32 %v3549_v6, %v10158_v30  ;;  %v11016_v57 = vld [vmem:[#allocation38_spill] sm:$0xff]  ;;  %v11017_v6 = vld [vmem:[#allocation65_spill] sm:$0xff] }
 0x661   : > { %8529 = vtanh.f32 %v3554_v26  ;;  %6582 = vmatmul.mubr.f32.vlgmr.msra.gmra.mrb[42].mxu0 %v3320_v46  ;;  %v11019_v26 = vld [vmem:[#allocation41_spill] sm:$0xff] }
 0x662   : > { %v10282_v47 = vadd.f32 %v3552_v39, %v3551_v27  ;;  %7849 = vmatpush1.bf16.msra.mxu0 %v9495_v3  ;;  %3869 = vmatprep.mubr.f32.mxu0 %v10851_v42  ;;  %v11018_v39 = vld [vmem:[#allocation40_spill] sm:$0xff]  ;;  %v11020_v27 = vld [vmem:[#allocation30_spill] sm:$0xff] }
 0x663   : > { %7851 = vmatprep.subr.bf16.mxu0 %v9501_v11 }
 0x664   : > { %8531 = vtanh.f32 %v10282_v47 }
 0x666   : > { %7853 = vmatpush1.bf16.msra.mxu0 %v9507_v34 }
 0x667   : > { %7855 = vmatprep.subr.bf16.mxu0 %v10882_v41 }
 0x66a   : > { %7857 = vmatpush1.bf16.msra.mxu0 %v10883_v58 }
 0x66b   : > { %v8530_v30 = vpop.eup %8529  ;;  %7859 = vmatprep.subr.bf16.mxu0 %v10884_v7 }
 0x66c   : > { %v3556_v46 = vmul.f32 0.5, %v8530_v30  ;;  %v11021_v30 = vld [vmem:[#allocation43_spill] sm:$0xff] }
 0x66e   : > { %v8532_v22 = vpop.eup %8531  ;;  %v3557_v4 = vadd.f32 0.5, %v3556_v46  ;;  %7861 = vmatpush1.bf16.msra.mxu0 %v10885_v56  ;;  %v11022_v46 = vld [vmem:[#allocation44_spill] sm:$0xff] }
 0x66f   : > { %7863 = vmatprep.subr.bf16.mxu0 %v10886_v60 }
 0x670   : > { %v3559_v36 = vmul.f32 %v8532_v22, %v3557_v4  ;;  %v11023_v22 = vld [vmem:[#allocation33_spill] sm:$0xff]  ;;  %v11024_v4 = vld [vmem:[#allocation46_spill] sm:$0xff] }
 0x672   : > { %5252 = vst [vmem:[%s9253_s9 + $0x18] sm:$0xff] %v3559_v36  ;;  %7865 = vmatpush1.bf16.msra.mxu0 %v9540_v21  ;;  %6617 = vmatmul.mubr.f32.vlgmr.msra.gmra.mrb[64].mxu1 %v3559_v36 }
 0x673   : > { %7904 = vmatpush3.bf16.msra.mxu1 %v10887_v19  ;;  %7867 = vmatprep.subr.bf16.mxu0 %v10888_v62 }
 0x674   : > { %7905 = vmatprep.subr.bf16.mxu1 %v10881_v15  ;;  %6651 = vmatprep.mubr.msk.f32.mxu1 %vm8887_vm1, %v10851_v42 }
 0x676   : > { %7869 = vmatpush1.bf16.msra.mxu0 %v9550_v25 }
 0x677   : > { %7907 = vmatpush3.bf16.msra.mxu1 %v10889_v59  ;;  %7871 = vmatprep.subr.bf16.mxu0 %v9556_v9 }
 0x678   : > { %7908 = vmatprep.subr.bf16.mxu1 %v10881_v15 }
 0x67a   : > { %7873 = vmatpush1.bf16.msra.mxu0 %v9560_v23 }
 0x67b   : > { %7910 = vmatpush3.bf16.msra.mxu1 %v10890_v12  ;;  %7875 = vmatprep.subr.bf16.mxu0 %v9566_v61 }
 0x67c   : > { %7911 = vmatprep.subr.bf16.mxu1 %v10881_v15 }
 0x67e   : > { %7877 = vmatpush1.bf16.msra.mxu0 %v9570_v8 }
 0x67f   : > { %7913 = vmatpush3.bf16.msra.mxu1 %v10891_v52  ;;  %7927 = vmatprep.subr.bf16.mxu0 %v9265_v53 }
 0x680   : > { %7914 = vmatprep.subr.bf16.mxu1 %v10881_v15 }
 0x681   : > { %3870 = vmatmul.mubr.f32.vlgmr.msra.gmra.mrb[20].mxu0 %v3559_v36 }
 0x682   : > { %7929 = vmatpush1.bf16.msra.mxu0 %v9303_v5  ;;  %4108 = vmatprep.mubr.f32.mxu0 %v10851_v42 }
 0x683   : > { %7916 = vmatpush3.bf16.msra.mxu1 %v11008_v17  ;;  %7931 = vmatprep.subr.bf16.mxu0 %v11009_v51 }
 0x684   : > { %7917 = vmatprep.subr.bf16.mxu1 %v10881_v15 }
 0x686   : > { %7933 = vmatpush1.bf16.msra.mxu0 %v11010_v16 }
 0x687   : > { %7919 = vmatpush3.bf16.msra.mxu1 %v11011_v20  ;;  %7935 = vmatprep.subr.bf16.mxu0 %v11012_v40 }
 0x688   : > { %7920 = vmatprep.subr.bf16.mxu1 %v10881_v15 }
 0x68a   : > { %7937 = vmatpush1.bf16.msra.mxu0 %v11013_v10 }
 0x68b   : > { %7922 = vmatpush3.bf16.msra.mxu1 %v11014_v50  ;;  %7939 = vmatprep.subr.bf16.mxu0 %v11015_v18 }
 0x68c   : > { %7923 = vmatprep.subr.bf16.mxu1 %v10881_v15 }
 0x68e   : > { %7941 = vmatpush1.bf16.msra.mxu0 %v11016_v57 }
 0x68f   : > { %7925 = vmatpush3.bf16.msra.mxu1 %v11017_v6  ;;  %7943 = vmatprep.subr.bf16.mxu0 %v11018_v39  ;;  %v11029_v39 = vld [vmem:[#allocation39_spill] sm:$0xff] }
 0x690   : > { %7958 = vmatprep.subr.bf16.mxu1 %v10881_v15 }
 0x692   : > { %6652 = vmatmul.mubr.f32.vlgmr.msra.gmra.mrb[66].mxu1 %v3559_v36  ;;  %7945 = vmatpush1.bf16.msra.mxu0 %v11019_v26  ;;  %v11025_v36 = vld [vmem:[#allocation47_spill] sm:$0xff]  ;;  %v11026_v26 = vld [vmem:[#allocation36_spill] sm:$0xff] }
 0x693   : > { %7960 = vmatpush3.bf16.msra.mxu1 %v11020_v27  ;;  %7947 = vmatprep.subr.bf16.mxu0 %v11021_v30  ;;  %v11027_v27 = vld [vmem:[#allocation49_spill] sm:$0xff]  ;;  %v11028_v30 = vld [vmem:[#allocation50_spill] sm:$0xff] }
 0x694   : > { %7961 = vmatprep.subr.bf16.mxu1 %v10881_v15  ;;  %6686 = vmatprep.mubr.msk.f32.mxu1 %vm8887_vm1, %v10851_v42 }
 0x696   : > { %7949 = vmatpush1.bf16.msra.mxu0 %v11022_v46  ;;  %v11034_v46 = vld [vmem:[#allocation74_spill] sm:$0xff] }
 0x697   : > { %7963 = vmatpush3.bf16.msra.mxu1 %v11023_v22  ;;  %7951 = vmatprep.subr.bf16.mxu0 %v11024_v4  ;;  %v11030_v22 = vld [vmem:[#allocation42_spill] sm:$0xff]  ;;  %v11031_v4 = vld [vmem:[#allocation45_spill] sm:$0xff] }
 0x698   : > { %7964 = vmatprep.subr.bf16.mxu1 %v10881_v15 }
 0x69a   : > { %7953 = vmatpush1.bf16.msra.mxu0 %v11025_v36 }
 0x69b   : > { %7966 = vmatpush3.bf16.msra.mxu1 %v11026_v26  ;;  %7955 = vmatprep.subr.bf16.mxu0 %v11027_v27  ;;  %v11032_v26 = vld [vmem:[#allocation48_spill] sm:$0xff]  ;;  %v11033_v27 = vld [vmem:[#allocation51_spill] sm:$0xff] }
 0x69c   : > { %7967 = vmatprep.subr.bf16.mxu1 %v10881_v15 }
 0x69e   : > { %7957 = vmatpush1.bf16.msra.mxu0 %v11028_v30 }
 0x69f   : > { %7969 = vmatpush3.bf16.msra.mxu1 %v11029_v39  ;;  %7982 = vmatprep.subr.bf16.mxu0 %v10881_v15 }
 0x6a0   : > { %7970 = vmatprep.subr.bf16.mxu1 %v10881_v15 }
 0x6a3   : > { %7972 = vmatpush3.bf16.msra.mxu1 %v11030_v22 }
 0x6a4   : > { %7973 = vmatprep.subr.bf16.mxu1 %v10881_v15 }
 0x6a7   : > { %7975 = vmatpush3.bf16.msra.mxu1 %v11031_v4 }
 0x6a8   : > { %7976 = vmatprep.subr.bf16.mxu1 %v10881_v15 }
 0x6ab   : > { %7978 = vmatpush3.bf16.msra.mxu1 %v11032_v26 }
 0x6ac   : > { %7979 = vmatprep.subr.bf16.mxu1 %v10881_v15 }
 0x6af   : > { %7981 = vmatpush3.bf16.msra.mxu1 %v11033_v27 }
 0x6b0   : > { %8038 = vmatprep.subr.bf16.mxu1 %v10881_v15 }
 0x714   : > { %v3632_v39 = vpop.f32.mrb[10].mxu0  ;;  %v3703_v30 = vpop.f32.mrb[62].mxu1 }
 0x715   : > { %v8256_v36 = vadd.f32 %v3632_v39, %v10913_v32  ;;  %v3709_v22 = vadd.f32 %v3703_v30, %v11034_v46  ;;  %v3634_v6 = vpop.f32.mrb[11].mxu0  ;;  %v6548_v57 = vpop.f32.mrb[63].mxu1 }
 0x716   : > { %v8257_v4 = vadd.f32 %v3634_v6, %v9723_v2  ;;  %v11035_v6 = vld [vmem:[#allocation75_spill] sm:$0xff] }
 0x717   : > { %v3781_v18 = vmul.f32 0.5, %v8256_v36 }
 0x718   : > { %v3785_v50 = vmul.f32 0.5, %v8257_v4 }
 0x719   : > { %8533 = vtanh.f32 %v3781_v18 }
 0x71a   : > { %8535 = vtanh.f32 %v3785_v50 }
 0x71b   : > { %8537 = vtanh.f32 %v3709_v22  ;;  %v11036_v22 = vld [vmem:[#allocation84_spill] sm:$0xff] }
 0x723   : > { %v8534_v26 = vpop.eup %8533 }
 0x724   : > { %v8536_v10 = vpop.eup %8535  ;;  %v3783_v27 = vmul.f32 0.5, %v8534_v26 }
 0x725   : > { %v3787_v40 = vmul.f32 0.5, %v8536_v10  ;;  %v8538_v16 = vpop.eup %8537 }
 0x726   : > { %v3784_v20 = vadd.f32 0.5, %v3783_v27 }
 0x727   : > { %v3788_v51 = vadd.f32 0.5, %v3787_v40 }
 0x728   : > { %v3791_v17 = vmul.f32 %v8538_v16, %v3784_v20 }
 0x729   : > { %v3790_v39 = vmul.f32 %v3788_v51, %v10236_v63 }
 0x72b   : > { %v10360_v30 = vadd.f32 %v3791_v17, %v3790_v39 }
 0x734   : > { %v3776_v57 = vpop.f32.mrb[42].mxu0 }
 0x735   : > { %v3780_v46 = vadd.f32 %v3776_v57, %v11035_v6  ;;  %v6583_v4 = vpop.f32.mrb[43].mxu0 }
 0x737   : > { %v3793_v18 = vmul.f32 0.5, %v3780_v46 }
 0x739   : > { %8539 = vtanh.f32 %v3793_v18 }
 0x73a   : > { %8541 = vtanh.f32 %v10360_v30 }
 0x743   : > { %v8540_v50 = vpop.eup %8539 }
 0x744   : > { %v3795_v26 = vmul.f32 0.5, %v8540_v50  ;;  %v8542_v20 = vpop.eup %8541 }
 0x745   : > { %v3942_v10 = vpop.f32.mrb[64].mxu1 }
 0x746   : > { %v3796_v27 = vadd.f32 0.5, %v3795_v26  ;;  %v3948_v40 = vadd.f32 %v3942_v10, %v11036_v22  ;;  %v6618_v16 = vpop.f32.mrb[65].mxu1 }
 0x748   : > { %v3798_v63 = vmul.f32 %v8542_v20, %v3796_v27  ;;  %v11037_v27 = vld [vmem:[#allocation85_spill] sm:$0xff] }
 0x74a   : > { %5253 = vst [vmem:[%s9251_s30 + $0x28] sm:$0xff] %v3798_v63  ;;  %4109 = vmatmul.mubr.f32.vlgmr.msra.gmra.mrb[12].mxu0 %v3798_v63  ;;  %6687 = vmatmul.mubr.f32.vlgmr.msra.gmra.mrb[68].mxu1 %v3798_v63 }
 0x74b   : > { %7984 = vmatpush3.bf16.msra.mxu0 %v9418_v28  ;;  %8040 = vmatpush3.bf16.msra.mxu1 %v9422_v29 }
 0x74c   : > { %7985 = vmatprep.subr.bf16.mxu0 %v10881_v15  ;;  %8041 = vmatprep.subr.bf16.mxu1 %v10881_v15 }
 0x74d   : > { %6721 = vmatprep.mubr.msk.f32.mxu0 %vm8887_vm1, %v10851_v42  ;;  %6756 = vmatprep.mubr.msk.f32.mxu1 %vm8887_vm1, %v10851_v42 }
 0x74f   : > { %7987 = vmatpush3.bf16.msra.mxu0 %v9431_v35  ;;  %8043 = vmatpush3.bf16.msra.mxu1 %v9435_v38 }
 0x750   : > { %7988 = vmatprep.subr.bf16.mxu0 %v10881_v15  ;;  %8044 = vmatprep.subr.bf16.mxu1 %v10881_v15 }
 0x753   : > { %7990 = vmatpush3.bf16.msra.mxu0 %v9443_v44  ;;  %8046 = vmatpush3.bf16.msra.mxu1 %v9447_v45 }
 0x754   : > { %v3871_v17 = vpop.f32.mrb[20].mxu0  ;;  %7991 = vmatprep.subr.bf16.mxu0 %v10881_v15  ;;  %8047 = vmatprep.subr.bf16.mxu1 %v10881_v15 }
 0x755   : > { %v8266_v51 = vadd.f32 %v3871_v17, %v9753_v33  ;;  %v3873_v36 = vpop.f32.mrb[21].mxu0 }
 0x756   : > { %v8267_v39 = vadd.f32 %v3873_v36, %v9756_v37 }
 0x757   : > { %v4020_v57 = vmul.f32 0.5, %v8266_v51  ;;  %7993 = vmatpush3.bf16.msra.mxu0 %v9451_v54  ;;  %8049 = vmatpush3.bf16.msra.mxu1 %v9455_v55 }
 0x758   : > { %v4024_v6 = vmul.f32 0.5, %v8267_v39  ;;  %7994 = vmatprep.subr.bf16.mxu0 %v10881_v15  ;;  %8050 = vmatprep.subr.bf16.mxu1 %v10881_v15 }
 0x759   : > { %8543 = vtanh.f32 %v4020_v57 }
 0x75a   : > { %8545 = vtanh.f32 %v4024_v6 }
 0x75b   : > { %7996 = vmatpush3.bf16.msra.mxu0 %v9459_v0  ;;  %8052 = vmatpush3.bf16.msra.mxu1 %v9463_v1  ;;  %8547 = vtanh.f32 %v3948_v40 }
 0x75c   : > { %7997 = vmatprep.subr.bf16.mxu0 %v10881_v15  ;;  %8053 = vmatprep.subr.bf16.mxu1 %v10881_v15 }
 0x75f   : > { %7999 = vmatpush3.bf16.msra.mxu0 %v9467_v13  ;;  %8055 = vmatpush3.bf16.msra.mxu1 %v9471_v14 }
 0x760   : > { %8000 = vmatprep.subr.bf16.mxu0 %v10881_v15  ;;  %8056 = vmatprep.subr.bf16.mxu1 %v10881_v15 }
 0x763   : > { %v8544_v46 = vpop.eup %8543  ;;  %8002 = vmatpush3.bf16.msra.mxu0 %v9475_v24  ;;  %8058 = vmatpush3.bf16.msra.mxu1 %v9479_v31 }
 0x764   : > { %v8546_v4 = vpop.eup %8545  ;;  %v4022_v18 = vmul.f32 0.5, %v8544_v46  ;;  %8003 = vmatprep.subr.bf16.mxu0 %v10881_v15  ;;  %8059 = vmatprep.subr.bf16.mxu1 %v10881_v15 }
 0x765   : > { %v4026_v50 = vmul.f32 0.5, %v8546_v4  ;;  %v4015_v26 = vpop.f32.mrb[66].mxu1  ;;  %v8548_v16 = vpop.eup %8547  ;;  %v11038_v4 = vld [vmem:[#allocation61_spill] sm:$0xff] }
 0x766   : > { %v4023_v10 = vadd.f32 0.5, %v4022_v18  ;;  %v4019_v22 = vadd.f32 %v4015_v26, %v11037_v27  ;;  %v6653_v40 = vpop.f32.mrb[67].mxu1  ;;  %v11039_v18 = vld [vmem:[#allocation31_spill] sm:$0xff]  ;;  %v11044_v27 = vld [vmem:[#allocation64_spill] sm:$0xff] }
 0x767   : > { %v4027_v20 = vadd.f32 0.5, %v4026_v50  ;;  %8005 = vmatpush3.bf16.msra.mxu0 %v9483_v43  ;;  %8061 = vmatpush3.bf16.msra.mxu1 %v9487_v48  ;;  %v11040_v50 = vld [vmem:[#allocation32_spill] sm:$0xff]  ;;  %v11041_v26 = vld [vmem:[#allocation63_spill] sm:$0xff]  ;;  %v11047_v40 = vld [vmem:[#allocation65_spill] sm:$0xff] }
 0x768   : > { %v4030_v17 = vmul.f32 %v8548_v16, %v4023_v10  ;;  %v4032_v51 = vmul.f32 0.5, %v4019_v22  ;;  %8007 = vmatprep.subr.bf16.mxu0 %v9489_v49  ;;  %8062 = vmatprep.subr.bf16.mxu1 %v10881_v15  ;;  %v11042_v10 = vld [vmem:[#allocation34_spill] sm:$0xff]  ;;  %v11048_v16 = vld [vmem:[#allocation40_spill] sm:$0xff] }
 0x769   : > { %v4029_v36 = vmul.f32 %v4027_v20, %v10282_v47  ;;  %v11046_v22 = vld [vmem:[#allocation38_spill] sm:$0xff]  ;;  %v11049_v20 = vld [vmem:[#allocation41_spill] sm:$0xff] }
 0x76a   : > { %8549 = vtanh.f32 %v4032_v51  ;;  %6722 = vmatmul.mubr.f32.vlgmr.msra.gmra.mrb[44].mxu0 %v3798_v63  ;;  %v11051_v51 = vld [vmem:[#allocation43_spill] sm:$0xff] }
 0x76b   : > { %v10406_v39 = vadd.f32 %v4030_v17, %v4029_v36  ;;  %8009 = vmatpush1.bf16.msra.mxu0 %v9495_v3  ;;  %4347 = vmatprep.mubr.f32.mxu0 %v10851_v42  ;;  %v11050_v17 = vld [vmem:[#allocation30_spill] sm:$0xff]  ;;  %v11052_v36 = vld [vmem:[#allocation44_spill] sm:$0xff] }
 0x76c   : > { %8011 = vmatprep.subr.bf16.mxu0 %v9501_v11 }
 0x76d   : > { %8551 = vtanh.f32 %v10406_v39 }
 0x76f   : > { %8013 = vmatpush1.bf16.msra.mxu0 %v9507_v34 }
 0x770   : > { %8015 = vmatprep.subr.bf16.mxu0 %v10882_v41 }
 0x773   : > { %8017 = vmatpush1.bf16.msra.mxu0 %v10883_v58 }
 0x774   : > { %v8550_v47 = vpop.eup %8549  ;;  %8019 = vmatprep.subr.bf16.mxu0 %v10884_v7 }
 0x775   : > { %v4034_v63 = vmul.f32 0.5, %v8550_v47  ;;  %v11053_v47 = vld [vmem:[#allocation33_spill] sm:$0xff] }
 0x777   : > { %v8552_v57 = vpop.eup %8551  ;;  %v4035_v6 = vadd.f32 0.5, %v4034_v63  ;;  %8021 = vmatpush1.bf16.msra.mxu0 %v10885_v56  ;;  %v11054_v63 = vld [vmem:[#allocation46_spill] sm:$0xff] }
 0x778   : > { %8023 = vmatprep.subr.bf16.mxu0 %v10886_v60 }
 0x779   : > { %v4037_v46 = vmul.f32 %v8552_v57, %v4035_v6  ;;  %v11055_v57 = vld [vmem:[#allocation47_spill] sm:$0xff]  ;;  %v11056_v6 = vld [vmem:[#allocation36_spill] sm:$0xff] }
 0x77b   : > { %5254 = vst [vmem:[%s9253_s9 + $0x10] sm:$0xff] %v4037_v46  ;;  %8025 = vmatpush1.bf16.msra.mxu0 %v9540_v21  ;;  %6757 = vmatmul.mubr.f32.vlgmr.msra.gmra.mrb[70].mxu1 %v4037_v46 }
 0x77c   : > { %8064 = vmatpush3.bf16.msra.mxu1 %v10887_v19  ;;  %8027 = vmatprep.subr.bf16.mxu0 %v10888_v62 }
 0x77d   : > { %8065 = vmatprep.subr.bf16.mxu1 %v10881_v15  ;;  %6791 = vmatprep.mubr.msk.f32.mxu1 %vm8887_vm1, %v10851_v42 }
 0x77f   : > { %8029 = vmatpush1.bf16.msra.mxu0 %v9550_v25 }
 0x780   : > { %8067 = vmatpush3.bf16.msra.mxu1 %v10889_v59  ;;  %8031 = vmatprep.subr.bf16.mxu0 %v9556_v9 }
 0x781   : > { %8068 = vmatprep.subr.bf16.mxu1 %v10881_v15 }
 0x783   : > { %8033 = vmatpush1.bf16.msra.mxu0 %v9560_v23 }
 0x784   : > { %8070 = vmatpush3.bf16.msra.mxu1 %v10890_v12  ;;  %8035 = vmatprep.subr.bf16.mxu0 %v9566_v61 }
 0x785   : > { %8071 = vmatprep.subr.bf16.mxu1 %v10881_v15 }
 0x787   : > { %8037 = vmatpush1.bf16.msra.mxu0 %v9570_v8 }
 0x788   : > { %8073 = vmatpush3.bf16.msra.mxu1 %v10891_v52  ;;  %8087 = vmatprep.subr.bf16.mxu0 %v9265_v53  ;;  %v11043_v53 = vld [vmem:[#allocation35_spill] sm:$0xff] }
 0x789   : > { %8074 = vmatprep.subr.bf16.mxu1 %v10881_v15 }
 0x78a   : > { %4348 = vmatmul.mubr.f32.vlgmr.msra.gmra.mrb[18].mxu0 %v4037_v46 }
 0x78b   : > { %8089 = vmatpush1.bf16.msra.mxu0 %v9303_v5  ;;  %4586 = vmatprep.mubr.f32.mxu0 %v10851_v42  ;;  %v11045_v5 = vld [vmem:[#allocation37_spill] sm:$0xff] }
 0x78c   : > { %8076 = vmatpush3.bf16.msra.mxu1 %v11038_v4  ;;  %8091 = vmatprep.subr.bf16.mxu0 %v11039_v18  ;;  %v11058_v18 = vld [vmem:[#allocation50_spill] sm:$0xff] }
 0x78d   : > { %8077 = vmatprep.subr.bf16.mxu1 %v10881_v15 }
 0x78f   : > { %8093 = vmatpush1.bf16.msra.mxu0 %v11040_v50  ;;  %v11059_v50 = vld [vmem:[#allocation39_spill] sm:$0xff] }
 0x790   : > { %8079 = vmatpush3.bf16.msra.mxu1 %v11041_v26  ;;  %8095 = vmatprep.subr.bf16.mxu0 %v11042_v10  ;;  %v11060_v10 = vld [vmem:[#allocation42_spill] sm:$0xff] }
 0x791   : > { %8080 = vmatprep.subr.bf16.mxu1 %v10881_v15 }
 0x793   : > { %8097 = vmatpush1.bf16.msra.mxu0 %v11043_v53  ;;  %v11061_v53 = vld [vmem:[#allocation45_spill] sm:$0xff] }
 0x794   : > { %8082 = vmatpush3.bf16.msra.mxu1 %v11044_v27  ;;  %8099 = vmatprep.subr.bf16.mxu0 %v11045_v5  ;;  %v11062_v5 = vld [vmem:[#allocation48_spill] sm:$0xff] }
 0x795   : > { %8083 = vmatprep.subr.bf16.mxu1 %v10881_v15 }
 0x797   : > { %8101 = vmatpush1.bf16.msra.mxu0 %v11046_v22  ;;  %v11063_v22 = vld [vmem:[#allocation51_spill] sm:$0xff] }
 0x798   : > { %8085 = vmatpush3.bf16.msra.mxu1 %v11047_v40  ;;  %8103 = vmatprep.subr.bf16.mxu0 %v11048_v16 }
 0x799   : > { %8118 = vmatprep.subr.bf16.mxu1 %v10881_v15 }
 0x79b   : > { %6792 = vmatmul.mubr.f32.vlgmr.msra.gmra.mrb[72].mxu1 %v4037_v46  ;;  %8105 = vmatpush1.bf16.msra.mxu0 %v11049_v20  ;;  %v11057_v46 = vld [vmem:[#allocation49_spill] sm:$0xff] }
 0x79c   : > { %8120 = vmatpush3.bf16.msra.mxu1 %v11050_v17  ;;  %8107 = vmatprep.subr.bf16.mxu0 %v11051_v51  ;;  %v11064_v51 = vld [vmem:[#allocation76_spill] sm:$0xff] }
 0x79d   : > { %8121 = vmatprep.subr.bf16.mxu1 %v10881_v15  ;;  %6826 = vmatprep.mubr.msk.f32.mxu1 %vm8887_vm1, %v10851_v42 }
 0x79f   : > { %8109 = vmatpush1.bf16.msra.mxu0 %v11052_v36 }
 0x7a0   : > { %8123 = vmatpush3.bf16.msra.mxu1 %v11053_v47  ;;  %8111 = vmatprep.subr.bf16.mxu0 %v11054_v63 }
 0x7a1   : > { %8124 = vmatprep.subr.bf16.mxu1 %v10881_v15 }
 0x7a3   : > { %8113 = vmatpush1.bf16.msra.mxu0 %v11055_v57 }
 0x7a4   : > { %8126 = vmatpush3.bf16.msra.mxu1 %v11056_v6  ;;  %8115 = vmatprep.subr.bf16.mxu0 %v11057_v46 }
 0x7a5   : > { %8127 = vmatprep.subr.bf16.mxu1 %v10881_v15 }
 0x7a7   : > { %8117 = vmatpush1.bf16.msra.mxu0 %v11058_v18 }
 0x7a8   : > { %8129 = vmatpush3.bf16.msra.mxu1 %v11059_v50  ;;  %8142 = vmatprep.subr.bf16.mxu0 %v10881_v15 }
 0x7a9   : > { %8130 = vmatprep.subr.bf16.mxu1 %v10881_v15 }
 0x7ac   : > { %8132 = vmatpush3.bf16.msra.mxu1 %v11060_v10 }
 0x7ad   : > { %8133 = vmatprep.subr.bf16.mxu1 %v10881_v15 }
 0x7b0   : > { %8135 = vmatpush3.bf16.msra.mxu1 %v11061_v53 }
 0x7b1   : > { %8136 = vmatprep.subr.bf16.mxu1 %v10881_v15 }
 0x7b4   : > { %8138 = vmatpush3.bf16.msra.mxu1 %v11062_v5 }
 0x7b5   : > { %8139 = vmatprep.subr.bf16.mxu1 %v10881_v15 }
 0x7b8   : > { %8141 = vmatpush3.bf16.msra.mxu1 %v11063_v22 }
 0x7b9   : > { %8198 = vmatprep.subr.bf16.mxu1 %v10881_v15 }
 0x81d   : > { %v4110_v16 = vpop.f32.mrb[12].mxu0  ;;  %v4181_v20 = vpop.f32.mrb[68].mxu1 }
 0x81e   : > { %v8258_v17 = vadd.f32 %v4110_v16, %v10913_v32  ;;  %v4187_v36 = vadd.f32 %v4181_v20, %v11064_v51  ;;  %v4112_v47 = vpop.f32.mrb[13].mxu0  ;;  %v6688_v63 = vpop.f32.mrb[69].mxu1 }
 0x81f   : > { %v8259_v57 = vadd.f32 %v4112_v47, %v9723_v2  ;;  %v11065_v47 = vld [vmem:[#allocation77_spill] sm:$0xff] }
 0x820   : > { %v4259_v6 = vmul.f32 0.5, %v8258_v17 }
 0x821   : > { %v4263_v46 = vmul.f32 0.5, %v8259_v57 }
 0x822   : > { %8553 = vtanh.f32 %v4259_v6 }
 0x823   : > { %8555 = vtanh.f32 %v4263_v46 }
 0x824   : > { %8557 = vtanh.f32 %v4187_v36 }
 0x82c   : > { %v8554_v18 = vpop.eup %8553 }
 0x82d   : > { %v8556_v50 = vpop.eup %8555  ;;  %v4261_v10 = vmul.f32 0.5, %v8554_v18 }
 0x82e   : > { %v4265_v53 = vmul.f32 0.5, %v8556_v50  ;;  %v8558_v22 = vpop.eup %8557  ;;  %v11066_v50 = vld [vmem:[#allocation82_spill] sm:$0xff] }
 0x82f   : > { %v4262_v5 = vadd.f32 0.5, %v4261_v10 }
 0x830   : > { %v4266_v40 = vadd.f32 0.5, %v4265_v53 }
 0x831   : > { %v4269_v27 = vmul.f32 %v8558_v22, %v4262_v5 }
 0x832   : > { %v4268_v16 = vmul.f32 %v4266_v40, %v10360_v30 }
 0x834   : > { %v10484_v20 = vadd.f32 %v4269_v27, %v4268_v16 }
 0x83d   : > { %v4254_v51 = vpop.f32.mrb[44].mxu0 }
 0x83e   : > { %v4258_v17 = vadd.f32 %v4254_v51, %v11065_v47  ;;  %v6723_v63 = vpop.f32.mrb[45].mxu0 }
 0x840   : > { %v4271_v57 = vmul.f32 0.5, %v4258_v17 }
 0x842   : > { %8559 = vtanh.f32 %v4271_v57 }
 0x843   : > { %8561 = vtanh.f32 %v10484_v20 }
 0x84c   : > { %v8560_v36 = vpop.eup %8559 }
 0x84d   : > { %v4273_v6 = vmul.f32 0.5, %v8560_v36  ;;  %v8562_v5 = vpop.eup %8561 }
 0x84e   : > { %v4420_v46 = vpop.f32.mrb[70].mxu1 }
 0x84f   : > { %v4274_v18 = vadd.f32 0.5, %v4273_v6  ;;  %v4426_v10 = vadd.f32 %v4420_v46, %v11066_v50  ;;  %v6758_v53 = vpop.f32.mrb[71].mxu1 }
 0x851   : > { %v4276_v30 = vmul.f32 %v8562_v5, %v4274_v18 }
 0x853   : > { %5255 = vst [vmem:[%s9251_s30 + $0x30] sm:$0xff] %v4276_v30  ;;  %4587 = vmatmul.mubr.f32.vlgmr.msra.gmra.mrb[14].mxu0 %v4276_v30  ;;  %6827 = vmatmul.mubr.f32.vlgmr.msra.gmra.mrb[74].mxu1 %v4276_v30 }
 0x854   : > { %8144 = vmatpush3.bf16.msra.mxu0 %v9418_v28  ;;  %8200 = vmatpush3.bf16.msra.mxu1 %v9422_v29 }
 0x855   : > { %8145 = vmatprep.subr.bf16.mxu0 %v10881_v15  ;;  %8201 = vmatprep.subr.bf16.mxu1 %v10881_v15 }
 0x856   : > { %6861 = vmatprep.mubr.msk.f32.mxu0 %vm8887_vm1, %v10851_v42  ;;  %6896 = vmatprep.mubr.msk.f32.mxu1 %vm8887_vm1, %v10851_v42 }
 0x858   : > { %8147 = vmatpush3.bf16.msra.mxu0 %v9431_v35  ;;  %8203 = vmatpush3.bf16.msra.mxu1 %v9435_v38 }
 0x859   : > { %8148 = vmatprep.subr.bf16.mxu0 %v10881_v15  ;;  %8204 = vmatprep.subr.bf16.mxu1 %v10881_v15 }
 0x85c   : > { %8150 = vmatpush3.bf16.msra.mxu0 %v9443_v44  ;;  %8206 = vmatpush3.bf16.msra.mxu1 %v9447_v45 }
 0x85d   : > { %v4349_v28 = vpop.f32.mrb[18].mxu0  ;;  %8151 = vmatprep.subr.bf16.mxu0 %v10881_v15  ;;  %8207 = vmatprep.subr.bf16.mxu1 %v10881_v15 }
 0x85e   : > { %v8264_v29 = vadd.f32 %v4349_v28, %v9753_v33  ;;  %v4351_v27 = vpop.f32.mrb[19].mxu0 }
 0x85f   : > { %v8265_v35 = vadd.f32 %v4351_v27, %v9756_v37 }
 0x860   : > { %v4498_v40 = vmul.f32 0.5, %v8264_v29  ;;  %8153 = vmatpush3.bf16.msra.mxu0 %v9451_v54  ;;  %8209 = vmatpush3.bf16.msra.mxu1 %v9455_v55 }
 0x861   : > { %v4502_v38 = vmul.f32 0.5, %v8265_v35  ;;  %8154 = vmatprep.subr.bf16.mxu0 %v10881_v15  ;;  %8210 = vmatprep.subr.bf16.mxu1 %v10881_v15 }
 0x862   : > { %8563 = vtanh.f32 %v4498_v40 }
 0x863   : > { %8565 = vtanh.f32 %v4502_v38 }
 0x864   : > { %8156 = vmatpush3.bf16.msra.mxu0 %v9459_v0  ;;  %8212 = vmatpush3.bf16.msra.mxu1 %v9463_v1  ;;  %8567 = vtanh.f32 %v4426_v10  ;;  %v11072_v10 = vld [vmem:[#allocation80_spill] sm:$0xff] }
 0x865   : > { %8157 = vmatprep.subr.bf16.mxu0 %v10881_v15  ;;  %8213 = vmatprep.subr.bf16.mxu1 %v10881_v15 }
 0x868   : > { %8159 = vmatpush3.bf16.msra.mxu0 %v9467_v13  ;;  %8215 = vmatpush3.bf16.msra.mxu1 %v9471_v14  ;;  %v11067_v13 = vld [vmem:[#allocation83_spill] sm:$0xff] }
 0x869   : > { %8160 = vmatprep.subr.bf16.mxu0 %v10881_v15  ;;  %8216 = vmatprep.subr.bf16.mxu1 %v10881_v15 }
 0x86c   : > { %v8564_v44 = vpop.eup %8563  ;;  %8162 = vmatpush3.bf16.msra.mxu0 %v9475_v24  ;;  %8218 = vmatpush3.bf16.msra.mxu1 %v9479_v31 }
 0x86d   : > { %v8566_v45 = vpop.eup %8565  ;;  %v4500_v54 = vmul.f32 0.5, %v8564_v44  ;;  %8163 = vmatprep.subr.bf16.mxu0 %v10881_v15  ;;  %8219 = vmatprep.subr.bf16.mxu1 %v10881_v15 }
 0x86e   : > { %v4504_v55 = vmul.f32 0.5, %v8566_v45  ;;  %v4493_v0 = vpop.f32.mrb[72].mxu1  ;;  %v8568_v16 = vpop.eup %8567 }
 0x86f   : > { %v4501_v1 = vadd.f32 0.5, %v4500_v54  ;;  %v4497_v14 = vadd.f32 %v4493_v0, %v11067_v13  ;;  %v6793_v22 = vpop.f32.mrb[73].mxu1 }
 0x870   : > { %v4505_v51 = vadd.f32 0.5, %v4504_v55  ;;  %8165 = vmatpush3.bf16.msra.mxu0 %v9483_v43  ;;  %8221 = vmatpush3.bf16.msra.mxu1 %v9487_v48 }
 0x871   : > { %v4508_v24 = vmul.f32 %v8568_v16, %v4501_v1  ;;  %v4510_v31 = vmul.f32 0.5, %v4497_v14  ;;  %8167 = vmatprep.subr.bf16.mxu0 %v9489_v49  ;;  %8222 = vmatprep.subr.bf16.mxu1 %v10881_v15 }
 0x872   : > { %v4507_v47 = vmul.f32 %v4505_v51, %v10406_v39 }
 0x873   : > { %8569 = vtanh.f32 %v4510_v31  ;;  %6862 = vmatmul.mubr.f32.vlgmr.msra.gmra.mrb[46].mxu0 %v4276_v30 }
 0x874   : > { %v10530_v17 = vadd.f32 %v4508_v24, %v4507_v47  ;;  %8169 = vmatpush1.bf16.msra.mxu0 %v9495_v3  ;;  %4825 = vmatprep.mubr.f32.mxu0 %v10851_v42 }
 0x875   : > { %8171 = vmatprep.subr.bf16.mxu0 %v9501_v11  ;;  %v11068_v11 = vld [vmem:[#allocation64_spill] sm:$0xff] }
 0x876   : > { %8571 = vtanh.f32 %v10530_v17 }
 0x878   : > { %8173 = vmatpush1.bf16.msra.mxu0 %v9507_v34  ;;  %v11069_v34 = vld [vmem:[#allocation65_spill] sm:$0xff] }
 0x879   : > { %8175 = vmatprep.subr.bf16.mxu0 %v10882_v41 }
 0x87c   : > { %8177 = vmatpush1.bf16.msra.mxu0 %v10883_v58 }
 0x87d   : > { %v8570_v43 = vpop.eup %8569  ;;  %8179 = vmatprep.subr.bf16.mxu0 %v10884_v7 }
 0x87e   : > { %v4512_v48 = vmul.f32 0.5, %v8570_v43 }
 0x880   : > { %v8572_v49 = vpop.eup %8571  ;;  %v4513_v39 = vadd.f32 0.5, %v4512_v48  ;;  %8181 = vmatpush1.bf16.msra.mxu0 %v10885_v56 }
 0x881   : > { %8183 = vmatprep.subr.bf16.mxu0 %v10886_v60 }
 0x882   : > { %v4515_v3 = vmul.f32 %v8572_v49, %v4513_v39 }
 0x884   : > { %5256 = vst [vmem:[%s9253_s9 + $0x8] sm:$0xff] %v4515_v3  ;;  %8185 = vmatpush1.bf16.msra.mxu0 %v9540_v21  ;;  %6897 = vmatmul.mubr.f32.vlgmr.msra.gmra.mrb[76].mxu1 %v4515_v3 }
 0x885   : > { %8224 = vmatpush3.bf16.msra.mxu1 %v10887_v19  ;;  %8187 = vmatprep.subr.bf16.mxu0 %v10888_v62 }
 0x886   : > { %8225 = vmatprep.subr.bf16.mxu1 %v10881_v15  ;;  %6931 = vmatprep.mubr.msk.f32.mxu1 %vm8887_vm1, %v10851_v42 }
 0x888   : > { %8189 = vmatpush1.bf16.msra.mxu0 %v9550_v25 }
 0x889   : > { %8227 = vmatpush3.bf16.msra.mxu1 %v10889_v59  ;;  %8191 = vmatprep.subr.bf16.mxu0 %v9556_v9  ;;  %v11070_v9 = vld [vmem:[#allocation78_spill] sm:$0xff] }
 0x88a   : > { %8228 = vmatprep.subr.bf16.mxu1 %v10881_v15 }
 0x88c   : > { %8193 = vmatpush1.bf16.msra.mxu0 %v9560_v23 }
 0x88d   : > { %8230 = vmatpush3.bf16.msra.mxu1 %v10890_v12  ;;  %8195 = vmatprep.subr.bf16.mxu0 %v9566_v61 }
 0x88e   : > { %8231 = vmatprep.subr.bf16.mxu1 %v10881_v15 }
 0x890   : > { %8197 = vmatpush1.bf16.msra.mxu0 %v9570_v8 }
 0x891   : > { %8233 = vmatpush3.bf16.msra.mxu1 %v10891_v52 }
 0x892   : > { %8234 = vmatprep.subr.bf16.mxu1 %v10881_v15 }
 0x893   : > { %4826 = vmatmul.mubr.f32.vlgmr.msra.gmra.mrb[16].mxu0 %v4515_v3 }
 0x895   : > { %8236 = vmatpush3.bf16.msra.mxu1 %v11038_v4 }
 0x896   : > { %8237 = vmatprep.subr.bf16.mxu1 %v10881_v15 }
 0x899   : > { %8239 = vmatpush3.bf16.msra.mxu1 %v11041_v26  ;;  %v11071_v26 = vld [vmem:[#allocation79_spill] sm:$0xff] }
 0x89a   : > { %8240 = vmatprep.subr.bf16.mxu1 %v10881_v15 }
 0x89d   : > { %8242 = vmatpush3.bf16.msra.mxu1 %v11068_v11 }
 0x89e   : > { %8243 = vmatprep.subr.bf16.mxu1 %v10881_v15 }
 0x8a1   : > { %8245 = vmatpush3.bf16.msra.mxu1 %v11069_v34 }
 0x8a4   : > { %6932 = vmatmul.mubr.f32.vlgmr.msra.gmra.mrb[78].mxu1 %v4515_v3 }
 0x926   : > { %v4588_v21 = vpop.f32.mrb[14].mxu0  ;;  %v4659_v8 = vpop.f32.mrb[74].mxu1 }
 0x927   : > { %v8260_v25 = vadd.f32 %v4588_v21, %v10913_v32  ;;  %v4665_v23 = vadd.f32 %v4659_v8, %v11070_v9  ;;  %v4590_v61 = vpop.f32.mrb[15].mxu0  ;;  %v6828_v42 = vpop.f32.mrb[75].mxu1 }
 0x928   : > { %v8261_v41 = vadd.f32 %v4590_v61, %v9723_v2 }
 0x929   : > { %v4737_v58 = vmul.f32 0.5, %v8260_v25 }
 0x92a   : > { %v4741_v7 = vmul.f32 0.5, %v8261_v41 }
 0x92b   : > { %8573 = vtanh.f32 %v4737_v58 }
 0x92c   : > { %8575 = vtanh.f32 %v4741_v7 }
 0x92d   : > { %8577 = vtanh.f32 %v4665_v23 }
 0x935   : > { %v8574_v56 = vpop.eup %8573 }
 0x936   : > { %v8576_v15 = vpop.eup %8575  ;;  %v4739_v60 = vmul.f32 0.5, %v8574_v56 }
 0x937   : > { %v4743_v19 = vmul.f32 0.5, %v8576_v15  ;;  %v8578_v59 = vpop.eup %8577 }
 0x938   : > { %v4740_v62 = vadd.f32 0.5, %v4739_v60 }
 0x939   : > { %v4744_v12 = vadd.f32 0.5, %v4743_v19 }
 0x93a   : > { %v4747_v52 = vmul.f32 %v8578_v59, %v4740_v62 }
 0x93b   : > { %v4746_v32 = vmul.f32 %v4744_v12, %v10484_v20 }
 0x93d   : > { %v4748_v4 = vadd.f32 %v4747_v52, %v4746_v32 }
 0x93f   : > { %4996 = vst [vmem:[#allocation5] sm:$0xff] %v4748_v4 }
 0x946   : > { %v4732_v2 = vpop.f32.mrb[46].mxu0 }
 0x947   : > { %v4736_v63 = vadd.f32 %v4732_v2, %v11071_v26  ;;  %v6863_v57 = vpop.f32.mrb[47].mxu0 }
 0x949   : > { %v4749_v36 = vmul.f32 0.5, %v4736_v63 }
 0x94b   : > { %8579 = vtanh.f32 %v4749_v36 }
 0x94c   : > { %8581 = vtanh.f32 %v4748_v4 }
 0x955   : > { %v8580_v6 = vpop.eup %8579 }
 0x956   : > { %v4751_v46 = vmul.f32 0.5, %v8580_v6  ;;  %v8582_v5 = vpop.eup %8581 }
 0x957   : > { %v4898_v18 = vpop.f32.mrb[76].mxu1 }
 0x958   : > { %v4752_v50 = vadd.f32 0.5, %v4751_v46  ;;  %v4904_v20 = vadd.f32 %v4898_v18, %v11072_v10  ;;  %v6898_v53 = vpop.f32.mrb[77].mxu1 }
 0x95a   : > { %v4754_v30 = vmul.f32 %v8582_v5, %v4752_v50 }
 0x95c   : > { %5257 = vst [vmem:[%s9251_s30 + $0x38] sm:$0xff] %v4754_v30  ;;  %4995 = vst [vmem:[#allocation4] sm:$0xff] %v4754_v30 }
 0x95d   : > { %8750 = shalt.err (!%p8747_p8)
}
 0x95e   : > { %s8751_s24 = scalar_lea.hbm %s10578_s12, 1024  ;;  %s8755_s19 = scalar_lea.hbm %s10690_s5, 2048 }
 0x95f   : > { %p8752_p12 = scmp.ne.s32.totalorder %s10578_s12, %s8751_s24  ;;  %p8756_p10 = scmp.lt.u32.totalorder %s10578_s12, %s10690_s5 }
 0x960   : > { %p8757_p2 = scmp.lt.u32.totalorder %s8755_s19, %s8751_s24  ;;  %p8759_p3 = scmp.lt.u32.totalorder %s8751_s24, %s10578_s12 }
 0x961   : > { %p8753_p7 = pnand %p8752_p12, %p11073_p13 }
 0x962   : > { %p8758_p1 = por %p8757_p2, %p8756_p10 }
 0x963   : > { %p8754_p9 = pneg %p8753_p7 }
 0x964   : > { %p8760_p6 = por %p8759_p3, %p8758_p1 }
 0x966   : > { %p8761_p0 = pnand %p8760_p6, %p8754_p9 }
 0x968   : > { %8764 = shalt.err (!%p8761_p0)
}
 0x969   : > { %s8889_s29 = smov 128   ;;  %s8890_s6 = smov 8   ;;  %v4827_v28 = vpop.f32.mrb[16].mxu0  ;;  %v11074_v13 = vld [vmem:[#allocation81_spill] sm:$0xff] }
 0x96a   : > { %8326 = dma.vmem_to_hbm [thread:$0]  (%p11073_p13), %s10580_s21, 1024, %s10578_s12, %s5000_s18, %s8889_s29, %s8889_s29, %s8890_s6   ;;  %v8262_v29 = vadd.f32 %v4827_v28, %v9753_v33  ;;  %v4829_v27 = vpop.f32.mrb[17].mxu0 }
 0x96b   : > { %v8263_v35 = vadd.f32 %v4829_v27, %v9756_v37  ;;  %s5028_s8 = ssub.s32 1, %s8963_s28  ;;  %s5035_s21 = sshll.u32 %s9253_s9, 4  ;;  %s10621_s21 = int_to_ptr.vmem [resolvable:$true] %s5035_s21 }
 0x96c   : > { %v4976_v40 = vmul.f32 0.5, %v8262_v29  ;;  %s5269_s17 = sshll.u32 %s5028_s8, 10  ;;  %s11075_s13 = sld [smem:[#allocation96_spill]] }
 0x96d   : > { %v4980_v38 = vmul.f32 0.5, %v8263_v35  ;;  %s10626_s28 = scalar_lea.sflag [#allocation19], %s316_s10  ;;  %s8765_s30 = scalar_lea.vmem %s10621_s21, 1024 }
 0x96e   : > { %8583 = vtanh.f32 %v4976_v40  ;;  %p8766_p13 = scmp.ne.s32.totalorder %s10621_s21, %s8765_s30  ;;  %p11076_p4 = scmp.ne.s32.totalorder %s10803_s14, 0 }
 0x96f   : > { %8585 = vtanh.f32 %v4980_v38  ;;  %s8891_s7 = smov [#allocation18]  }
 0x970   : > { %8587 = vtanh.f32 %v4904_v20  ;;  %p8767_p5 = pnand %p8766_p13, %p11076_p4  ;;  %s8769_s19 = sshll.u32 %s8891_s7, 4  ;;  %s8770_s19 = int_to_ptr.vmem [resolvable:$false] %s8769_s19 }
 0x971   : > { %s8771_s15 = scalar_lea.vmem %s8770_s19, 2048  ;;  %p8772_p8 = scmp.lt.s32.totalorder %s10621_s21, %s8770_s19 }
 0x972   : > { %s10619_s24 = scalar_lea.hbm %s11075_s13, %s5269_s17  ;;  %p8768_p11 = pneg %p8767_p5 }
 0x973   : > { %p8773_p12 = scmp.lt.s32.totalorder %s8771_s15, %s8765_s30 }
 0x975   : > { %p8774_p7 = por %p8773_p12, %p8772_p8 }
 0x977   : > { %v4971_v0 = vpop.f32.mrb[78].mxu1  ;;  %p8775_p9 = pnand %p8774_p7, %p8768_p11 }
 0x978   : > { %v8584_v44 = vpop.eup %8583  ;;  %v4975_v14 = vadd.f32 %v4971_v0, %v11074_v13  ;;  %v6933_v22 = vpop.f32.mrb[79].mxu1 }
 0x979   : > { %v8586_v45 = vpop.eup %8585  ;;  %v4978_v54 = vmul.f32 0.5, %v8584_v44 }
 0x97a   : > { %v4982_v55 = vmul.f32 0.5, %v8586_v45  ;;  %v8588_v33 = vpop.eup %8587  ;;  %v4988_v37 = vmul.f32 0.5, %v4975_v14 }
 0x97b   : > { %v4979_v1 = vadd.f32 0.5, %v4978_v54 }
 0x97c   : > { %v4983_v16 = vadd.f32 0.5, %v4982_v55  ;;  %8589 = vtanh.f32 %v4988_v37 }
 0x97d   : > { %v4986_v51 = vmul.f32 %v8588_v33, %v4979_v1 }
 0x97e   : > { %v4985_v24 = vmul.f32 %v4983_v16, %v10530_v17 }
 0x980   : > { %v4987_v31 = vadd.f32 %v4986_v51, %v4985_v24 }
 0x982   : > { %8591 = vtanh.f32 %v4987_v31  ;;  %4998 = vst [vmem:[#allocation7] sm:$0xff] %v4987_v31 }
 0x986   : > { %v8590_v47 = vpop.eup %8589 }
 0x987   : > { %v4990_v43 = vmul.f32 0.5, %v8590_v47 }
 0x989   : > { %v4991_v49 = vadd.f32 0.5, %v4990_v43 }
 0x98c   : > { %v8592_v48 = vpop.eup %8591 }
 0x98d   : > { %v4993_v39 = vmul.f32 %v8592_v48, %v4991_v49 }
 0x98f   : > { %4994 = vst [vmem:[%s9253_s9] sm:$0xff] %v4993_v39  ;;  %4997 = vst [vmem:[#allocation6] sm:$0xff] %v4993_v39 }
 0x990   : > { %8778 = shalt.err (!%p8775_p9)
}
 0x991   : > { %s8779_s10 = scalar_lea.hbm %s10619_s24, 1024  ;;  %s8783_s8 = scalar_lea.hbm %s11075_s13, 2048 }
 0x992   : > { %p8780_p10 = scmp.ne.s32.totalorder %s10619_s24, %s8779_s10  ;;  %p8784_p3 = scmp.lt.u32.totalorder %s10619_s24, %s11075_s13 }
 0x993   : > { %p8785_p6 = scmp.lt.u32.totalorder %s8783_s8, %s8779_s10  ;;  %p8787_p13 = scmp.lt.u32.totalorder %s8779_s10, %s10619_s24 }
 0x994   : > { %p8781_p2 = pnand %p8780_p10, %p11076_p4 }
 0x995   : > { %p8786_p0 = por %p8785_p6, %p8784_p3 }
 0x996   : > { %p8782_p1 = pneg %p8781_p2 }
 0x997   : > { %p8788_p5 = por %p8787_p13, %p8786_p0 }
 0x999   : > { %p8789_p11 = pnand %p8788_p5, %p8782_p1 }
 0x99b   : > { %8792 = shalt.err (!%p8789_p11)
}
 0x99c   : > { %8327 = dma.vmem_to_hbm [thread:$0]  (%p11076_p4), %s10621_s21, 1024, %s10619_s24, %s10626_s28, %s8889_s29, %s8889_s29, %s8890_s6  }
 0x99d PF: > { %s11077_s18 = sld [smem:[#allocation27_spill]]  ;;  %s11078_s30 = sld [smem:[#allocation28_spill]] }
 0x99e   : > { %p11080_p12 = scmp.ge.s32.totalorder %s8871_s27, 2 }
 0x9a3   : > { %s5050_s7 = sand.u32 1, %s11077_s18   ;;  %p11079_p8 = scmp.ne.s32.totalorder %s11078_s30, 0 }
 0x9a4   : > { %s5051_s19 = scalar_lea.sflag [#allocation10], %s5050_s7 }
 0x9a5   : > { %p8348_p7 = pnand %p11080_p12, %p11079_p8 }
 0x9a7   : > { %8838 = dma.done.wait (!%p8348_p7), %s5051_s19, 1024  }
 0x9a8   : > { %8840 = vsyncadd (!%p8348_p7), %s5051_s19, 4294966272  ;;  %s11081_s15 = sld [smem:[#allocation26_spill]]  ;;  %s11082_s14 = sld [smem:[#allocation29_spill]] }
 0x9a9   : > { %p11084_p10 = pmov %p11080_p12 }
 0x9ae   : > { %s5059_s10 = sand.u32 1, %s11081_s15   ;;  %p11083_p9 = scmp.ne.s32.totalorder %s11082_s14, 0 }
 0x9af   : > { %s5060_s9 = scalar_lea.sflag [#allocation19], %s5059_s10 }
 0x9b0   : > { %p8351_p2 = pnand %p11084_p10, %p11083_p9 }
 0x9b2   : > { %8842 = dma.done.wait (!%p8351_p2), %s5060_s9, 1024  }
 0x9b3   : > { %8844 = vsyncadd (!%p8351_p2), %s5060_s9, 4294966272  ;;  %p27_p4 = scmp.ge.s32.totalorder %s9149_s20, 4   ;;  %s11085_s21 = smov %s8851_s22 }
 0x9b4   : > { %s11086_s22 = smov %s8855_s23  ;;  %s11087_s23 = smov %s9173_s16 }
 0x9b5   : > { %s11088_s24 = smov %s8863_s25  ;;  %s11089_s25 = smov %s8867_s26 }
 0x9b6   : > { %s11090_s26 = smov %s9159_s11  ;;  %s11091_s27 = smov %s9149_s20 }
 0x9b7   :  { %29 = sbr.rel (!%p27_p4) target bundleno = 15 (0xf), region = 148 }
 0x9be   :  { %5065 = vsyncpa [#allocation9], 1 }
 0x9bf   :  { %5067 = vsyncpa [#allocation9 + $0x1], 1 }
 0x9c0   :  { %5068 = vsyncpa [#allocation12], 1 }
 0x9c1   :  { %5070 = vsyncpa [#allocation12 + $0x1], 1 }
 0x9c2   :  { %5071 = vsyncpa [#allocation15], 1 }
 0x9c3   :  { %5072 = vsyncpa [#allocation10], 1 }
 0x9c4   :  { %5074 = vsyncpa [#allocation10 + $0x1], 1 }
 0x9c5   :  { %5075 = vsyncpa [#allocation19], 1 }
 0x9c6   :  { %5077 = vsyncpa [#allocation19 + $0x1], 1 }

</bundles_post_ra>
